<compile_context>
chip_gen: v7x
topology: tpu7x:2x2x1
jax: 0.10.0
libtpu: 0.0.40
codegen_flags: <defaults>
</compile_context>

<pallas_src>
import functools

import jax
import jax.numpy as jnp
from jax.experimental import pallas as pl
from jax.experimental.pallas import tpu as pltpu

_LN_EPS = 1e-5


def _layernorm(v, g, b):
    mu = jnp.mean(v, axis=-1, keepdims=True)
    var = jnp.mean((v - mu) ** 2, axis=-1, keepdims=True)
    return (v - mu) * jax.lax.rsqrt(var + _LN_EPS) * g + b


def _erf(x):
    # Abramowitz & Stegun 7.1.26, |err| < 1.5e-7.  Uses only exp/div/mul/add/
    # select, which all lower on the TPU VPU/EUP (no dependence on a lax.erf
    # Mosaic lowering rule).
    p = 0.3275911
    a1, a2, a3, a4, a5 = (0.254829592, -0.284496736, 1.421413741,
                          -1.453152027, 1.061405429)
    ax = jnp.abs(x)
    t = 1.0 / (1.0 + p * ax)
    poly = ((((a5 * t + a4) * t + a3) * t + a2) * t + a1) * t
    y = 1.0 - poly * jnp.exp(-ax * ax)
    return jnp.where(x >= 0.0, y, -y)


def _gelu_exact(x):
    # nn.GELU() (exact erf form), to 1e-7 erf accuracy.
    return 0.5 * x * (1.0 + _erf(x * 0.7071067811865476))


# ----------------------------------------------------------------------------
# Fused embedding kernel:
#   out = Linear(relu(Linear(feat))) + Linear(lapl)       (node emb + pos emb)
# ----------------------------------------------------------------------------
def _embed_kernel(feat_ref, lapl_ref, w1_ref, b1_ref, w2_ref, b2_ref,
                  wp_ref, bp_ref, o_ref):
    bf16 = jnp.bfloat16
    f = feat_ref[...].astype(bf16)
    l = lapl_ref[...].astype(bf16)
    h = jnp.dot(f, w1_ref[...], preferred_element_type=jnp.float32) + b1_ref[...]
    h = jnp.maximum(h, 0.0)
    node = jnp.dot(h.astype(bf16), w2_ref[...],
                   preferred_element_type=jnp.float32) + b2_ref[...]
    pos = jnp.dot(l, wp_ref[...], preferred_element_type=jnp.float32) + bp_ref[...]
    o_ref[...] = node + pos


def _embed(node_feat, lapl, p):
    """node_feat (M, F), lapl (M, P) -> (M, dim). Memory-bound: 1024-row tiles."""
    M, F = node_feat.shape
    P = lapl.shape[1]
    dim = p["emb_w2"].shape[1]
    tm = M if M <= 1024 else 1024
    grid = (pl.cdiv(M, tm),)

    def row_spec(n):
        return pl.BlockSpec((tm, n), lambda i: (i, 0))

    def full_spec(w):
        return pl.BlockSpec(w.shape, lambda i, _nd=w.ndim: (0,) * _nd)

    weights = [p["emb_w1"], p["emb_b1"], p["emb_w2"], p["emb_b2"],
               p["pos_w"], p["pos_b"]]

    return pl.pallas_call(
        _embed_kernel,
        out_shape=jax.ShapeDtypeStruct((M, dim), jnp.float32),
        grid=grid,
        in_specs=[row_spec(F), row_spec(P)] + [full_spec(w) for w in weights],
        out_specs=row_spec(dim),
        compiler_params=pltpu.CompilerParams(dimension_semantics=("parallel",)),
    )(node_feat, lapl, *weights)


# ----------------------------------------------------------------------------
# Transformer stack: grid = (batch tiles ["parallel"], depth ["arbitrary"]).
# x lives in the resident output block across the depth axis; per-layer weights
# are streamed (block index = d) and double-buffered by the Pallas pipeline.
# ----------------------------------------------------------------------------
def _stack_kernel(x_ref, adj_ref,
                  ln1g_ref, ln1b_ref, wqkv_ref, wg_ref, bg_ref,
                  wpj_ref, bpj_ref, ln2g_ref, ln2b_ref,
                  wm1_ref, bm1_ref, wm2_ref, bm2_ref,
                  o_ref, qkv_sc, cat_sc, *, num_heads, seq_real):
    H = num_heads
    bt = adj_ref.shape[0]
    Sp = adj_ref.shape[1]
    C = x_ref.shape[-1]
    scale = C ** (-0.5)                              # dim ** -0.5 as in reference
    bf16 = jnp.bfloat16
    d = pl.program_id(1)

    # Layer 0: load the carried state from the input block (constant index
    # across d, so it is fetched only once per batch tile).
    @pl.when(d == 0)
    def _():
        o_ref[...] = x_ref[...]

    x = o_ref[...]                                   # (bt*Sp, C) f32 carried state

    # ---------------- GraphAttention ----------------
    xn = _layernorm(x, ln1g_ref[0], ln1b_ref[0])
    xn_b = xn.astype(bf16)

    # One wide QKV matmul for all heads / all batch elements in this tile.
    qkv_sc[...] = jnp.dot(xn_b, wqkv_ref[0],
                          preferred_element_type=jnp.float32)   # (bt*Sp, 3*H*C)

    # gamma = exp(Linear(dim, 2)(norm1(x))): two VPU lane reductions, no MXU.
    wg = wg_ref[0]                                   # (2, C)
    bg = bg_ref[0]                                   # (1, 2)
    g0 = jnp.exp(jnp.sum(xn * wg[0:1, :], axis=-1, keepdims=True) + bg[:, 0:1])
    g1 = jnp.exp(jnp.sum(xn * wg[1:2, :], axis=-1, keepdims=True) + bg[:, 1:2])

    # Mask padded key columns out of the softmax (tokens >= seq_real are pad).
    if seq_real < Sp:
        col = jax.lax.broadcasted_iota(jnp.int32, (1, Sp), 1)
        key_mask = jnp.where(col < seq_real, 0.0, -1e30).astype(jnp.float32)
    else:
        key_mask = None

    # Per (batch element, head): (Sp, Sp) score / softmax / A@V core only.
    for bi in range(bt):
        r0 = bi * Sp
        adj_b = adj_ref[bi].astype(jnp.float32)      # bf16 in HBM -> f32 here
        g0_b = g0[r0:r0 + Sp]
        g1_b = g1[r0:r0 + Sp]
        for h in range(H):
            q = qkv_sc[r0:r0 + Sp, h * C:(h + 1) * C].astype(bf16)
            k = qkv_sc[r0:r0 + Sp, (H + h) * C:(H + h + 1) * C].astype(bf16)
            v = qkv_sc[r0:r0 + Sp, (2 * H + h) * C:(2 * H + h + 1) * C].astype(bf16)
            s = jax.lax.dot_general(q, k, (((1,), (1,)), ((), ())),
                                    preferred_element_type=jnp.float32) * scale
            s = g0_b * s + g1_b * adj_b              # fused_mul_add
            if key_mask is not None:
                s = s + key_mask
            m = jnp.max(s, axis=-1, keepdims=True)
            e = jnp.exp(s - m)
            r = pl.reciprocal(jnp.sum(e, axis=-1, keepdims=True), approx=True)
            pr = (e * r).astype(bf16)
            # head-concat written into scratch -> single wide proj matmul below
            cat_sc[r0:r0 + Sp, h * C:(h + 1) * C] = jnp.dot(
                pr, v, preferred_element_type=jnp.float32)

    attn = jnp.dot(cat_sc[...].astype(bf16), wpj_ref[0],
                   preferred_element_type=jnp.float32) + bpj_ref[0]
    x = attn + xn                                    # residual adds norm1(x)

    # ---------------- MLP ----------------
    xn2 = _layernorm(x, ln2g_ref[0], ln2b_ref[0])
    h1 = jnp.dot(xn2.astype(bf16), wm1_ref[0],
                 preferred_element_type=jnp.float32) + bm1_ref[0]
    h1 = _gelu_exact(h1)
    y2 = jnp.dot(h1.astype(bf16), wm2_ref[0],
                 preferred_element_type=jnp.float32) + bm2_ref[0]
    o_ref[...] = y2 + xn2                            # residual adds norm2(x)


def _attention_stack(x_flat, adj_cls, p, *, num_heads, seq_real):
    B, Sp, _ = adj_cls.shape
    C = x_flat.shape[-1]
    D = p["stk_ln1g"].shape[0]
    H = num_heads

    # Batch tile: modest (<=4) and keep >= 2 grid steps when possible (megacore
    # sharding on v7x + pipeline overlap of the next x/adj DMA).
    bt = 1
    for cand in (4, 2):
        if B % cand == 0 and B // cand >= 2:
            bt = cand
            break

    weights = [p["stk_ln1g"], p["stk_ln1b"], p["stk_wqkv"], p["stk_wg"],
               p["stk_bg"], p["stk_wpj"], p["stk_bpj"], p["stk_ln2g"],
               p["stk_ln2b"], p["stk_wm1"], p["stk_bm1"], p["stk_wm2"],
               p["stk_bm2"]]

    def layer_spec(w):
        return pl.BlockSpec((1,) + w.shape[1:], lambda b, d: (d, 0, 0))

    kernel = functools.partial(_stack_kernel, num_heads=H, seq_real=seq_real)
    return pl.pallas_call(
        kernel,
        out_shape=jax.ShapeDtypeStruct((B * Sp, C), jnp.float32),
        grid=(B // bt, D),
        in_specs=[pl.BlockSpec((bt * Sp, C), lambda b, d: (b, 0)),
                  pl.BlockSpec((bt, Sp, Sp), lambda b, d: (b, 0, 0))]
                 + [layer_spec(w) for w in weights],
        out_specs=pl.BlockSpec((bt * Sp, C), lambda b, d: (b, 0)),
        scratch_shapes=[pltpu.VMEM((bt * Sp, 3 * H * C), jnp.float32),
                        pltpu.VMEM((bt * Sp, H * C), jnp.float32)],
        compiler_params=pltpu.CompilerParams(
            dimension_semantics=("parallel", "arbitrary"),
            vmem_limit_bytes=32 * 1024 * 1024),
    )(x_flat, adj_cls, *weights)


# ----------------------------------------------------------------------------
# Fused mlp_head (LayerNorm -> Linear) + projector (3x Linear+GELU -> LN -> Linear)
# ----------------------------------------------------------------------------
def _head_proj_kernel(x_ref,
                      hlng_ref, hlnb_ref, hw_ref, hb_ref,
                      p1w_ref, p1b_ref, p2w_ref, p2b_ref, p3w_ref, p3b_ref,
                      plng_ref, plnb_ref, p4w_ref, p4b_ref,
                      emb_ref, proj_ref):
    bf16 = jnp.bfloat16
    x = _layernorm(x_ref[...], hlng_ref[...], hlnb_ref[...])
    e = jnp.dot(x.astype(bf16), hw_ref[...],
                preferred_element_type=jnp.float32) + hb_ref[...]
    emb_ref[...] = e

    z = jnp.dot(e.astype(bf16), p1w_ref[...],
                preferred_element_type=jnp.float32) + p1b_ref[...]
    z = _gelu_exact(z)
    z = jnp.dot(z.astype(bf16), p2w_ref[...],
                preferred_element_type=jnp.float32) + p2b_ref[...]
    z = _gelu_exact(z)
    z = jnp.dot(z.astype(bf16), p3w_ref[...],
                preferred_element_type=jnp.float32) + p3b_ref[...]
    z = _gelu_exact(z)
    z = _layernorm(z, plng_ref[...], plnb_ref[...])
    proj_ref[...] = jnp.dot(z.astype(bf16), p4w_ref[...],
                            preferred_element_type=jnp.float32) + p4b_ref[...]


def _head_and_projector(x, p):
    B, C = x.shape
    num_classes = p["proj_w4"].shape[1]
    weights = [
        p["head_ln_g"], p["head_ln_b"], p["head_w"], p["head_b"],
        p["proj_w1"], p["proj_b1"], p["proj_w2"], p["proj_b2"],
        p["proj_w3"], p["proj_b3"], p["proj_ln_g"], p["proj_ln_b"],
        p["proj_w4"], p["proj_b4"],
    ]
    bt = B if B <= 256 else 256
    grid = (pl.cdiv(B, bt),)

    def full_spec(w):
        return pl.BlockSpec(w.shape, lambda i, _nd=w.ndim: (0,) * _nd)

    return pl.pallas_call(
        _head_proj_kernel,
        out_shape=(jax.ShapeDtypeStruct((B, C), jnp.float32),
                   jax.ShapeDtypeStruct((B, num_classes), jnp.float32)),
        grid=grid,
        in_specs=[pl.BlockSpec((bt, C), lambda i: (i, 0))]
                 + [full_spec(w) for w in weights],
        out_specs=(pl.BlockSpec((bt, C), lambda i: (i, 0)),
                   pl.BlockSpec((bt, num_classes), lambda i: (i, 0))),
        compiler_params=pltpu.CompilerParams(dimension_semantics=("parallel",)),
    )(x, *weights)


# ----------------------------------------------------------------------------
# Full forward pass (takes PRE-PACKED params from pack_params, done once).
# ----------------------------------------------------------------------------
def graph_transformer_forward(p, node_feat, adj, lapl, *, num_heads):
    B, N, F = node_feat.shape
    P = lapl.shape[-1]
    dim = p["cls_token"].shape[-1]
    S = N + 1
    Sp = ((S + 7) // 8) * 8                          # sublane-aligned token count

    # Fused: to_node_embedding(feat) + to_pos_embedding(lapl)  (node rows)
    nodes = _embed(node_feat.reshape(B * N, F), lapl.reshape(B * N, P),
                   p).reshape(B, N, dim)

    # CLS row: cls_token + cls_pos_embedding; pad tokens to Sp and flatten rows.
    cls_row = jnp.broadcast_to(p["cls_token"] + p["cls_pos"], (B, 1, dim))
    x = jnp.concatenate([cls_row, nodes], axis=1)              # (B, S, dim)
    x = jnp.pad(x, ((0, 0), (0, Sp - S), (0, 0)))              # zero pad rows
    x = x.reshape(B * Sp, dim)

    # adj_cls: zeros with [0,0]=1 and [1:S,1:S]=adj, padded to Sp; bf16 (exact
    # for a 0/1 adjacency) to halve the largest DMA'd operand.
    adj_cls = jnp.pad(adj, ((0, 0), (1, Sp - S), (1, Sp - S)))
    adj_cls = adj_cls.at[:, 0, 0].set(1.0).astype(jnp.bfloat16)

    x = _attention_stack(x, adj_cls, p, num_heads=num_heads, seq_real=S)

    cls = x.reshape(B, Sp, dim)[:, 0]                          # CLS token
    return _head_and_projector(cls, p)                         # (B, dim), (B, classes)


# ----------------------------------------------------------------------------
# Parameter init (PyTorch-like shapes) and one-time packing for the kernels.
# ----------------------------------------------------------------------------
def init_params(key, *, dim, depth, num_heads, mlp_ratio, feat_dim, pos_dim,
                proj_dim, num_classes):
    keys = iter(jax.random.split(key, 64 + depth * 8))

    def nxt():
        return next(keys)

    def w(shape, std=0.05):
        return jax.random.normal(nxt(), shape, jnp.float32) * std

    def zeros(shape):
        return jnp.zeros(shape, jnp.float32)

    def ones(shape):
        return jnp.ones(shape, jnp.float32)

    p = {}
    p["cls_token"] = jax.random.normal(nxt(), (1, 1, dim), jnp.float32)
    p["cls_pos"] = jax.random.normal(nxt(), (1, 1, dim), jnp.float32)

    p["emb_w1"] = w((feat_dim, dim * 2)); p["emb_b1"] = zeros((dim * 2,))
    p["emb_w2"] = w((dim * 2, dim));      p["emb_b2"] = zeros((dim,))
    p["pos_w"] = w((pos_dim, dim));       p["pos_b"] = zeros((dim,))

    hid = dim * mlp_ratio
    blocks = []
    for _ in range(depth):
        blocks.append(dict(
            ln1_g=ones((dim,)), ln1_b=zeros((dim,)),
            # out-feature layout [qkv, head, chan] like the PyTorch .view()
            w_qkv=w((dim, 3 * num_heads * dim)),               # bias=False
            w_gamma=jax.random.uniform(nxt(), (dim, 2), jnp.float32, 0.0, 0.01),
            b_gamma=zeros((2,)),
            w_proj=w((num_heads * dim, dim)), b_proj=zeros((dim,)),
            ln2_g=ones((dim,)), ln2_b=zeros((dim,)),
            w_mlp1=w((dim, hid)), b_mlp1=zeros((hid,)),
            w_mlp2=w((hid, dim)), b_mlp2=zeros((dim,)),
        ))
    p["blocks"] = blocks

    p["head_ln_g"] = ones((dim,)); p["head_ln_b"] = zeros((dim,))
    p["head_w"] = w((dim, dim));   p["head_b"] = zeros((dim,))

    p["proj_w1"] = w((dim, proj_dim));      p["proj_b1"] = zeros((proj_dim,))
    p["proj_w2"] = w((proj_dim, proj_dim)); p["proj_b2"] = zeros((proj_dim,))
    p["proj_w3"] = w((proj_dim, proj_dim)); p["proj_b3"] = zeros((proj_dim,))
    p["proj_ln_g"] = ones((proj_dim,));     p["proj_ln_b"] = zeros((proj_dim,))
    p["proj_w4"] = w((proj_dim, num_classes)); p["proj_b4"] = zeros((num_classes,))
    return p


def pack_params(p):
    """One-time packing (stacking / transposes / bf16 casts) OUTSIDE the jitted
    forward, so no per-call weight reshuffling touches HBM."""
    bf16 = jnp.bfloat16
    dim = p["cls_token"].shape[-1]
    blocks = p["blocks"]
    D = len(blocks)
    hid = blocks[0]["w_mlp1"].shape[1]

    def stack(key):
        return jnp.stack([blk[key] for blk in blocks], axis=0)

    q = {
        "cls_token": p["cls_token"], "cls_pos": p["cls_pos"],
        # embedding + positional embedding
        "emb_w1": p["emb_w1"].astype(bf16), "emb_b1": p["emb_b1"].reshape(1, -1),
        "emb_w2": p["emb_w2"].astype(bf16), "emb_b2": p["emb_b2"].reshape(1, -1),
        "pos_w": p["pos_w"].astype(bf16),   "pos_b": p["pos_b"].reshape(1, -1),
        # attention stack, depth axis leading (streamed per grid step)
        "stk_ln1g": stack("ln1_g").reshape(D, 1, dim),
        "stk_ln1b": stack("ln1_b").reshape(D, 1, dim),
        "stk_wqkv": stack("w_qkv").astype(bf16),                   # (D, C, 3*H*C)
        "stk_wg": jnp.transpose(stack("w_gamma"), (0, 2, 1)),      # (D, 2, C)
        "stk_bg": stack("b_gamma").reshape(D, 1, 2),
        "stk_wpj": stack("w_proj").astype(bf16),                   # (D, H*C, C)
        "stk_bpj": stack("b_proj").reshape(D, 1, dim),
        "stk_ln2g": stack("ln2_g").reshape(D, 1, dim),
        "stk_ln2b": stack("ln2_b").reshape(D, 1, dim),
        "stk_wm1": stack("w_mlp1").astype(bf16),                   # (D, C, hid)
        "stk_bm1": stack("b_mlp1").reshape(D, 1, hid),
        "stk_wm2": stack("w_mlp2").astype(bf16),                   # (D, hid, C)
        "stk_bm2": stack("b_mlp2").reshape(D, 1, dim),
        # mlp_head + projector
        "head_ln_g": p["head_ln_g"].reshape(1, -1),
        "head_ln_b": p["head_ln_b"].reshape(1, -1),
        "head_w": p["head_w"].astype(bf16), "head_b": p["head_b"].reshape(1, -1),
        "proj_w1": p["proj_w1"].astype(bf16), "proj_b1": p["proj_b1"].reshape(1, -1),
        "proj_w2": p["proj_w2"].astype(bf16), "proj_b2": p["proj_b2"].reshape(1, -1),
        "proj_w3": p["proj_w3"].astype(bf16), "proj_b3": p["proj_b3"].reshape(1, -1),
        "proj_ln_g": p["proj_ln_g"].reshape(1, -1),
        "proj_ln_b": p["proj_ln_b"].reshape(1, -1),
        "proj_w4": p["proj_w4"].astype(bf16), "proj_b4": p["proj_b4"].reshape(1, -1),
    }
    return q


if __name__ == "__main__":
    # Small but representative config (B=4 so the batch grid has >= 2 steps).
    B, N = 4, 8
    dim, depth, num_heads, mlp_ratio = 32, 2, 4, 2
    feat_dim, pos_dim, proj_dim, num_classes = 8, 16, 64, 16

    key = jax.random.PRNGKey(0)
    kp, k1, k2, k3 = jax.random.split(key, 4)

    raw = init_params(kp, dim=dim, depth=depth, num_heads=num_heads,
                      mlp_ratio=mlp_ratio, feat_dim=feat_dim, pos_dim=pos_dim,
                      proj_dim=proj_dim, num_classes=num_classes)
    params = jax.tree_util.tree_map(lambda a: a, pack_params(raw))  # packed once

    node_feat = jax.random.normal(k1, (B, N, feat_dim), jnp.float32)
    adj = (jax.random.uniform(k2, (B, N, N)) < 0.3).astype(jnp.float32)
    lapl = jax.random.normal(k3, (B, N, pos_dim), jnp.float32)

    fwd = jax.jit(functools.partial(graph_transformer_forward, num_heads=num_heads))
    emb, proj = fwd(params, node_feat, adj, lapl)
    jax.block_until_ready((emb, proj))
    assert emb.shape == (B, dim) and proj.shape == (B, num_classes)
    print("KERNEL_OK")
</pallas_src>

<mosaic_0001>
module attributes {stable_mosaic.version = 11 : i64} {
  func.func @_embed_kernel(%arg0: i32, %arg1: memref<32x8xf32, #tpu.memory_space<vmem>>, %arg2: memref<32x16xf32, #tpu.memory_space<vmem>>, %arg3: memref<8x64xbf16, #tpu.memory_space<vmem>>, %arg4: memref<1x64xf32, #tpu.memory_space<vmem>>, %arg5: memref<64x32xbf16, #tpu.memory_space<vmem>>, %arg6: memref<1x32xf32, #tpu.memory_space<vmem>>, %arg7: memref<16x32xbf16, #tpu.memory_space<vmem>>, %arg8: memref<1x32xf32, #tpu.memory_space<vmem>>, %arg9: memref<32x32xf32, #tpu.memory_space<vmem>>) attributes {dimension_semantics = [#tpu.dimension_semantics<parallel>], iteration_bounds = array<i64: 1>, scalar_prefetch = 0 : i64, scratch_operands = 0 : i64, tpu.core_type = #tpu.core_type<tc>, window_params = [{transform_indices = @transform_0, window_bounds = array<i64: 32, 8>}, {transform_indices = @transform_1, window_bounds = array<i64: 32, 16>}, {pipeline_mode = #tpu.pipeline_mode<synchronous>, transform_indices = @transform_2, window_bounds = array<i64: 8, 64>}, {pipeline_mode = #tpu.pipeline_mode<synchronous>, transform_indices = @transform_3, window_bounds = array<i64: 1, 64>}, {pipeline_mode = #tpu.pipeline_mode<synchronous>, transform_indices = @transform_4, window_bounds = array<i64: 64, 32>}, {pipeline_mode = #tpu.pipeline_mode<synchronous>, transform_indices = @transform_5, window_bounds = array<i64: 1, 32>}, {pipeline_mode = #tpu.pipeline_mode<synchronous>, transform_indices = @transform_6, window_bounds = array<i64: 16, 32>}, {pipeline_mode = #tpu.pipeline_mode<synchronous>, transform_indices = @transform_7, window_bounds = array<i64: 1, 32>}, {transform_indices = @transform_8, window_bounds = array<i64: 32, 32>}]} {
    %c0 = arith.constant 0 : index
    %c0_0 = arith.constant 0 : index
    %0 = vector.load %arg1[%c0, %c0_0] : memref<32x8xf32, #tpu.memory_space<vmem>>, vector<32x8xf32>
    %1 = arith.truncf %0 : vector<32x8xf32> to vector<32x8xbf16>
    %c0_1 = arith.constant 0 : index
    %c0_2 = arith.constant 0 : index
    %2 = vector.load %arg2[%c0_1, %c0_2] : memref<32x16xf32, #tpu.memory_space<vmem>>, vector<32x16xf32>
    %3 = arith.truncf %2 : vector<32x16xf32> to vector<32x16xbf16>
    %c0_3 = arith.constant 0 : index
    %c0_4 = arith.constant 0 : index
    %4 = vector.load %arg3[%c0_3, %c0_4] : memref<8x64xbf16, #tpu.memory_space<vmem>>, vector<8x64xbf16>
    %cst = arith.constant dense<0.000000e+00> : vector<32x64xf32>
    %5 = tpu.matmul %1, %4, %cst {dimension_numbers = #tpu.dot_dimension_numbers<[1], [0], [0], [1], [0, 0, 1, 1], [], []>} : vector<32x8xbf16>, vector<8x64xbf16>, vector<32x64xf32> -> vector<32x64xf32>
    %c0_5 = arith.constant 0 : index
    %c0_6 = arith.constant 0 : index
    %6 = vector.load %arg4[%c0_5, %c0_6] : memref<1x64xf32, #tpu.memory_space<vmem>>, vector<1x64xf32>
    %7 = vector.broadcast %6 : vector<1x64xf32> to vector<32x64xf32>
    %8 = arith.addf %5, %7 : vector<32x64xf32>
    %cst_7 = arith.constant 0.000000e+00 : f32
    %9 = vector.broadcast %cst_7 : f32 to vector<32x64xf32>
    %10 = arith.maximumf %8, %9 : vector<32x64xf32>
    %11 = arith.truncf %10 : vector<32x64xf32> to vector<32x64xbf16>
    %c0_8 = arith.constant 0 : index
    %c0_9 = arith.constant 0 : index
    %12 = vector.load %arg5[%c0_8, %c0_9] : memref<64x32xbf16, #tpu.memory_space<vmem>>, vector<64x32xbf16>
    %cst_10 = arith.constant dense<0.000000e+00> : vector<32x32xf32>
    %13 = tpu.matmul %11, %12, %cst_10 {dimension_numbers = #tpu.dot_dimension_numbers<[1], [0], [0], [1], [0, 0, 1, 1], [], []>} : vector<32x64xbf16>, vector<64x32xbf16>, vector<32x32xf32> -> vector<32x32xf32>
    %c0_11 = arith.constant 0 : index
    %c0_12 = arith.constant 0 : index
    %14 = vector.load %arg6[%c0_11, %c0_12] : memref<1x32xf32, #tpu.memory_space<vmem>>, vector<1x32xf32>
    %15 = vector.broadcast %14 : vector<1x32xf32> to vector<32x32xf32>
    %16 = arith.addf %13, %15 : vector<32x32xf32>
    %c0_13 = arith.constant 0 : index
    %c0_14 = arith.constant 0 : index
    %17 = vector.load %arg7[%c0_13, %c0_14] : memref<16x32xbf16, #tpu.memory_space<vmem>>, vector<16x32xbf16>
    %cst_15 = arith.constant dense<0.000000e+00> : vector<32x32xf32>
    %18 = tpu.matmul %3, %17, %cst_15 {dimension_numbers = #tpu.dot_dimension_numbers<[1], [0], [0], [1], [0, 0, 1, 1], [], []>} : vector<32x16xbf16>, vector<16x32xbf16>, vector<32x32xf32> -> vector<32x32xf32>
    %c0_16 = arith.constant 0 : index
    %c0_17 = arith.constant 0 : index
    %19 = vector.load %arg8[%c0_16, %c0_17] : memref<1x32xf32, #tpu.memory_space<vmem>>, vector<1x32xf32>
    %20 = vector.broadcast %19 : vector<1x32xf32> to vector<32x32xf32>
    %21 = arith.addf %18, %20 : vector<32x32xf32>
    %22 = arith.addf %16, %21 : vector<32x32xf32>
    %c0_18 = arith.constant 0 : index
    %c0_19 = arith.constant 0 : index
    %23 = vector.load %arg9[%c0_18, %c0_19] : memref<32x32xf32, #tpu.memory_space<vmem>>, vector<32x32xf32>
    tpu.vector_store %arg9[%c0_18, %c0_19], %22 {strides = array<i32>} : memref<32x32xf32, #tpu.memory_space<vmem>>, vector<32x32xf32>,
    return
  }
  func.func @transform_0(%arg0: i32) -> (i32, i32) {
    %c0_i32 = arith.constant 0 : i32
    %c0_i32_0 = arith.constant 0 : i32
    return %arg0, %c0_i32 : i32, i32
  }
  func.func @transform_1(%arg0: i32) -> (i32, i32) {
    %c0_i32 = arith.constant 0 : i32
    %c0_i32_0 = arith.constant 0 : i32
    return %arg0, %c0_i32 : i32, i32
  }
  func.func @transform_2(%arg0: i32) -> (i32, i32) {
    %c0_i32 = arith.constant 0 : i32
    %c0_i32_0 = arith.constant 0 : i32
    %c0_i32_1 = arith.constant 0 : i32
    return %c0_i32, %c0_i32_0 : i32, i32
  }
  func.func @transform_3(%arg0: i32) -> (i32, i32) {
    %c0_i32 = arith.constant 0 : i32
    %c0_i32_0 = arith.constant 0 : i32
    %c0_i32_1 = arith.constant 0 : i32
    return %c0_i32, %c0_i32_0 : i32, i32
  }
  func.func @transform_4(%arg0: i32) -> (i32, i32) {
    %c0_i32 = arith.constant 0 : i32
    %c0_i32_0 = arith.constant 0 : i32
    %c0_i32_1 = arith.constant 0 : i32
    return %c0_i32, %c0_i32_0 : i32, i32
  }
  func.func @transform_5(%arg0: i32) -> (i32, i32) {
    %c0_i32 = arith.constant 0 : i32
    %c0_i32_0 = arith.constant 0 : i32
    %c0_i32_1 = arith.constant 0 : i32
    return %c0_i32, %c0_i32_0 : i32, i32
  }
  func.func @transform_6(%arg0: i32) -> (i32, i32) {
    %c0_i32 = arith.constant 0 : i32
    %c0_i32_0 = arith.constant 0 : i32
    %c0_i32_1 = arith.constant 0 : i32
    return %c0_i32, %c0_i32_0 : i32, i32
  }
  func.func @transform_7(%arg0: i32) -> (i32, i32) {
    %c0_i32 = arith.constant 0 : i32
    %c0_i32_0 = arith.constant 0 : i32
    %c0_i32_1 = arith.constant 0 : i32
    return %c0_i32, %c0_i32_0 : i32, i32
  }
  func.func @transform_8(%arg0: i32) -> (i32, i32) {
    %c0_i32 = arith.constant 0 : i32
    %c0_i32_0 = arith.constant 0 : i32
    return %arg0, %c0_i32 : i32, i32
  }
}

module attributes {stable_mosaic.version = 11 : i64} {
  func.func @_stack_kernel(%arg0: i32, %arg1: i32, %arg2: memref<32x32xf32, #tpu.memory_space<vmem>>, %arg3: memref<2x16x16xbf16, #tpu.memory_space<vmem>>, %arg4: memref<1x1x32xf32, #tpu.memory_space<vmem>>, %arg5: memref<1x1x32xf32, #tpu.memory_space<vmem>>, %arg6: memref<1x32x384xbf16, #tpu.memory_space<vmem>>, %arg7: memref<1x2x32xf32, #tpu.memory_space<vmem>>, %arg8: memref<1x1x2xf32, #tpu.memory_space<vmem>>, %arg9: memref<1x128x32xbf16, #tpu.memory_space<vmem>>, %arg10: memref<1x1x32xf32, #tpu.memory_space<vmem>>, %arg11: memref<1x1x32xf32, #tpu.memory_space<vmem>>, %arg12: memref<1x1x32xf32, #tpu.memory_space<vmem>>, %arg13: memref<1x32x64xbf16, #tpu.memory_space<vmem>>, %arg14: memref<1x1x64xf32, #tpu.memory_space<vmem>>, %arg15: memref<1x64x32xbf16, #tpu.memory_space<vmem>>, %arg16: memref<1x1x32xf32, #tpu.memory_space<vmem>>, %arg17: memref<32x32xf32, #tpu.memory_space<vmem>>, %arg18: memref<32x384xf32, #tpu.memory_space<vmem>>, %arg19: memref<32x128xf32, #tpu.memory_space<vmem>>) attributes {dimension_semantics = [#tpu.dimension_semantics<parallel>, #tpu.dimension_semantics<arbitrary>], iteration_bounds = array<i64: 2, 2>, scalar_prefetch = 0 : i64, scratch_operands = 2 : i64, tpu.core_type = #tpu.core_type<tc>, window_params = [{transform_indices = @transform_0, window_bounds = array<i64: 32, 32>}, {transform_indices = @transform_1, window_bounds = array<i64: 2, 16, 16>}, {transform_indices = @transform_2, window_bounds = array<i64: 1, 1, 32>}, {transform_indices = @transform_3, window_bounds = array<i64: 1, 1, 32>}, {transform_indices = @transform_4, window_bounds = array<i64: 1, 32, 384>}, {transform_indices = @transform_5, window_bounds = array<i64: 1, 2, 32>}, {transform_indices = @transform_6, window_bounds = array<i64: 1, 1, 2>}, {transform_indices = @transform_7, window_bounds = array<i64: 1, 128, 32>}, {transform_indices = @transform_8, window_bounds = array<i64: 1, 1, 32>}, {transform_indices = @transform_9, window_bounds = array<i64: 1, 1, 32>}, {transform_indices = @transform_10, window_bounds = array<i64: 1, 1, 32>}, {transform_indices = @transform_11, window_bounds = array<i64: 1, 32, 64>}, {transform_indices = @transform_12, window_bounds = array<i64: 1, 1, 64>}, {transform_indices = @transform_13, window_bounds = array<i64: 1, 64, 32>}, {transform_indices = @transform_14, window_bounds = array<i64: 1, 1, 32>}, {transform_indices = @transform_15, window_bounds = array<i64: 32, 32>}]} {
    %c0_i32 = arith.constant 0 : i32
    %0 = arith.cmpi eq, %arg1, %c0_i32 : i32
    %1 = arith.extui %0 : i1 to i32
    %c0_i32_0 = arith.constant 0 : i32
    %2 = arith.cmpi ne, %1, %c0_i32_0 : i32
    scf.if %2 {
      %c0_176 = arith.constant 0 : index
      %c0_177 = arith.constant 0 : index
      %399 = vector.load %arg2[%c0_176, %c0_177] : memref<32x32xf32, #tpu.memory_space<vmem>>, vector<32x32xf32>
      %c0_178 = arith.constant 0 : index
      %c0_179 = arith.constant 0 : index
      %400 = vector.load %arg17[%c0_178, %c0_179] : memref<32x32xf32, #tpu.memory_space<vmem>>, vector<32x32xf32>
      tpu.vector_store %arg17[%c0_178, %c0_179], %399 {strides = array<i32>} : memref<32x32xf32, #tpu.memory_space<vmem>>, vector<32x32xf32>,
    } else {
    }
    %c0 = arith.constant 0 : index
    %c0_1 = arith.constant 0 : index
    %3 = vector.load %arg17[%c0, %c0_1] : memref<32x32xf32, #tpu.memory_space<vmem>>, vector<32x32xf32>
    %c0_2 = arith.constant 0 : index
    %c0_3 = arith.constant 0 : index
    %c0_4 = arith.constant 0 : index
    %4 = vector.load %arg4[%c0_2, %c0_3, %c0_4] : memref<1x1x32xf32, #tpu.memory_space<vmem>>, vector<1x1x32xf32>
    %5 = vector.shape_cast %4 : vector<1x1x32xf32> to vector<1x32xf32>
    %c0_5 = arith.constant 0 : index
    %c0_6 = arith.constant 0 : index
    %c0_7 = arith.constant 0 : index
    %6 = vector.load %arg5[%c0_5, %c0_6, %c0_7] : memref<1x1x32xf32, #tpu.memory_space<vmem>>, vector<1x1x32xf32>
    %7 = vector.shape_cast %6 : vector<1x1x32xf32> to vector<1x32xf32>
    %cst = arith.constant dense<0.000000e+00> : vector<32xf32>
    %8 = vector.multi_reduction <add>, %3, %cst [1] : vector<32x32xf32> to vector<32xf32>
    %9 = vector.shape_cast %8 : vector<32xf32> to vector<32x1xf32>
    %cst_8 = arith.constant 3.200000e+01 : f32
    %10 = vector.broadcast %cst_8 : f32 to vector<32x1xf32>
    %11 = arith.divf %9, %10 : vector<32x1xf32>
    %12 = vector.broadcast %11 : vector<32x1xf32> to vector<32x32xf32>
    %13 = arith.subf %3, %12 : vector<32x32xf32>
    %14 = arith.mulf %13, %13 : vector<32x32xf32>
    %cst_9 = arith.constant dense<0.000000e+00> : vector<32xf32>
    %15 = vector.multi_reduction <add>, %14, %cst_9 [1] : vector<32x32xf32> to vector<32xf32>
    %16 = vector.shape_cast %15 : vector<32xf32> to vector<32x1xf32>
    %cst_10 = arith.constant 3.200000e+01 : f32
    %17 = vector.broadcast %cst_10 : f32 to vector<32x1xf32>
    %18 = arith.divf %16, %17 : vector<32x1xf32>
    %19 = vector.broadcast %11 : vector<32x1xf32> to vector<32x32xf32>
    %20 = arith.subf %3, %19 : vector<32x32xf32>
    %cst_11 = arith.constant 9.99999974E-6 : f32
    %21 = vector.broadcast %cst_11 : f32 to vector<32x1xf32>
    %22 = arith.addf %18, %21 : vector<32x1xf32>
    %23 = math.rsqrt %22 : vector<32x1xf32>
    %24 = vector.broadcast %23 : vector<32x1xf32> to vector<32x32xf32>
    %25 = arith.mulf %20, %24 : vector<32x32xf32>
    %26 = vector.broadcast %5 : vector<1x32xf32> to vector<32x32xf32>
    %27 = arith.mulf %25, %26 : vector<32x32xf32>
    %28 = vector.broadcast %7 : vector<1x32xf32> to vector<32x32xf32>
    %29 = arith.addf %27, %28 : vector<32x32xf32>
    %30 = arith.truncf %29 : vector<32x32xf32> to vector<32x32xbf16>
    %c0_12 = arith.constant 0 : index
    %c0_13 = arith.constant 0 : index
    %c0_14 = arith.constant 0 : index
    %31 = vector.load %arg6[%c0_12, %c0_13, %c0_14] : memref<1x32x384xbf16, #tpu.memory_space<vmem>>, vector<1x32x384xbf16>
    %32 = vector.shape_cast %31 : vector<1x32x384xbf16> to vector<32x384xbf16>
    %cst_15 = arith.constant dense<0.000000e+00> : vector<32x384xf32>
    %33 = tpu.matmul %30, %32, %cst_15 {dimension_numbers = #tpu.dot_dimension_numbers<[1], [0], [0], [1], [0, 0, 1, 1], [], []>} : vector<32x32xbf16>, vector<32x384xbf16>, vector<32x384xf32> -> vector<32x384xf32>
    %c0_16 = arith.constant 0 : index
    %c0_17 = arith.constant 0 : index
    %34 = vector.load %arg18[%c0_16, %c0_17] : memref<32x384xf32, #tpu.memory_space<vmem>>, vector<32x384xf32>
    tpu.vector_store %arg18[%c0_16, %c0_17], %33 {strides = array<i32>} : memref<32x384xf32, #tpu.memory_space<vmem>>, vector<32x384xf32>,
    %c0_18 = arith.constant 0 : index
    %c0_19 = arith.constant 0 : index
    %c0_20 = arith.constant 0 : index
    %35 = vector.load %arg7[%c0_18, %c0_19, %c0_20] : memref<1x2x32xf32, #tpu.memory_space<vmem>>, vector<1x2x32xf32>
    %36 = vector.shape_cast %35 : vector<1x2x32xf32> to vector<2x32xf32>
    %c0_21 = arith.constant 0 : index
    %c0_22 = arith.constant 0 : index
    %c0_23 = arith.constant 0 : index
    %37 = vector.load %arg8[%c0_21, %c0_22, %c0_23] : memref<1x1x2xf32, #tpu.memory_space<vmem>>, vector<1x1x2xf32>
    %38 = vector.shape_cast %37 : vector<1x1x2xf32> to vector<1x2xf32>
    %39 = vector.extract_strided_slice %36 {offsets = [0, 0], sizes = [1, 32], strides = [1, 1]} : vector<2x32xf32> to vector<1x32xf32>
    %40 = vector.broadcast %39 : vector<1x32xf32> to vector<32x32xf32>
    %41 = arith.mulf %29, %40 : vector<32x32xf32>
    %cst_24 = arith.constant dense<0.000000e+00> : vector<32xf32>
    %42 = vector.multi_reduction <add>, %41, %cst_24 [1] : vector<32x32xf32> to vector<32xf32>
    %43 = vector.shape_cast %42 : vector<32xf32> to vector<32x1xf32>
    %44 = vector.extract_strided_slice %38 {offsets = [0, 0], sizes = [1, 1], strides = [1, 1]} : vector<1x2xf32> to vector<1x1xf32>
    %45 = vector.broadcast %44 : vector<1x1xf32> to vector<32x1xf32>
    %46 = arith.addf %43, %45 : vector<32x1xf32>
    %47 = math.exp %46 : vector<32x1xf32>
    %48 = vector.extract_strided_slice %36 {offsets = [1, 0], sizes = [1, 32], strides = [1, 1]} : vector<2x32xf32> to vector<1x32xf32>
    %49 = vector.broadcast %48 : vector<1x32xf32> to vector<32x32xf32>
    %50 = arith.mulf %29, %49 : vector<32x32xf32>
    %cst_25 = arith.constant dense<0.000000e+00> : vector<32xf32>
    %51 = vector.multi_reduction <add>, %50, %cst_25 [1] : vector<32x32xf32> to vector<32xf32>
    %52 = vector.shape_cast %51 : vector<32xf32> to vector<32x1xf32>
    %53 = vector.extract_strided_slice %38 {offsets = [0, 1], sizes = [1, 1], strides = [1, 1]} : vector<1x2xf32> to vector<1x1xf32>
    %54 = vector.broadcast %53 : vector<1x1xf32> to vector<32x1xf32>
    %55 = arith.addf %52, %54 : vector<32x1xf32>
    %56 = math.exp %55 : vector<32x1xf32>
    %57 = tpu.iota {dimensions = array<i32: 1>} : vector<1x16xi32>
    %c9_i32 = arith.constant 9 : i32
    %58 = vector.broadcast %c9_i32 : i32 to vector<1x16xi32>
    %59 = arith.cmpi slt, %57, %58 : vector<1x16xi32>
    %cst_26 = arith.constant 0.000000e+00 : f32
    %cst_27 = arith.constant -1.000000e+30 : f32
    %60 = vector.broadcast %cst_26 : f32 to vector<1x16xf32>
    %61 = vector.broadcast %cst_27 : f32 to vector<1x16xf32>
    %62 = arith.select %59, %60, %61 : vector<1x16xi1>, vector<1x16xf32>
    %c0_28 = arith.constant 0 : index
    %c0_29 = arith.constant 0 : index
    %c0_30 = arith.constant 0 : index
    %63 = vector.load %arg3[%c0_28, %c0_29, %c0_30] : memref<2x16x16xbf16, #tpu.memory_space<vmem>>, vector<1x16x16xbf16>
    %64 = vector.shape_cast %63 : vector<1x16x16xbf16> to vector<16x16xbf16>
    %65 = arith.extf %64 : vector<16x16xbf16> to vector<16x16xf32>
    %66 = vector.extract_strided_slice %47 {offsets = [0, 0], sizes = [16, 1], strides = [1, 1]} : vector<32x1xf32> to vector<16x1xf32>
    %67 = vector.extract_strided_slice %56 {offsets = [0, 0], sizes = [16, 1], strides = [1, 1]} : vector<32x1xf32> to vector<16x1xf32>
    %c0_31 = arith.constant 0 : index
    %c0_32 = arith.constant 0 : index
    %68 = vector.load %arg18[%c0_31, %c0_32] : memref<32x384xf32, #tpu.memory_space<vmem>>, vector<16x32xf32>
    %69 = arith.truncf %68 : vector<16x32xf32> to vector<16x32xbf16>
    %c0_33 = arith.constant 0 : index
    %c128 = arith.constant 128 : index
    %70 = vector.load %arg18[%c0_33, %c128] : memref<32x384xf32, #tpu.memory_space<vmem>>, vector<16x32xf32>
    %71 = arith.truncf %70 : vector<16x32xf32> to vector<16x32xbf16>
    %c0_34 = arith.constant 0 : index
    %c256 = arith.constant 256 : index
    %72 = vector.load %arg18[%c0_34, %c256] : memref<32x384xf32, #tpu.memory_space<vmem>>, vector<16x32xf32>
    %73 = arith.truncf %72 : vector<16x32xf32> to vector<16x32xbf16>
    %cst_35 = arith.constant dense<0.000000e+00> : vector<16x16xf32>
    %74 = tpu.matmul %69, %71, %cst_35 {dimension_numbers = #tpu.dot_dimension_numbers<[1], [1], [0], [0], [0, 0, 1, 0], [], []>} : vector<16x32xbf16>, vector<16x32xbf16>, vector<16x16xf32> -> vector<16x16xf32>
    %cst_36 = arith.constant 0.176776692 : f32
    %75 = vector.broadcast %cst_36 : f32 to vector<16x16xf32>
    %76 = arith.mulf %74, %75 : vector<16x16xf32>
    %77 = vector.broadcast %66 : vector<16x1xf32> to vector<16x16xf32>
    %78 = arith.mulf %77, %76 : vector<16x16xf32>
    %79 = vector.broadcast %67 : vector<16x1xf32> to vector<16x16xf32>
    %80 = arith.mulf %79, %65 : vector<16x16xf32>
    %81 = arith.addf %78, %80 : vector<16x16xf32>
    %82 = vector.broadcast %62 : vector<1x16xf32> to vector<16x16xf32>
    %83 = arith.addf %81, %82 : vector<16x16xf32>
    %cst_37 = arith.constant dense<0xFF800000> : vector<16xf32>
    %84 = vector.multi_reduction <maximumf>, %83, %cst_37 [1] : vector<16x16xf32> to vector<16xf32>
    %85 = vector.shape_cast %84 : vector<16xf32> to vector<16x1xf32>
    %86 = vector.broadcast %85 : vector<16x1xf32> to vector<16x16xf32>
    %87 = arith.subf %83, %86 : vector<16x16xf32>
    %88 = math.exp %87 : vector<16x16xf32>
    %cst_38 = arith.constant dense<0.000000e+00> : vector<16xf32>
    %89 = vector.multi_reduction <add>, %88, %cst_38 [1] : vector<16x16xf32> to vector<16xf32>
    %90 = vector.shape_cast %89 : vector<16xf32> to vector<16x1xf32>
    %91 = tpu.reciprocal %90 {approx = true} : vector<16x1xf32> -> vector<16x1xf32>
    %92 = vector.broadcast %91 : vector<16x1xf32> to vector<16x16xf32>
    %93 = arith.mulf %88, %92 : vector<16x16xf32>
    %94 = arith.truncf %93 : vector<16x16xf32> to vector<16x16xbf16>
    %cst_39 = arith.constant dense<0.000000e+00> : vector<16x32xf32>
    %95 = tpu.matmul %94, %73, %cst_39 {dimension_numbers = #tpu.dot_dimension_numbers<[1], [0], [0], [1], [0, 0, 1, 1], [], []>} : vector<16x16xbf16>, vector<16x32xbf16>, vector<16x32xf32> -> vector<16x32xf32>
    %c0_40 = arith.constant 0 : index
    %c0_41 = arith.constant 0 : index
    %96 = vector.load %arg19[%c0_40, %c0_41] : memref<32x128xf32, #tpu.memory_space<vmem>>, vector<16x32xf32>
    tpu.vector_store %arg19[%c0_40, %c0_41], %95 {strides = array<i32>} : memref<32x128xf32, #tpu.memory_space<vmem>>, vector<16x32xf32>,
    %c0_42 = arith.constant 0 : index
    %c32 = arith.constant 32 : index
    %97 = vector.load %arg18[%c0_42, %c32] : memref<32x384xf32, #tpu.memory_space<vmem>>, vector<16x32xf32>
    %98 = arith.truncf %97 : vector<16x32xf32> to vector<16x32xbf16>
    %c0_43 = arith.constant 0 : index
    %c160 = arith.constant 160 : index
    %99 = vector.load %arg18[%c0_43, %c160] : memref<32x384xf32, #tpu.memory_space<vmem>>, vector<16x32xf32>
    %100 = arith.truncf %99 : vector<16x32xf32> to vector<16x32xbf16>
    %c0_44 = arith.constant 0 : index
    %c288 = arith.constant 288 : index
    %101 = vector.load %arg18[%c0_44, %c288] : memref<32x384xf32, #tpu.memory_space<vmem>>, vector<16x32xf32>
    %102 = arith.truncf %101 : vector<16x32xf32> to vector<16x32xbf16>
    %cst_45 = arith.constant dense<0.000000e+00> : vector<16x16xf32>
    %103 = tpu.matmul %98, %100, %cst_45 {dimension_numbers = #tpu.dot_dimension_numbers<[1], [1], [0], [0], [0, 0, 1, 0], [], []>} : vector<16x32xbf16>, vector<16x32xbf16>, vector<16x16xf32> -> vector<16x16xf32>
    %cst_46 = arith.constant 0.176776692 : f32
    %104 = vector.broadcast %cst_46 : f32 to vector<16x16xf32>
    %105 = arith.mulf %103, %104 : vector<16x16xf32>
    %106 = vector.broadcast %66 : vector<16x1xf32> to vector<16x16xf32>
    %107 = arith.mulf %106, %105 : vector<16x16xf32>
    %108 = vector.broadcast %67 : vector<16x1xf32> to vector<16x16xf32>
    %109 = arith.mulf %108, %65 : vector<16x16xf32>
    %110 = arith.addf %107, %109 : vector<16x16xf32>
    %111 = vector.broadcast %62 : vector<1x16xf32> to vector<16x16xf32>
    %112 = arith.addf %110, %111 : vector<16x16xf32>
    %cst_47 = arith.constant dense<0xFF800000> : vector<16xf32>
    %113 = vector.multi_reduction <maximumf>, %112, %cst_47 [1] : vector<16x16xf32> to vector<16xf32>
    %114 = vector.shape_cast %113 : vector<16xf32> to vector<16x1xf32>
    %115 = vector.broadcast %114 : vector<16x1xf32> to vector<16x16xf32>
    %116 = arith.subf %112, %115 : vector<16x16xf32>
    %117 = math.exp %116 : vector<16x16xf32>
    %cst_48 = arith.constant dense<0.000000e+00> : vector<16xf32>
    %118 = vector.multi_reduction <add>, %117, %cst_48 [1] : vector<16x16xf32> to vector<16xf32>
    %119 = vector.shape_cast %118 : vector<16xf32> to vector<16x1xf32>
    %120 = tpu.reciprocal %119 {approx = true} : vector<16x1xf32> -> vector<16x1xf32>
    %121 = vector.broadcast %120 : vector<16x1xf32> to vector<16x16xf32>
    %122 = arith.mulf %117, %121 : vector<16x16xf32>
    %123 = arith.truncf %122 : vector<16x16xf32> to vector<16x16xbf16>
    %cst_49 = arith.constant dense<0.000000e+00> : vector<16x32xf32>
    %124 = tpu.matmul %123, %102, %cst_49 {dimension_numbers = #tpu.dot_dimension_numbers<[1], [0], [0], [1], [0, 0, 1, 1], [], []>} : vector<16x16xbf16>, vector<16x32xbf16>, vector<16x32xf32> -> vector<16x32xf32>
    %c0_50 = arith.constant 0 : index
    %c32_51 = arith.constant 32 : index
    %125 = vector.load %arg19[%c0_50, %c32_51] : memref<32x128xf32, #tpu.memory_space<vmem>>, vector<16x32xf32>
    tpu.vector_store %arg19[%c0_50, %c32_51], %124 {strides = array<i32>} : memref<32x128xf32, #tpu.memory_space<vmem>>, vector<16x32xf32>,
    %c0_52 = arith.constant 0 : index
    %c64 = arith.constant 64 : index
    %126 = vector.load %arg18[%c0_52, %c64] : memref<32x384xf32, #tpu.memory_space<vmem>>, vector<16x32xf32>
    %127 = arith.truncf %126 : vector<16x32xf32> to vector<16x32xbf16>
    %c0_53 = arith.constant 0 : index
    %c192 = arith.constant 192 : index
    %128 = vector.load %arg18[%c0_53, %c192] : memref<32x384xf32, #tpu.memory_space<vmem>>, vector<16x32xf32>
    %129 = arith.truncf %128 : vector<16x32xf32> to vector<16x32xbf16>
    %c0_54 = arith.constant 0 : index
    %c320 = arith.constant 320 : index
    %130 = vector.load %arg18[%c0_54, %c320] : memref<32x384xf32, #tpu.memory_space<vmem>>, vector<16x32xf32>
    %131 = arith.truncf %130 : vector<16x32xf32> to vector<16x32xbf16>
    %cst_55 = arith.constant dense<0.000000e+00> : vector<16x16xf32>
    %132 = tpu.matmul %127, %129, %cst_55 {dimension_numbers = #tpu.dot_dimension_numbers<[1], [1], [0], [0], [0, 0, 1, 0], [], []>} : vector<16x32xbf16>, vector<16x32xbf16>, vector<16x16xf32> -> vector<16x16xf32>
    %cst_56 = arith.constant 0.176776692 : f32
    %133 = vector.broadcast %cst_56 : f32 to vector<16x16xf32>
    %134 = arith.mulf %132, %133 : vector<16x16xf32>
    %135 = vector.broadcast %66 : vector<16x1xf32> to vector<16x16xf32>
    %136 = arith.mulf %135, %134 : vector<16x16xf32>
    %137 = vector.broadcast %67 : vector<16x1xf32> to vector<16x16xf32>
    %138 = arith.mulf %137, %65 : vector<16x16xf32>
    %139 = arith.addf %136, %138 : vector<16x16xf32>
    %140 = vector.broadcast %62 : vector<1x16xf32> to vector<16x16xf32>
    %141 = arith.addf %139, %140 : vector<16x16xf32>
    %cst_57 = arith.constant dense<0xFF800000> : vector<16xf32>
    %142 = vector.multi_reduction <maximumf>, %141, %cst_57 [1] : vector<16x16xf32> to vector<16xf32>
    %143 = vector.shape_cast %142 : vector<16xf32> to vector<16x1xf32>
    %144 = vector.broadcast %143 : vector<16x1xf32> to vector<16x16xf32>
    %145 = arith.subf %141, %144 : vector<16x16xf32>
    %146 = math.exp %145 : vector<16x16xf32>
    %cst_58 = arith.constant dense<0.000000e+00> : vector<16xf32>
    %147 = vector.multi_reduction <add>, %146, %cst_58 [1] : vector<16x16xf32> to vector<16xf32>
    %148 = vector.shape_cast %147 : vector<16xf32> to vector<16x1xf32>
    %149 = tpu.reciprocal %148 {approx = true} : vector<16x1xf32> -> vector<16x1xf32>
    %150 = vector.broadcast %149 : vector<16x1xf32> to vector<16x16xf32>
    %151 = arith.mulf %146, %150 : vector<16x16xf32>
    %152 = arith.truncf %151 : vector<16x16xf32> to vector<16x16xbf16>
    %cst_59 = arith.constant dense<0.000000e+00> : vector<16x32xf32>
    %153 = tpu.matmul %152, %131, %cst_59 {dimension_numbers = #tpu.dot_dimension_numbers<[1], [0], [0], [1], [0, 0, 1, 1], [], []>} : vector<16x16xbf16>, vector<16x32xbf16>, vector<16x32xf32> -> vector<16x32xf32>
    %c0_60 = arith.constant 0 : index
    %c64_61 = arith.constant 64 : index
    %154 = vector.load %arg19[%c0_60, %c64_61] : memref<32x128xf32, #tpu.memory_space<vmem>>, vector<16x32xf32>
    tpu.vector_store %arg19[%c0_60, %c64_61], %153 {strides = array<i32>} : memref<32x128xf32, #tpu.memory_space<vmem>>, vector<16x32xf32>,
    %c0_62 = arith.constant 0 : index
    %c96 = arith.constant 96 : index
    %155 = vector.load %arg18[%c0_62, %c96] : memref<32x384xf32, #tpu.memory_space<vmem>>, vector<16x32xf32>
    %156 = arith.truncf %155 : vector<16x32xf32> to vector<16x32xbf16>
    %c0_63 = arith.constant 0 : index
    %c224 = arith.constant 224 : index
    %157 = vector.load %arg18[%c0_63, %c224] : memref<32x384xf32, #tpu.memory_space<vmem>>, vector<16x32xf32>
    %158 = arith.truncf %157 : vector<16x32xf32> to vector<16x32xbf16>
    %c0_64 = arith.constant 0 : index
    %c352 = arith.constant 352 : index
    %159 = vector.load %arg18[%c0_64, %c352] : memref<32x384xf32, #tpu.memory_space<vmem>>, vector<16x32xf32>
    %160 = arith.truncf %159 : vector<16x32xf32> to vector<16x32xbf16>
    %cst_65 = arith.constant dense<0.000000e+00> : vector<16x16xf32>
    %161 = tpu.matmul %156, %158, %cst_65 {dimension_numbers = #tpu.dot_dimension_numbers<[1], [1], [0], [0], [0, 0, 1, 0], [], []>} : vector<16x32xbf16>, vector<16x32xbf16>, vector<16x16xf32> -> vector<16x16xf32>
    %cst_66 = arith.constant 0.176776692 : f32
    %162 = vector.broadcast %cst_66 : f32 to vector<16x16xf32>
    %163 = arith.mulf %161, %162 : vector<16x16xf32>
    %164 = vector.broadcast %66 : vector<16x1xf32> to vector<16x16xf32>
    %165 = arith.mulf %164, %163 : vector<16x16xf32>
    %166 = vector.broadcast %67 : vector<16x1xf32> to vector<16x16xf32>
    %167 = arith.mulf %166, %65 : vector<16x16xf32>
    %168 = arith.addf %165, %167 : vector<16x16xf32>
    %169 = vector.broadcast %62 : vector<1x16xf32> to vector<16x16xf32>
    %170 = arith.addf %168, %169 : vector<16x16xf32>
    %cst_67 = arith.constant dense<0xFF800000> : vector<16xf32>
    %171 = vector.multi_reduction <maximumf>, %170, %cst_67 [1] : vector<16x16xf32> to vector<16xf32>
    %172 = vector.shape_cast %171 : vector<16xf32> to vector<16x1xf32>
    %173 = vector.broadcast %172 : vector<16x1xf32> to vector<16x16xf32>
    %174 = arith.subf %170, %173 : vector<16x16xf32>
    %175 = math.exp %174 : vector<16x16xf32>
    %cst_68 = arith.constant dense<0.000000e+00> : vector<16xf32>
    %176 = vector.multi_reduction <add>, %175, %cst_68 [1] : vector<16x16xf32> to vector<16xf32>
    %177 = vector.shape_cast %176 : vector<16xf32> to vector<16x1xf32>
    %178 = tpu.reciprocal %177 {approx = true} : vector<16x1xf32> -> vector<16x1xf32>
    %179 = vector.broadcast %178 : vector<16x1xf32> to vector<16x16xf32>
    %180 = arith.mulf %175, %179 : vector<16x16xf32>
    %181 = arith.truncf %180 : vector<16x16xf32> to vector<16x16xbf16>
    %cst_69 = arith.constant dense<0.000000e+00> : vector<16x32xf32>
    %182 = tpu.matmul %181, %160, %cst_69 {dimension_numbers = #tpu.dot_dimension_numbers<[1], [0], [0], [1], [0, 0, 1, 1], [], []>} : vector<16x16xbf16>, vector<16x32xbf16>, vector<16x32xf32> -> vector<16x32xf32>
    %c0_70 = arith.constant 0 : index
    %c96_71 = arith.constant 96 : index
    %183 = vector.load %arg19[%c0_70, %c96_71] : memref<32x128xf32, #tpu.memory_space<vmem>>, vector<16x32xf32>
    tpu.vector_store %arg19[%c0_70, %c96_71], %182 {strides = array<i32>} : memref<32x128xf32, #tpu.memory_space<vmem>>, vector<16x32xf32>,
    %c1 = arith.constant 1 : index
    %c0_72 = arith.constant 0 : index
    %c0_73 = arith.constant 0 : index
    %184 = vector.load %arg3[%c1, %c0_72, %c0_73] : memref<2x16x16xbf16, #tpu.memory_space<vmem>>, vector<1x16x16xbf16>
    %185 = vector.shape_cast %184 : vector<1x16x16xbf16> to vector<16x16xbf16>
    %186 = arith.extf %185 : vector<16x16xbf16> to vector<16x16xf32>
    %187 = vector.extract_strided_slice %47 {offsets = [16, 0], sizes = [16, 1], strides = [1, 1]} : vector<32x1xf32> to vector<16x1xf32>
    %188 = vector.extract_strided_slice %56 {offsets = [16, 0], sizes = [16, 1], strides = [1, 1]} : vector<32x1xf32> to vector<16x1xf32>
    %c16 = arith.constant 16 : index
    %c0_74 = arith.constant 0 : index
    %189 = vector.load %arg18[%c16, %c0_74] : memref<32x384xf32, #tpu.memory_space<vmem>>, vector<16x32xf32>
    %190 = arith.truncf %189 : vector<16x32xf32> to vector<16x32xbf16>
    %c16_75 = arith.constant 16 : index
    %c128_76 = arith.constant 128 : index
    %191 = vector.load %arg18[%c16_75, %c128_76] : memref<32x384xf32, #tpu.memory_space<vmem>>, vector<16x32xf32>
    %192 = arith.truncf %191 : vector<16x32xf32> to vector<16x32xbf16>
    %c16_77 = arith.constant 16 : index
    %c256_78 = arith.constant 256 : index
    %193 = vector.load %arg18[%c16_77, %c256_78] : memref<32x384xf32, #tpu.memory_space<vmem>>, vector<16x32xf32>
    %194 = arith.truncf %193 : vector<16x32xf32> to vector<16x32xbf16>
    %cst_79 = arith.constant dense<0.000000e+00> : vector<16x16xf32>
    %195 = tpu.matmul %190, %192, %cst_79 {dimension_numbers = #tpu.dot_dimension_numbers<[1], [1], [0], [0], [0, 0, 1, 0], [], []>} : vector<16x32xbf16>, vector<16x32xbf16>, vector<16x16xf32> -> vector<16x16xf32>
    %cst_80 = arith.constant 0.176776692 : f32
    %196 = vector.broadcast %cst_80 : f32 to vector<16x16xf32>
    %197 = arith.mulf %195, %196 : vector<16x16xf32>
    %198 = vector.broadcast %187 : vector<16x1xf32> to vector<16x16xf32>
    %199 = arith.mulf %198, %197 : vector<16x16xf32>
    %200 = vector.broadcast %188 : vector<16x1xf32> to vector<16x16xf32>
    %201 = arith.mulf %200, %186 : vector<16x16xf32>
    %202 = arith.addf %199, %201 : vector<16x16xf32>
    %203 = vector.broadcast %62 : vector<1x16xf32> to vector<16x16xf32>
    %204 = arith.addf %202, %203 : vector<16x16xf32>
    %cst_81 = arith.constant dense<0xFF800000> : vector<16xf32>
    %205 = vector.multi_reduction <maximumf>, %204, %cst_81 [1] : vector<16x16xf32> to vector<16xf32>
    %206 = vector.shape_cast %205 : vector<16xf32> to vector<16x1xf32>
    %207 = vector.broadcast %206 : vector<16x1xf32> to vector<16x16xf32>
    %208 = arith.subf %204, %207 : vector<16x16xf32>
    %209 = math.exp %208 : vector<16x16xf32>
    %cst_82 = arith.constant dense<0.000000e+00> : vector<16xf32>
    %210 = vector.multi_reduction <add>, %209, %cst_82 [1] : vector<16x16xf32> to vector<16xf32>
    %211 = vector.shape_cast %210 : vector<16xf32> to vector<16x1xf32>
    %212 = tpu.reciprocal %211 {approx = true} : vector<16x1xf32> -> vector<16x1xf32>
    %213 = vector.broadcast %212 : vector<16x1xf32> to vector<16x16xf32>
    %214 = arith.mulf %209, %213 : vector<16x16xf32>
    %215 = arith.truncf %214 : vector<16x16xf32> to vector<16x16xbf16>
    %cst_83 = arith.constant dense<0.000000e+00> : vector<16x32xf32>
    %216 = tpu.matmul %215, %194, %cst_83 {dimension_numbers = #tpu.dot_dimension_numbers<[1], [0], [0], [1], [0, 0, 1, 1], [], []>} : vector<16x16xbf16>, vector<16x32xbf16>, vector<16x32xf32> -> vector<16x32xf32>
    %c16_84 = arith.constant 16 : index
    %c0_85 = arith.constant 0 : index
    %217 = vector.load %arg19[%c16_84, %c0_85] : memref<32x128xf32, #tpu.memory_space<vmem>>, vector<16x32xf32>
    tpu.vector_store %arg19[%c16_84, %c0_85], %216 {strides = array<i32>} : memref<32x128xf32, #tpu.memory_space<vmem>>, vector<16x32xf32>,
    %c16_86 = arith.constant 16 : index
    %c32_87 = arith.constant 32 : index
    %218 = vector.load %arg18[%c16_86, %c32_87] : memref<32x384xf32, #tpu.memory_space<vmem>>, vector<16x32xf32>
    %219 = arith.truncf %218 : vector<16x32xf32> to vector<16x32xbf16>
    %c16_88 = arith.constant 16 : index
    %c160_89 = arith.constant 160 : index
    %220 = vector.load %arg18[%c16_88, %c160_89] : memref<32x384xf32, #tpu.memory_space<vmem>>, vector<16x32xf32>
    %221 = arith.truncf %220 : vector<16x32xf32> to vector<16x32xbf16>
    %c16_90 = arith.constant 16 : index
    %c288_91 = arith.constant 288 : index
    %222 = vector.load %arg18[%c16_90, %c288_91] : memref<32x384xf32, #tpu.memory_space<vmem>>, vector<16x32xf32>
    %223 = arith.truncf %222 : vector<16x32xf32> to vector<16x32xbf16>
    %cst_92 = arith.constant dense<0.000000e+00> : vector<16x16xf32>
    %224 = tpu.matmul %219, %221, %cst_92 {dimension_numbers = #tpu.dot_dimension_numbers<[1], [1], [0], [0], [0, 0, 1, 0], [], []>} : vector<16x32xbf16>, vector<16x32xbf16>, vector<16x16xf32> -> vector<16x16xf32>
    %cst_93 = arith.constant 0.176776692 : f32
    %225 = vector.broadcast %cst_93 : f32 to vector<16x16xf32>
    %226 = arith.mulf %224, %225 : vector<16x16xf32>
    %227 = vector.broadcast %187 : vector<16x1xf32> to vector<16x16xf32>
    %228 = arith.mulf %227, %226 : vector<16x16xf32>
    %229 = vector.broadcast %188 : vector<16x1xf32> to vector<16x16xf32>
    %230 = arith.mulf %229, %186 : vector<16x16xf32>
    %231 = arith.addf %228, %230 : vector<16x16xf32>
    %232 = vector.broadcast %62 : vector<1x16xf32> to vector<16x16xf32>
    %233 = arith.addf %231, %232 : vector<16x16xf32>
    %cst_94 = arith.constant dense<0xFF800000> : vector<16xf32>
    %234 = vector.multi_reduction <maximumf>, %233, %cst_94 [1] : vector<16x16xf32> to vector<16xf32>
    %235 = vector.shape_cast %234 : vector<16xf32> to vector<16x1xf32>
    %236 = vector.broadcast %235 : vector<16x1xf32> to vector<16x16xf32>
    %237 = arith.subf %233, %236 : vector<16x16xf32>
    %238 = math.exp %237 : vector<16x16xf32>
    %cst_95 = arith.constant dense<0.000000e+00> : vector<16xf32>
    %239 = vector.multi_reduction <add>, %238, %cst_95 [1] : vector<16x16xf32> to vector<16xf32>
    %240 = vector.shape_cast %239 : vector<16xf32> to vector<16x1xf32>
    %241 = tpu.reciprocal %240 {approx = true} : vector<16x1xf32> -> vector<16x1xf32>
    %242 = vector.broadcast %241 : vector<16x1xf32> to vector<16x16xf32>
    %243 = arith.mulf %238, %242 : vector<16x16xf32>
    %244 = arith.truncf %243 : vector<16x16xf32> to vector<16x16xbf16>
    %cst_96 = arith.constant dense<0.000000e+00> : vector<16x32xf32>
    %245 = tpu.matmul %244, %223, %cst_96 {dimension_numbers = #tpu.dot_dimension_numbers<[1], [0], [0], [1], [0, 0, 1, 1], [], []>} : vector<16x16xbf16>, vector<16x32xbf16>, vector<16x32xf32> -> vector<16x32xf32>
    %c16_97 = arith.constant 16 : index
    %c32_98 = arith.constant 32 : index
    %246 = vector.load %arg19[%c16_97, %c32_98] : memref<32x128xf32, #tpu.memory_space<vmem>>, vector<16x32xf32>
    tpu.vector_store %arg19[%c16_97, %c32_98], %245 {strides = array<i32>} : memref<32x128xf32, #tpu.memory_space<vmem>>, vector<16x32xf32>,
    %c16_99 = arith.constant 16 : index
    %c64_100 = arith.constant 64 : index
    %247 = vector.load %arg18[%c16_99, %c64_100] : memref<32x384xf32, #tpu.memory_space<vmem>>, vector<16x32xf32>
    %248 = arith.truncf %247 : vector<16x32xf32> to vector<16x32xbf16>
    %c16_101 = arith.constant 16 : index
    %c192_102 = arith.constant 192 : index
    %249 = vector.load %arg18[%c16_101, %c192_102] : memref<32x384xf32, #tpu.memory_space<vmem>>, vector<16x32xf32>
    %250 = arith.truncf %249 : vector<16x32xf32> to vector<16x32xbf16>
    %c16_103 = arith.constant 16 : index
    %c320_104 = arith.constant 320 : index
    %251 = vector.load %arg18[%c16_103, %c320_104] : memref<32x384xf32, #tpu.memory_space<vmem>>, vector<16x32xf32>
    %252 = arith.truncf %251 : vector<16x32xf32> to vector<16x32xbf16>
    %cst_105 = arith.constant dense<0.000000e+00> : vector<16x16xf32>
    %253 = tpu.matmul %248, %250, %cst_105 {dimension_numbers = #tpu.dot_dimension_numbers<[1], [1], [0], [0], [0, 0, 1, 0], [], []>} : vector<16x32xbf16>, vector<16x32xbf16>, vector<16x16xf32> -> vector<16x16xf32>
    %cst_106 = arith.constant 0.176776692 : f32
    %254 = vector.broadcast %cst_106 : f32 to vector<16x16xf32>
    %255 = arith.mulf %253, %254 : vector<16x16xf32>
    %256 = vector.broadcast %187 : vector<16x1xf32> to vector<16x16xf32>
    %257 = arith.mulf %256, %255 : vector<16x16xf32>
    %258 = vector.broadcast %188 : vector<16x1xf32> to vector<16x16xf32>
    %259 = arith.mulf %258, %186 : vector<16x16xf32>
    %260 = arith.addf %257, %259 : vector<16x16xf32>
    %261 = vector.broadcast %62 : vector<1x16xf32> to vector<16x16xf32>
    %262 = arith.addf %260, %261 : vector<16x16xf32>
    %cst_107 = arith.constant dense<0xFF800000> : vector<16xf32>
    %263 = vector.multi_reduction <maximumf>, %262, %cst_107 [1] : vector<16x16xf32> to vector<16xf32>
    %264 = vector.shape_cast %263 : vector<16xf32> to vector<16x1xf32>
    %265 = vector.broadcast %264 : vector<16x1xf32> to vector<16x16xf32>
    %266 = arith.subf %262, %265 : vector<16x16xf32>
    %267 = math.exp %266 : vector<16x16xf32>
    %cst_108 = arith.constant dense<0.000000e+00> : vector<16xf32>
    %268 = vector.multi_reduction <add>, %267, %cst_108 [1] : vector<16x16xf32> to vector<16xf32>
    %269 = vector.shape_cast %268 : vector<16xf32> to vector<16x1xf32>
    %270 = tpu.reciprocal %269 {approx = true} : vector<16x1xf32> -> vector<16x1xf32>
    %271 = vector.broadcast %270 : vector<16x1xf32> to vector<16x16xf32>
    %272 = arith.mulf %267, %271 : vector<16x16xf32>
    %273 = arith.truncf %272 : vector<16x16xf32> to vector<16x16xbf16>
    %cst_109 = arith.constant dense<0.000000e+00> : vector<16x32xf32>
    %274 = tpu.matmul %273, %252, %cst_109 {dimension_numbers = #tpu.dot_dimension_numbers<[1], [0], [0], [1], [0, 0, 1, 1], [], []>} : vector<16x16xbf16>, vector<16x32xbf16>, vector<16x32xf32> -> vector<16x32xf32>
    %c16_110 = arith.constant 16 : index
    %c64_111 = arith.constant 64 : index
    %275 = vector.load %arg19[%c16_110, %c64_111] : memref<32x128xf32, #tpu.memory_space<vmem>>, vector<16x32xf32>
    tpu.vector_store %arg19[%c16_110, %c64_111], %274 {strides = array<i32>} : memref<32x128xf32, #tpu.memory_space<vmem>>, vector<16x32xf32>,
    %c16_112 = arith.constant 16 : index
    %c96_113 = arith.constant 96 : index
    %276 = vector.load %arg18[%c16_112, %c96_113] : memref<32x384xf32, #tpu.memory_space<vmem>>, vector<16x32xf32>
    %277 = arith.truncf %276 : vector<16x32xf32> to vector<16x32xbf16>
    %c16_114 = arith.constant 16 : index
    %c224_115 = arith.constant 224 : index
    %278 = vector.load %arg18[%c16_114, %c224_115] : memref<32x384xf32, #tpu.memory_space<vmem>>, vector<16x32xf32>
    %279 = arith.truncf %278 : vector<16x32xf32> to vector<16x32xbf16>
    %c16_116 = arith.constant 16 : index
    %c352_117 = arith.constant 352 : index
    %280 = vector.load %arg18[%c16_116, %c352_117] : memref<32x384xf32, #tpu.memory_space<vmem>>, vector<16x32xf32>
    %281 = arith.truncf %280 : vector<16x32xf32> to vector<16x32xbf16>
    %cst_118 = arith.constant dense<0.000000e+00> : vector<16x16xf32>
    %282 = tpu.matmul %277, %279, %cst_118 {dimension_numbers = #tpu.dot_dimension_numbers<[1], [1], [0], [0], [0, 0, 1, 0], [], []>} : vector<16x32xbf16>, vector<16x32xbf16>, vector<16x16xf32> -> vector<16x16xf32>
    %cst_119 = arith.constant 0.176776692 : f32
    %283 = vector.broadcast %cst_119 : f32 to vector<16x16xf32>
    %284 = arith.mulf %282, %283 : vector<16x16xf32>
    %285 = vector.broadcast %187 : vector<16x1xf32> to vector<16x16xf32>
    %286 = arith.mulf %285, %284 : vector<16x16xf32>
    %287 = vector.broadcast %188 : vector<16x1xf32> to vector<16x16xf32>
    %288 = arith.mulf %287, %186 : vector<16x16xf32>
    %289 = arith.addf %286, %288 : vector<16x16xf32>
    %290 = vector.broadcast %62 : vector<1x16xf32> to vector<16x16xf32>
    %291 = arith.addf %289, %290 : vector<16x16xf32>
    %cst_120 = arith.constant dense<0xFF800000> : vector<16xf32>
    %292 = vector.multi_reduction <maximumf>, %291, %cst_120 [1] : vector<16x16xf32> to vector<16xf32>
    %293 = vector.shape_cast %292 : vector<16xf32> to vector<16x1xf32>
    %294 = vector.broadcast %293 : vector<16x1xf32> to vector<16x16xf32>
    %295 = arith.subf %291, %294 : vector<16x16xf32>
    %296 = math.exp %295 : vector<16x16xf32>
    %cst_121 = arith.constant dense<0.000000e+00> : vector<16xf32>
    %297 = vector.multi_reduction <add>, %296, %cst_121 [1] : vector<16x16xf32> to vector<16xf32>
    %298 = vector.shape_cast %297 : vector<16xf32> to vector<16x1xf32>
    %299 = tpu.reciprocal %298 {approx = true} : vector<16x1xf32> -> vector<16x1xf32>
    %300 = vector.broadcast %299 : vector<16x1xf32> to vector<16x16xf32>
    %301 = arith.mulf %296, %300 : vector<16x16xf32>
    %302 = arith.truncf %301 : vector<16x16xf32> to vector<16x16xbf16>
    %cst_122 = arith.constant dense<0.000000e+00> : vector<16x32xf32>
    %303 = tpu.matmul %302, %281, %cst_122 {dimension_numbers = #tpu.dot_dimension_numbers<[1], [0], [0], [1], [0, 0, 1, 1], [], []>} : vector<16x16xbf16>, vector<16x32xbf16>, vector<16x32xf32> -> vector<16x32xf32>
    %c16_123 = arith.constant 16 : index
    %c96_124 = arith.constant 96 : index
    %304 = vector.load %arg19[%c16_123, %c96_124] : memref<32x128xf32, #tpu.memory_space<vmem>>, vector<16x32xf32>
    tpu.vector_store %arg19[%c16_123, %c96_124], %303 {strides = array<i32>} : memref<32x128xf32, #tpu.memory_space<vmem>>, vector<16x32xf32>,
    %c0_125 = arith.constant 0 : index
    %c0_126 = arith.constant 0 : index
    %305 = vector.load %arg19[%c0_125, %c0_126] : memref<32x128xf32, #tpu.memory_space<vmem>>, vector<32x128xf32>
    %306 = arith.truncf %305 : vector<32x128xf32> to vector<32x128xbf16>
    %c0_127 = arith.constant 0 : index
    %c0_128 = arith.constant 0 : index
    %c0_129 = arith.constant 0 : index
    %307 = vector.load %arg9[%c0_127, %c0_128, %c0_129] : memref<1x128x32xbf16, #tpu.memory_space<vmem>>, vector<1x128x32xbf16>
    %308 = vector.shape_cast %307 : vector<1x128x32xbf16> to vector<128x32xbf16>
    %cst_130 = arith.constant dense<0.000000e+00> : vector<32x32xf32>
    %309 = tpu.matmul %306, %308, %cst_130 {dimension_numbers = #tpu.dot_dimension_numbers<[1], [0], [0], [1], [0, 0, 1, 1], [], []>} : vector<32x128xbf16>, vector<128x32xbf16>, vector<32x32xf32> -> vector<32x32xf32>
    %c0_131 = arith.constant 0 : index
    %c0_132 = arith.constant 0 : index
    %c0_133 = arith.constant 0 : index
    %310 = vector.load %arg10[%c0_131, %c0_132, %c0_133] : memref<1x1x32xf32, #tpu.memory_space<vmem>>, vector<1x1x32xf32>
    %311 = vector.shape_cast %310 : vector<1x1x32xf32> to vector<1x32xf32>
    %312 = vector.broadcast %311 : vector<1x32xf32> to vector<32x32xf32>
    %313 = arith.addf %309, %312 : vector<32x32xf32>
    %314 = arith.addf %313, %29 : vector<32x32xf32>
    %c0_134 = arith.constant 0 : index
    %c0_135 = arith.constant 0 : index
    %c0_136 = arith.constant 0 : index
    %315 = vector.load %arg11[%c0_134, %c0_135, %c0_136] : memref<1x1x32xf32, #tpu.memory_space<vmem>>, vector<1x1x32xf32>
    %316 = vector.shape_cast %315 : vector<1x1x32xf32> to vector<1x32xf32>
    %c0_137 = arith.constant 0 : index
    %c0_138 = arith.constant 0 : index
    %c0_139 = arith.constant 0 : index
    %317 = vector.load %arg12[%c0_137, %c0_138, %c0_139] : memref<1x1x32xf32, #tpu.memory_space<vmem>>, vector<1x1x32xf32>
    %318 = vector.shape_cast %317 : vector<1x1x32xf32> to vector<1x32xf32>
    %cst_140 = arith.constant dense<0.000000e+00> : vector<32xf32>
    %319 = vector.multi_reduction <add>, %314, %cst_140 [1] : vector<32x32xf32> to vector<32xf32>
    %320 = vector.shape_cast %319 : vector<32xf32> to vector<32x1xf32>
    %cst_141 = arith.constant 3.200000e+01 : f32
    %321 = vector.broadcast %cst_141 : f32 to vector<32x1xf32>
    %322 = arith.divf %320, %321 : vector<32x1xf32>
    %323 = vector.broadcast %322 : vector<32x1xf32> to vector<32x32xf32>
    %324 = arith.subf %314, %323 : vector<32x32xf32>
    %325 = arith.mulf %324, %324 : vector<32x32xf32>
    %cst_142 = arith.constant dense<0.000000e+00> : vector<32xf32>
    %326 = vector.multi_reduction <add>, %325, %cst_142 [1] : vector<32x32xf32> to vector<32xf32>
    %327 = vector.shape_cast %326 : vector<32xf32> to vector<32x1xf32>
    %cst_143 = arith.constant 3.200000e+01 : f32
    %328 = vector.broadcast %cst_143 : f32 to vector<32x1xf32>
    %329 = arith.divf %327, %328 : vector<32x1xf32>
    %330 = vector.broadcast %322 : vector<32x1xf32> to vector<32x32xf32>
    %331 = arith.subf %314, %330 : vector<32x32xf32>
    %cst_144 = arith.constant 9.99999974E-6 : f32
    %332 = vector.broadcast %cst_144 : f32 to vector<32x1xf32>
    %333 = arith.addf %329, %332 : vector<32x1xf32>
    %334 = math.rsqrt %333 : vector<32x1xf32>
    %335 = vector.broadcast %334 : vector<32x1xf32> to vector<32x32xf32>
    %336 = arith.mulf %331, %335 : vector<32x32xf32>
    %337 = vector.broadcast %316 : vector<1x32xf32> to vector<32x32xf32>
    %338 = arith.mulf %336, %337 : vector<32x32xf32>
    %339 = vector.broadcast %318 : vector<1x32xf32> to vector<32x32xf32>
    %340 = arith.addf %338, %339 : vector<32x32xf32>
    %341 = arith.truncf %340 : vector<32x32xf32> to vector<32x32xbf16>
    %c0_145 = arith.constant 0 : index
    %c0_146 = arith.constant 0 : index
    %c0_147 = arith.constant 0 : index
    %342 = vector.load %arg13[%c0_145, %c0_146, %c0_147] : memref<1x32x64xbf16, #tpu.memory_space<vmem>>, vector<1x32x64xbf16>
    %343 = vector.shape_cast %342 : vector<1x32x64xbf16> to vector<32x64xbf16>
    %cst_148 = arith.constant dense<0.000000e+00> : vector<32x64xf32>
    %344 = tpu.matmul %341, %343, %cst_148 {dimension_numbers = #tpu.dot_dimension_numbers<[1], [0], [0], [1], [0, 0, 1, 1], [], []>} : vector<32x32xbf16>, vector<32x64xbf16>, vector<32x64xf32> -> vector<32x64xf32>
    %c0_149 = arith.constant 0 : index
    %c0_150 = arith.constant 0 : index
    %c0_151 = arith.constant 0 : index
    %345 = vector.load %arg14[%c0_149, %c0_150, %c0_151] : memref<1x1x64xf32, #tpu.memory_space<vmem>>, vector<1x1x64xf32>
    %346 = vector.shape_cast %345 : vector<1x1x64xf32> to vector<1x64xf32>
    %347 = vector.broadcast %346 : vector<1x64xf32> to vector<32x64xf32>
    %348 = arith.addf %344, %347 : vector<32x64xf32>
    %cst_152 = arith.constant 5.000000e-01 : f32
    %349 = vector.broadcast %cst_152 : f32 to vector<32x64xf32>
    %350 = arith.mulf %349, %348 : vector<32x64xf32>
    %cst_153 = arith.constant 0.707106769 : f32
    %351 = vector.broadcast %cst_153 : f32 to vector<32x64xf32>
    %352 = arith.mulf %348, %351 : vector<32x64xf32>
    %353 = math.absf %352 : vector<32x64xf32>
    %cst_154 = arith.constant 0.327591091 : f32
    %354 = vector.broadcast %cst_154 : f32 to vector<32x64xf32>
    %355 = arith.mulf %354, %353 : vector<32x64xf32>
    %cst_155 = arith.constant 1.000000e+00 : f32
    %356 = vector.broadcast %cst_155 : f32 to vector<32x64xf32>
    %357 = arith.addf %356, %355 : vector<32x64xf32>
    %cst_156 = arith.constant 1.000000e+00 : f32
    %358 = vector.broadcast %cst_156 : f32 to vector<32x64xf32>
    %359 = arith.divf %358, %357 : vector<32x64xf32>
    %cst_157 = arith.constant 1.06140542 : f32
    %360 = vector.broadcast %cst_157 : f32 to vector<32x64xf32>
    %361 = arith.mulf %360, %359 : vector<32x64xf32>
    %cst_158 = arith.constant -1.45315206 : f32
    %362 = vector.broadcast %cst_158 : f32 to vector<32x64xf32>
    %363 = arith.addf %361, %362 : vector<32x64xf32>
    %364 = arith.mulf %363, %359 : vector<32x64xf32>
    %cst_159 = arith.constant 1.42141378 : f32
    %365 = vector.broadcast %cst_159 : f32 to vector<32x64xf32>
    %366 = arith.addf %364, %365 : vector<32x64xf32>
    %367 = arith.mulf %366, %359 : vector<32x64xf32>
    %cst_160 = arith.constant -0.284496725 : f32
    %368 = vector.broadcast %cst_160 : f32 to vector<32x64xf32>
    %369 = arith.addf %367, %368 : vector<32x64xf32>
    %370 = arith.mulf %369, %359 : vector<32x64xf32>
    %cst_161 = arith.constant 0.254829586 : f32
    %371 = vector.broadcast %cst_161 : f32 to vector<32x64xf32>
    %372 = arith.addf %370, %371 : vector<32x64xf32>
    %373 = arith.mulf %372, %359 : vector<32x64xf32>
    %cst_162 = arith.constant 0.000000e+00 : f32
    %374 = vector.broadcast %cst_162 : f32 to vector<32x64xf32>
    %375 = arith.subf %374, %353 : vector<32x64xf32>
    %376 = arith.mulf %375, %353 : vector<32x64xf32>
    %377 = math.exp %376 : vector<32x64xf32>
    %378 = arith.mulf %373, %377 : vector<32x64xf32>
    %cst_163 = arith.constant 1.000000e+00 : f32
    %379 = vector.broadcast %cst_163 : f32 to vector<32x64xf32>
    %380 = arith.subf %379, %378 : vector<32x64xf32>
    %cst_164 = arith.constant 0.000000e+00 : f32
    %381 = vector.broadcast %cst_164 : f32 to vector<32x64xf32>
    %382 = arith.cmpf oge, %352, %381 : vector<32x64xf32>
    %cst_165 = arith.constant 0.000000e+00 : f32
    %383 = vector.broadcast %cst_165 : f32 to vector<32x64xf32>
    %384 = arith.subf %383, %380 : vector<32x64xf32>
    %385 = arith.select %382, %380, %384 : vector<32x64xi1>, vector<32x64xf32>
    %cst_166 = arith.constant 1.000000e+00 : f32
    %386 = vector.broadcast %cst_166 : f32 to vector<32x64xf32>
    %387 = arith.addf %386, %385 : vector<32x64xf32>
    %388 = arith.mulf %350, %387 : vector<32x64xf32>
    %389 = arith.truncf %388 : vector<32x64xf32> to vector<32x64xbf16>
    %c0_167 = arith.constant 0 : index
    %c0_168 = arith.constant 0 : index
    %c0_169 = arith.constant 0 : index
    %390 = vector.load %arg15[%c0_167, %c0_168, %c0_169] : memref<1x64x32xbf16, #tpu.memory_space<vmem>>, vector<1x64x32xbf16>
    %391 = vector.shape_cast %390 : vector<1x64x32xbf16> to vector<64x32xbf16>
    %cst_170 = arith.constant dense<0.000000e+00> : vector<32x32xf32>
    %392 = tpu.matmul %389, %391, %cst_170 {dimension_numbers = #tpu.dot_dimension_numbers<[1], [0], [0], [1], [0, 0, 1, 1], [], []>} : vector<32x64xbf16>, vector<64x32xbf16>, vector<32x32xf32> -> vector<32x32xf32>
    %c0_171 = arith.constant 0 : index
    %c0_172 = arith.constant 0 : index
    %c0_173 = arith.constant 0 : index
    %393 = vector.load %arg16[%c0_171, %c0_172, %c0_173] : memref<1x1x32xf32, #tpu.memory_space<vmem>>, vector<1x1x32xf32>
    %394 = vector.shape_cast %393 : vector<1x1x32xf32> to vector<1x32xf32>
    %395 = vector.broadcast %394 : vector<1x32xf32> to vector<32x32xf32>
    %396 = arith.addf %392, %395 : vector<32x32xf32>
    %397 = arith.addf %396, %340 : vector<32x32xf32>
    %c0_174 = arith.constant 0 : index
    %c0_175 = arith.constant 0 : index
    %398 = vector.load %arg17[%c0_174, %c0_175] : memref<32x32xf32, #tpu.memory_space<vmem>>, vector<32x32xf32>
    tpu.vector_store %arg17[%c0_174, %c0_175], %397 {strides = array<i32>} : memref<32x32xf32, #tpu.memory_space<vmem>>, vector<32x32xf32>,
    return
  }
  func.func @transform_0(%arg0: i32, %arg1: i32) -> (i32, i32) {
    %c0_i32 = arith.constant 0 : i32
    %c0_i32_0 = arith.constant 0 : i32
    return %arg0, %c0_i32 : i32, i32
  }
  func.func @transform_1(%arg0: i32, %arg1: i32) -> (i32, i32, i32) {
    %c0_i32 = arith.constant 0 : i32
    %c0_i32_0 = arith.constant 0 : i32
    %c0_i32_1 = arith.constant 0 : i32
    return %arg0, %c0_i32, %c0_i32_0 : i32, i32, i32
  }
  func.func @transform_2(%arg0: i32, %arg1: i32) -> (i32, i32, i32) {
    %c0_i32 = arith.constant 0 : i32
    %c0_i32_0 = arith.constant 0 : i32
    %c0_i32_1 = arith.constant 0 : i32
    return %arg1, %c0_i32, %c0_i32_0 : i32, i32, i32
  }
  func.func @transform_3(%arg0: i32, %arg1: i32) -> (i32, i32, i32) {
    %c0_i32 = arith.constant 0 : i32
    %c0_i32_0 = arith.constant 0 : i32
    %c0_i32_1 = arith.constant 0 : i32
    return %arg1, %c0_i32, %c0_i32_0 : i32, i32, i32
  }
  func.func @transform_4(%arg0: i32, %arg1: i32) -> (i32, i32, i32) {
    %c0_i32 = arith.constant 0 : i32
    %c0_i32_0 = arith.constant 0 : i32
    %c0_i32_1 = arith.constant 0 : i32
    return %arg1, %c0_i32, %c0_i32_0 : i32, i32, i32
  }
  func.func @transform_5(%arg0: i32, %arg1: i32) -> (i32, i32, i32) {
    %c0_i32 = arith.constant 0 : i32
    %c0_i32_0 = arith.constant 0 : i32
    %c0_i32_1 = arith.constant 0 : i32
    return %arg1, %c0_i32, %c0_i32_0 : i32, i32, i32
  }
  func.func @transform_6(%arg0: i32, %arg1: i32) -> (i32, i32, i32) {
    %c0_i32 = arith.constant 0 : i32
    %c0_i32_0 = arith.constant 0 : i32
    %c0_i32_1 = arith.constant 0 : i32
    return %arg1, %c0_i32, %c0_i32_0 : i32, i32, i32
  }
  func.func @transform_7(%arg0: i32, %arg1: i32) -> (i32, i32, i32) {
    %c0_i32 = arith.constant 0 : i32
    %c0_i32_0 = arith.constant 0 : i32
    %c0_i32_1 = arith.constant 0 : i32
    return %arg1, %c0_i32, %c0_i32_0 : i32, i32, i32
  }
  func.func @transform_8(%arg0: i32, %arg1: i32) -> (i32, i32, i32) {
    %c0_i32 = arith.constant 0 : i32
    %c0_i32_0 = arith.constant 0 : i32
    %c0_i32_1 = arith.constant 0 : i32
    return %arg1, %c0_i32, %c0_i32_0 : i32, i32, i32
  }
  func.func @transform_9(%arg0: i32, %arg1: i32) -> (i32, i32, i32) {
    %c0_i32 = arith.constant 0 : i32
    %c0_i32_0 = arith.constant 0 : i32
    %c0_i32_1 = arith.constant 0 : i32
    return %arg1, %c0_i32, %c0_i32_0 : i32, i32, i32
  }
  func.func @transform_10(%arg0: i32, %arg1: i32) -> (i32, i32, i32) {
    %c0_i32 = arith.constant 0 : i32
    %c0_i32_0 = arith.constant 0 : i32
    %c0_i32_1 = arith.constant 0 : i32
    return %arg1, %c0_i32, %c0_i32_0 : i32, i32, i32
  }
  func.func @transform_11(%arg0: i32, %arg1: i32) -> (i32, i32, i32) {
    %c0_i32 = arith.constant 0 : i32
    %c0_i32_0 = arith.constant 0 : i32
    %c0_i32_1 = arith.constant 0 : i32
    return %arg1, %c0_i32, %c0_i32_0 : i32, i32, i32
  }
  func.func @transform_12(%arg0: i32, %arg1: i32) -> (i32, i32, i32) {
    %c0_i32 = arith.constant 0 : i32
    %c0_i32_0 = arith.constant 0 : i32
    %c0_i32_1 = arith.constant 0 : i32
    return %arg1, %c0_i32, %c0_i32_0 : i32, i32, i32
  }
  func.func @transform_13(%arg0: i32, %arg1: i32) -> (i32, i32, i32) {
    %c0_i32 = arith.constant 0 : i32
    %c0_i32_0 = arith.constant 0 : i32
    %c0_i32_1 = arith.constant 0 : i32
    return %arg1, %c0_i32, %c0_i32_0 : i32, i32, i32
  }
  func.func @transform_14(%arg0: i32, %arg1: i32) -> (i32, i32, i32) {
    %c0_i32 = arith.constant 0 : i32
    %c0_i32_0 = arith.constant 0 : i32
    %c0_i32_1 = arith.constant 0 : i32
    return %arg1, %c0_i32, %c0_i32_0 : i32, i32, i32
  }
  func.func @transform_15(%arg0: i32, %arg1: i32) -> (i32, i32) {
    %c0_i32 = arith.constant 0 : i32
    %c0_i32_0 = arith.constant 0 : i32
    return %arg0, %c0_i32 : i32, i32
  }
}

module attributes {stable_mosaic.version = 11 : i64} {
  func.func @_head_proj_kernel(%arg0: i32, %arg1: memref<4x32xf32, #tpu.memory_space<vmem>>, %arg2: memref<1x32xf32, #tpu.memory_space<vmem>>, %arg3: memref<1x32xf32, #tpu.memory_space<vmem>>, %arg4: memref<32x32xbf16, #tpu.memory_space<vmem>>, %arg5: memref<1x32xf32, #tpu.memory_space<vmem>>, %arg6: memref<32x64xbf16, #tpu.memory_space<vmem>>, %arg7: memref<1x64xf32, #tpu.memory_space<vmem>>, %arg8: memref<64x64xbf16, #tpu.memory_space<vmem>>, %arg9: memref<1x64xf32, #tpu.memory_space<vmem>>, %arg10: memref<64x64xbf16, #tpu.memory_space<vmem>>, %arg11: memref<1x64xf32, #tpu.memory_space<vmem>>, %arg12: memref<1x64xf32, #tpu.memory_space<vmem>>, %arg13: memref<1x64xf32, #tpu.memory_space<vmem>>, %arg14: memref<64x16xbf16, #tpu.memory_space<vmem>>, %arg15: memref<1x16xf32, #tpu.memory_space<vmem>>, %arg16: memref<4x32xf32, #tpu.memory_space<vmem>>, %arg17: memref<4x16xf32, #tpu.memory_space<vmem>>) attributes {dimension_semantics = [#tpu.dimension_semantics<parallel>], iteration_bounds = array<i64: 1>, scalar_prefetch = 0 : i64, scratch_operands = 0 : i64, tpu.core_type = #tpu.core_type<tc>, window_params = [{transform_indices = @transform_0, window_bounds = array<i64: 4, 32>}, {pipeline_mode = #tpu.pipeline_mode<synchronous>, transform_indices = @transform_1, window_bounds = array<i64: 1, 32>}, {pipeline_mode = #tpu.pipeline_mode<synchronous>, transform_indices = @transform_2, window_bounds = array<i64: 1, 32>}, {pipeline_mode = #tpu.pipeline_mode<synchronous>, transform_indices = @transform_3, window_bounds = array<i64: 32, 32>}, {pipeline_mode = #tpu.pipeline_mode<synchronous>, transform_indices = @transform_4, window_bounds = array<i64: 1, 32>}, {pipeline_mode = #tpu.pipeline_mode<synchronous>, transform_indices = @transform_5, window_bounds = array<i64: 32, 64>}, {pipeline_mode = #tpu.pipeline_mode<synchronous>, transform_indices = @transform_6, window_bounds = array<i64: 1, 64>}, {pipeline_mode = #tpu.pipeline_mode<synchronous>, transform_indices = @transform_7, window_bounds = array<i64: 64, 64>}, {pipeline_mode = #tpu.pipeline_mode<synchronous>, transform_indices = @transform_8, window_bounds = array<i64: 1, 64>}, {pipeline_mode = #tpu.pipeline_mode<synchronous>, transform_indices = @transform_9, window_bounds = array<i64: 64, 64>}, {pipeline_mode = #tpu.pipeline_mode<synchronous>, transform_indices = @transform_10, window_bounds = array<i64: 1, 64>}, {pipeline_mode = #tpu.pipeline_mode<synchronous>, transform_indices = @transform_11, window_bounds = array<i64: 1, 64>}, {pipeline_mode = #tpu.pipeline_mode<synchronous>, transform_indices = @transform_12, window_bounds = array<i64: 1, 64>}, {pipeline_mode = #tpu.pipeline_mode<synchronous>, transform_indices = @transform_13, window_bounds = array<i64: 64, 16>}, {pipeline_mode = #tpu.pipeline_mode<synchronous>, transform_indices = @transform_14, window_bounds = array<i64: 1, 16>}, {transform_indices = @transform_15, window_bounds = array<i64: 4, 32>}, {transform_indices = @transform_16, window_bounds = array<i64: 4, 16>}]} {
    %c0 = arith.constant 0 : index
    %c0_0 = arith.constant 0 : index
    %0 = vector.load %arg1[%c0, %c0_0] : memref<4x32xf32, #tpu.memory_space<vmem>>, vector<4x32xf32>
    %c0_1 = arith.constant 0 : index
    %c0_2 = arith.constant 0 : index
    %1 = vector.load %arg2[%c0_1, %c0_2] : memref<1x32xf32, #tpu.memory_space<vmem>>, vector<1x32xf32>
    %c0_3 = arith.constant 0 : index
    %c0_4 = arith.constant 0 : index
    %2 = vector.load %arg3[%c0_3, %c0_4] : memref<1x32xf32, #tpu.memory_space<vmem>>, vector<1x32xf32>
    %cst = arith.constant dense<0.000000e+00> : vector<4xf32>
    %3 = vector.multi_reduction <add>, %0, %cst [1] : vector<4x32xf32> to vector<4xf32>
    %4 = vector.shape_cast %3 : vector<4xf32> to vector<4x1xf32>
    %cst_5 = arith.constant 3.200000e+01 : f32
    %5 = vector.broadcast %cst_5 : f32 to vector<4x1xf32>
    %6 = arith.divf %4, %5 : vector<4x1xf32>
    %7 = vector.broadcast %6 : vector<4x1xf32> to vector<4x32xf32>
    %8 = arith.subf %0, %7 : vector<4x32xf32>
    %9 = arith.mulf %8, %8 : vector<4x32xf32>
    %cst_6 = arith.constant dense<0.000000e+00> : vector<4xf32>
    %10 = vector.multi_reduction <add>, %9, %cst_6 [1] : vector<4x32xf32> to vector<4xf32>
    %11 = vector.shape_cast %10 : vector<4xf32> to vector<4x1xf32>
    %cst_7 = arith.constant 3.200000e+01 : f32
    %12 = vector.broadcast %cst_7 : f32 to vector<4x1xf32>
    %13 = arith.divf %11, %12 : vector<4x1xf32>
    %14 = vector.broadcast %6 : vector<4x1xf32> to vector<4x32xf32>
    %15 = arith.subf %0, %14 : vector<4x32xf32>
    %cst_8 = arith.constant 9.99999974E-6 : f32
    %16 = vector.broadcast %cst_8 : f32 to vector<4x1xf32>
    %17 = arith.addf %13, %16 : vector<4x1xf32>
    %18 = math.rsqrt %17 : vector<4x1xf32>
    %19 = vector.broadcast %18 : vector<4x1xf32> to vector<4x32xf32>
    %20 = arith.mulf %15, %19 : vector<4x32xf32>
    %21 = vector.broadcast %1 : vector<1x32xf32> to vector<4x32xf32>
    %22 = arith.mulf %20, %21 : vector<4x32xf32>
    %23 = vector.broadcast %2 : vector<1x32xf32> to vector<4x32xf32>
    %24 = arith.addf %22, %23 : vector<4x32xf32>
    %25 = arith.truncf %24 : vector<4x32xf32> to vector<4x32xbf16>
    %c0_9 = arith.constant 0 : index
    %c0_10 = arith.constant 0 : index
    %26 = vector.load %arg4[%c0_9, %c0_10] : memref<32x32xbf16, #tpu.memory_space<vmem>>, vector<32x32xbf16>
    %cst_11 = arith.constant dense<0.000000e+00> : vector<4x32xf32>
    %27 = tpu.matmul %25, %26, %cst_11 {dimension_numbers = #tpu.dot_dimension_numbers<[1], [0], [0], [1], [0, 0, 1, 1], [], []>} : vector<4x32xbf16>, vector<32x32xbf16>, vector<4x32xf32> -> vector<4x32xf32>
    %c0_12 = arith.constant 0 : index
    %c0_13 = arith.constant 0 : index
    %28 = vector.load %arg5[%c0_12, %c0_13] : memref<1x32xf32, #tpu.memory_space<vmem>>, vector<1x32xf32>
    %29 = vector.broadcast %28 : vector<1x32xf32> to vector<4x32xf32>
    %30 = arith.addf %27, %29 : vector<4x32xf32>
    %c0_14 = arith.constant 0 : index
    %c0_15 = arith.constant 0 : index
    %31 = vector.load %arg16[%c0_14, %c0_15] : memref<4x32xf32, #tpu.memory_space<vmem>>, vector<4x32xf32>
    tpu.vector_store %arg16[%c0_14, %c0_15], %30 {strides = array<i32>} : memref<4x32xf32, #tpu.memory_space<vmem>>, vector<4x32xf32>,
    %32 = arith.truncf %30 : vector<4x32xf32> to vector<4x32xbf16>
    %c0_16 = arith.constant 0 : index
    %c0_17 = arith.constant 0 : index
    %33 = vector.load %arg6[%c0_16, %c0_17] : memref<32x64xbf16, #tpu.memory_space<vmem>>, vector<32x64xbf16>
    %cst_18 = arith.constant dense<0.000000e+00> : vector<4x64xf32>
    %34 = tpu.matmul %32, %33, %cst_18 {dimension_numbers = #tpu.dot_dimension_numbers<[1], [0], [0], [1], [0, 0, 1, 1], [], []>} : vector<4x32xbf16>, vector<32x64xbf16>, vector<4x64xf32> -> vector<4x64xf32>
    %c0_19 = arith.constant 0 : index
    %c0_20 = arith.constant 0 : index
    %35 = vector.load %arg7[%c0_19, %c0_20] : memref<1x64xf32, #tpu.memory_space<vmem>>, vector<1x64xf32>
    %36 = vector.broadcast %35 : vector<1x64xf32> to vector<4x64xf32>
    %37 = arith.addf %34, %36 : vector<4x64xf32>
    %cst_21 = arith.constant 5.000000e-01 : f32
    %38 = vector.broadcast %cst_21 : f32 to vector<4x64xf32>
    %39 = arith.mulf %38, %37 : vector<4x64xf32>
    %cst_22 = arith.constant 0.707106769 : f32
    %40 = vector.broadcast %cst_22 : f32 to vector<4x64xf32>
    %41 = arith.mulf %37, %40 : vector<4x64xf32>
    %42 = math.absf %41 : vector<4x64xf32>
    %cst_23 = arith.constant 0.327591091 : f32
    %43 = vector.broadcast %cst_23 : f32 to vector<4x64xf32>
    %44 = arith.mulf %43, %42 : vector<4x64xf32>
    %cst_24 = arith.constant 1.000000e+00 : f32
    %45 = vector.broadcast %cst_24 : f32 to vector<4x64xf32>
    %46 = arith.addf %45, %44 : vector<4x64xf32>
    %cst_25 = arith.constant 1.000000e+00 : f32
    %47 = vector.broadcast %cst_25 : f32 to vector<4x64xf32>
    %48 = arith.divf %47, %46 : vector<4x64xf32>
    %cst_26 = arith.constant 1.06140542 : f32
    %49 = vector.broadcast %cst_26 : f32 to vector<4x64xf32>
    %50 = arith.mulf %49, %48 : vector<4x64xf32>
    %cst_27 = arith.constant -1.45315206 : f32
    %51 = vector.broadcast %cst_27 : f32 to vector<4x64xf32>
    %52 = arith.addf %50, %51 : vector<4x64xf32>
    %53 = arith.mulf %52, %48 : vector<4x64xf32>
    %cst_28 = arith.constant 1.42141378 : f32
    %54 = vector.broadcast %cst_28 : f32 to vector<4x64xf32>
    %55 = arith.addf %53, %54 : vector<4x64xf32>
    %56 = arith.mulf %55, %48 : vector<4x64xf32>
    %cst_29 = arith.constant -0.284496725 : f32
    %57 = vector.broadcast %cst_29 : f32 to vector<4x64xf32>
    %58 = arith.addf %56, %57 : vector<4x64xf32>
    %59 = arith.mulf %58, %48 : vector<4x64xf32>
    %cst_30 = arith.constant 0.254829586 : f32
    %60 = vector.broadcast %cst_30 : f32 to vector<4x64xf32>
    %61 = arith.addf %59, %60 : vector<4x64xf32>
    %62 = arith.mulf %61, %48 : vector<4x64xf32>
    %cst_31 = arith.constant 0.000000e+00 : f32
    %63 = vector.broadcast %cst_31 : f32 to vector<4x64xf32>
    %64 = arith.subf %63, %42 : vector<4x64xf32>
    %65 = arith.mulf %64, %42 : vector<4x64xf32>
    %66 = math.exp %65 : vector<4x64xf32>
    %67 = arith.mulf %62, %66 : vector<4x64xf32>
    %cst_32 = arith.constant 1.000000e+00 : f32
    %68 = vector.broadcast %cst_32 : f32 to vector<4x64xf32>
    %69 = arith.subf %68, %67 : vector<4x64xf32>
    %cst_33 = arith.constant 0.000000e+00 : f32
    %70 = vector.broadcast %cst_33 : f32 to vector<4x64xf32>
    %71 = arith.cmpf oge, %41, %70 : vector<4x64xf32>
    %cst_34 = arith.constant 0.000000e+00 : f32
    %72 = vector.broadcast %cst_34 : f32 to vector<4x64xf32>
    %73 = arith.subf %72, %69 : vector<4x64xf32>
    %74 = arith.select %71, %69, %73 : vector<4x64xi1>, vector<4x64xf32>
    %cst_35 = arith.constant 1.000000e+00 : f32
    %75 = vector.broadcast %cst_35 : f32 to vector<4x64xf32>
    %76 = arith.addf %75, %74 : vector<4x64xf32>
    %77 = arith.mulf %39, %76 : vector<4x64xf32>
    %78 = arith.truncf %77 : vector<4x64xf32> to vector<4x64xbf16>
    %c0_36 = arith.constant 0 : index
    %c0_37 = arith.constant 0 : index
    %79 = vector.load %arg8[%c0_36, %c0_37] : memref<64x64xbf16, #tpu.memory_space<vmem>>, vector<64x64xbf16>
    %cst_38 = arith.constant dense<0.000000e+00> : vector<4x64xf32>
    %80 = tpu.matmul %78, %79, %cst_38 {dimension_numbers = #tpu.dot_dimension_numbers<[1], [0], [0], [1], [0, 0, 1, 1], [], []>} : vector<4x64xbf16>, vector<64x64xbf16>, vector<4x64xf32> -> vector<4x64xf32>
    %c0_39 = arith.constant 0 : index
    %c0_40 = arith.constant 0 : index
    %81 = vector.load %arg9[%c0_39, %c0_40] : memref<1x64xf32, #tpu.memory_space<vmem>>, vector<1x64xf32>
    %82 = vector.broadcast %81 : vector<1x64xf32> to vector<4x64xf32>
    %83 = arith.addf %80, %82 : vector<4x64xf32>
    %cst_41 = arith.constant 5.000000e-01 : f32
    %84 = vector.broadcast %cst_41 : f32 to vector<4x64xf32>
    %85 = arith.mulf %84, %83 : vector<4x64xf32>
    %cst_42 = arith.constant 0.707106769 : f32
    %86 = vector.broadcast %cst_42 : f32 to vector<4x64xf32>
    %87 = arith.mulf %83, %86 : vector<4x64xf32>
    %88 = math.absf %87 : vector<4x64xf32>
    %cst_43 = arith.constant 0.327591091 : f32
    %89 = vector.broadcast %cst_43 : f32 to vector<4x64xf32>
    %90 = arith.mulf %89, %88 : vector<4x64xf32>
    %cst_44 = arith.constant 1.000000e+00 : f32
    %91 = vector.broadcast %cst_44 : f32 to vector<4x64xf32>
    %92 = arith.addf %91, %90 : vector<4x64xf32>
    %cst_45 = arith.constant 1.000000e+00 : f32
    %93 = vector.broadcast %cst_45 : f32 to vector<4x64xf32>
    %94 = arith.divf %93, %92 : vector<4x64xf32>
    %cst_46 = arith.constant 1.06140542 : f32
    %95 = vector.broadcast %cst_46 : f32 to vector<4x64xf32>
    %96 = arith.mulf %95, %94 : vector<4x64xf32>
    %cst_47 = arith.constant -1.45315206 : f32
    %97 = vector.broadcast %cst_47 : f32 to vector<4x64xf32>
    %98 = arith.addf %96, %97 : vector<4x64xf32>
    %99 = arith.mulf %98, %94 : vector<4x64xf32>
    %cst_48 = arith.constant 1.42141378 : f32
    %100 = vector.broadcast %cst_48 : f32 to vector<4x64xf32>
    %101 = arith.addf %99, %100 : vector<4x64xf32>
    %102 = arith.mulf %101, %94 : vector<4x64xf32>
    %cst_49 = arith.constant -0.284496725 : f32
    %103 = vector.broadcast %cst_49 : f32 to vector<4x64xf32>
    %104 = arith.addf %102, %103 : vector<4x64xf32>
    %105 = arith.mulf %104, %94 : vector<4x64xf32>
    %cst_50 = arith.constant 0.254829586 : f32
    %106 = vector.broadcast %cst_50 : f32 to vector<4x64xf32>
    %107 = arith.addf %105, %106 : vector<4x64xf32>
    %108 = arith.mulf %107, %94 : vector<4x64xf32>
    %cst_51 = arith.constant 0.000000e+00 : f32
    %109 = vector.broadcast %cst_51 : f32 to vector<4x64xf32>
    %110 = arith.subf %109, %88 : vector<4x64xf32>
    %111 = arith.mulf %110, %88 : vector<4x64xf32>
    %112 = math.exp %111 : vector<4x64xf32>
    %113 = arith.mulf %108, %112 : vector<4x64xf32>
    %cst_52 = arith.constant 1.000000e+00 : f32
    %114 = vector.broadcast %cst_52 : f32 to vector<4x64xf32>
    %115 = arith.subf %114, %113 : vector<4x64xf32>
    %cst_53 = arith.constant 0.000000e+00 : f32
    %116 = vector.broadcast %cst_53 : f32 to vector<4x64xf32>
    %117 = arith.cmpf oge, %87, %116 : vector<4x64xf32>
    %cst_54 = arith.constant 0.000000e+00 : f32
    %118 = vector.broadcast %cst_54 : f32 to vector<4x64xf32>
    %119 = arith.subf %118, %115 : vector<4x64xf32>
    %120 = arith.select %117, %115, %119 : vector<4x64xi1>, vector<4x64xf32>
    %cst_55 = arith.constant 1.000000e+00 : f32
    %121 = vector.broadcast %cst_55 : f32 to vector<4x64xf32>
    %122 = arith.addf %121, %120 : vector<4x64xf32>
    %123 = arith.mulf %85, %122 : vector<4x64xf32>
    %124 = arith.truncf %123 : vector<4x64xf32> to vector<4x64xbf16>
    %c0_56 = arith.constant 0 : index
    %c0_57 = arith.constant 0 : index
    %125 = vector.load %arg10[%c0_56, %c0_57] : memref<64x64xbf16, #tpu.memory_space<vmem>>, vector<64x64xbf16>
    %cst_58 = arith.constant dense<0.000000e+00> : vector<4x64xf32>
    %126 = tpu.matmul %124, %125, %cst_58 {dimension_numbers = #tpu.dot_dimension_numbers<[1], [0], [0], [1], [0, 0, 1, 1], [], []>} : vector<4x64xbf16>, vector<64x64xbf16>, vector<4x64xf32> -> vector<4x64xf32>
    %c0_59 = arith.constant 0 : index
    %c0_60 = arith.constant 0 : index
    %127 = vector.load %arg11[%c0_59, %c0_60] : memref<1x64xf32, #tpu.memory_space<vmem>>, vector<1x64xf32>
    %128 = vector.broadcast %127 : vector<1x64xf32> to vector<4x64xf32>
    %129 = arith.addf %126, %128 : vector<4x64xf32>
    %cst_61 = arith.constant 5.000000e-01 : f32
    %130 = vector.broadcast %cst_61 : f32 to vector<4x64xf32>
    %131 = arith.mulf %130, %129 : vector<4x64xf32>
    %cst_62 = arith.constant 0.707106769 : f32
    %132 = vector.broadcast %cst_62 : f32 to vector<4x64xf32>
    %133 = arith.mulf %129, %132 : vector<4x64xf32>
    %134 = math.absf %133 : vector<4x64xf32>
    %cst_63 = arith.constant 0.327591091 : f32
    %135 = vector.broadcast %cst_63 : f32 to vector<4x64xf32>
    %136 = arith.mulf %135, %134 : vector<4x64xf32>
    %cst_64 = arith.constant 1.000000e+00 : f32
    %137 = vector.broadcast %cst_64 : f32 to vector<4x64xf32>
    %138 = arith.addf %137, %136 : vector<4x64xf32>
    %cst_65 = arith.constant 1.000000e+00 : f32
    %139 = vector.broadcast %cst_65 : f32 to vector<4x64xf32>
    %140 = arith.divf %139, %138 : vector<4x64xf32>
    %cst_66 = arith.constant 1.06140542 : f32
    %141 = vector.broadcast %cst_66 : f32 to vector<4x64xf32>
    %142 = arith.mulf %141, %140 : vector<4x64xf32>
    %cst_67 = arith.constant -1.45315206 : f32
    %143 = vector.broadcast %cst_67 : f32 to vector<4x64xf32>
    %144 = arith.addf %142, %143 : vector<4x64xf32>
    %145 = arith.mulf %144, %140 : vector<4x64xf32>
    %cst_68 = arith.constant 1.42141378 : f32
    %146 = vector.broadcast %cst_68 : f32 to vector<4x64xf32>
    %147 = arith.addf %145, %146 : vector<4x64xf32>
    %148 = arith.mulf %147, %140 : vector<4x64xf32>
    %cst_69 = arith.constant -0.284496725 : f32
    %149 = vector.broadcast %cst_69 : f32 to vector<4x64xf32>
    %150 = arith.addf %148, %149 : vector<4x64xf32>
    %151 = arith.mulf %150, %140 : vector<4x64xf32>
    %cst_70 = arith.constant 0.254829586 : f32
    %152 = vector.broadcast %cst_70 : f32 to vector<4x64xf32>
    %153 = arith.addf %151, %152 : vector<4x64xf32>
    %154 = arith.mulf %153, %140 : vector<4x64xf32>
    %cst_71 = arith.constant 0.000000e+00 : f32
    %155 = vector.broadcast %cst_71 : f32 to vector<4x64xf32>
    %156 = arith.subf %155, %134 : vector<4x64xf32>
    %157 = arith.mulf %156, %134 : vector<4x64xf32>
    %158 = math.exp %157 : vector<4x64xf32>
    %159 = arith.mulf %154, %158 : vector<4x64xf32>
    %cst_72 = arith.constant 1.000000e+00 : f32
    %160 = vector.broadcast %cst_72 : f32 to vector<4x64xf32>
    %161 = arith.subf %160, %159 : vector<4x64xf32>
    %cst_73 = arith.constant 0.000000e+00 : f32
    %162 = vector.broadcast %cst_73 : f32 to vector<4x64xf32>
    %163 = arith.cmpf oge, %133, %162 : vector<4x64xf32>
    %cst_74 = arith.constant 0.000000e+00 : f32
    %164 = vector.broadcast %cst_74 : f32 to vector<4x64xf32>
    %165 = arith.subf %164, %161 : vector<4x64xf32>
    %166 = arith.select %163, %161, %165 : vector<4x64xi1>, vector<4x64xf32>
    %cst_75 = arith.constant 1.000000e+00 : f32
    %167 = vector.broadcast %cst_75 : f32 to vector<4x64xf32>
    %168 = arith.addf %167, %166 : vector<4x64xf32>
    %169 = arith.mulf %131, %168 : vector<4x64xf32>
    %c0_76 = arith.constant 0 : index
    %c0_77 = arith.constant 0 : index
    %170 = vector.load %arg12[%c0_76, %c0_77] : memref<1x64xf32, #tpu.memory_space<vmem>>, vector<1x64xf32>
    %c0_78 = arith.constant 0 : index
    %c0_79 = arith.constant 0 : index
    %171 = vector.load %arg13[%c0_78, %c0_79] : memref<1x64xf32, #tpu.memory_space<vmem>>, vector<1x64xf32>
    %cst_80 = arith.constant dense<0.000000e+00> : vector<4xf32>
    %172 = vector.multi_reduction <add>, %169, %cst_80 [1] : vector<4x64xf32> to vector<4xf32>
    %173 = vector.shape_cast %172 : vector<4xf32> to vector<4x1xf32>
    %cst_81 = arith.constant 6.400000e+01 : f32
    %174 = vector.broadcast %cst_81 : f32 to vector<4x1xf32>
    %175 = arith.divf %173, %174 : vector<4x1xf32>
    %176 = vector.broadcast %175 : vector<4x1xf32> to vector<4x64xf32>
    %177 = arith.subf %169, %176 : vector<4x64xf32>
    %178 = arith.mulf %177, %177 : vector<4x64xf32>
    %cst_82 = arith.constant dense<0.000000e+00> : vector<4xf32>
    %179 = vector.multi_reduction <add>, %178, %cst_82 [1] : vector<4x64xf32> to vector<4xf32>
    %180 = vector.shape_cast %179 : vector<4xf32> to vector<4x1xf32>
    %cst_83 = arith.constant 6.400000e+01 : f32
    %181 = vector.broadcast %cst_83 : f32 to vector<4x1xf32>
    %182 = arith.divf %180, %181 : vector<4x1xf32>
    %183 = vector.broadcast %175 : vector<4x1xf32> to vector<4x64xf32>
    %184 = arith.subf %169, %183 : vector<4x64xf32>
    %cst_84 = arith.constant 9.99999974E-6 : f32
    %185 = vector.broadcast %cst_84 : f32 to vector<4x1xf32>
    %186 = arith.addf %182, %185 : vector<4x1xf32>
    %187 = math.rsqrt %186 : vector<4x1xf32>
    %188 = vector.broadcast %187 : vector<4x1xf32> to vector<4x64xf32>
    %189 = arith.mulf %184, %188 : vector<4x64xf32>
    %190 = vector.broadcast %170 : vector<1x64xf32> to vector<4x64xf32>
    %191 = arith.mulf %189, %190 : vector<4x64xf32>
    %192 = vector.broadcast %171 : vector<1x64xf32> to vector<4x64xf32>
    %193 = arith.addf %191, %192 : vector<4x64xf32>
    %194 = arith.truncf %193 : vector<4x64xf32> to vector<4x64xbf16>
    %c0_85 = arith.constant 0 : index
    %c0_86 = arith.constant 0 : index
    %195 = vector.load %arg14[%c0_85, %c0_86] : memref<64x16xbf16, #tpu.memory_space<vmem>>, vector<64x16xbf16>
    %cst_87 = arith.constant dense<0.000000e+00> : vector<4x16xf32>
    %196 = tpu.matmul %194, %195, %cst_87 {dimension_numbers = #tpu.dot_dimension_numbers<[1], [0], [0], [1], [0, 0, 1, 1], [], []>} : vector<4x64xbf16>, vector<64x16xbf16>, vector<4x16xf32> -> vector<4x16xf32>
    %c0_88 = arith.constant 0 : index
    %c0_89 = arith.constant 0 : index
    %197 = vector.load %arg15[%c0_88, %c0_89] : memref<1x16xf32, #tpu.memory_space<vmem>>, vector<1x16xf32>
    %198 = vector.broadcast %197 : vector<1x16xf32> to vector<4x16xf32>
    %199 = arith.addf %196, %198 : vector<4x16xf32>
    %c0_90 = arith.constant 0 : index
    %c0_91 = arith.constant 0 : index
    %200 = vector.load %arg17[%c0_90, %c0_91] : memref<4x16xf32, #tpu.memory_space<vmem>>, vector<4x16xf32>
    tpu.vector_store %arg17[%c0_90, %c0_91], %199 {strides = array<i32>} : memref<4x16xf32, #tpu.memory_space<vmem>>, vector<4x16xf32>,
    return
  }
  func.func @transform_0(%arg0: i32) -> (i32, i32) {
    %c0_i32 = arith.constant 0 : i32
    %c0_i32_0 = arith.constant 0 : i32
    return %arg0, %c0_i32 : i32, i32
  }
  func.func @transform_1(%arg0: i32) -> (i32, i32) {
    %c0_i32 = arith.constant 0 : i32
    %c0_i32_0 = arith.constant 0 : i32
    %c0_i32_1 = arith.constant 0 : i32
    return %c0_i32, %c0_i32_0 : i32, i32
  }
  func.func @transform_2(%arg0: i32) -> (i32, i32) {
    %c0_i32 = arith.constant 0 : i32
    %c0_i32_0 = arith.constant 0 : i32
    %c0_i32_1 = arith.constant 0 : i32
    return %c0_i32, %c0_i32_0 : i32, i32
  }
  func.func @transform_3(%arg0: i32) -> (i32, i32) {
    %c0_i32 = arith.constant 0 : i32
    %c0_i32_0 = arith.constant 0 : i32
    %c0_i32_1 = arith.constant 0 : i32
    return %c0_i32, %c0_i32_0 : i32, i32
  }
  func.func @transform_4(%arg0: i32) -> (i32, i32) {
    %c0_i32 = arith.constant 0 : i32
    %c0_i32_0 = arith.constant 0 : i32
    %c0_i32_1 = arith.constant 0 : i32
    return %c0_i32, %c0_i32_0 : i32, i32
  }
  func.func @transform_5(%arg0: i32) -> (i32, i32) {
    %c0_i32 = arith.constant 0 : i32
    %c0_i32_0 = arith.constant 0 : i32
    %c0_i32_1 = arith.constant 0 : i32
    return %c0_i32, %c0_i32_0 : i32, i32
  }
  func.func @transform_6(%arg0: i32) -> (i32, i32) {
    %c0_i32 = arith.constant 0 : i32
    %c0_i32_0 = arith.constant 0 : i32
    %c0_i32_1 = arith.constant 0 : i32
    return %c0_i32, %c0_i32_0 : i32, i32
  }
  func.func @transform_7(%arg0: i32) -> (i32, i32) {
    %c0_i32 = arith.constant 0 : i32
    %c0_i32_0 = arith.constant 0 : i32
    %c0_i32_1 = arith.constant 0 : i32
    return %c0_i32, %c0_i32_0 : i32, i32
  }
  func.func @transform_8(%arg0: i32) -> (i32, i32) {
    %c0_i32 = arith.constant 0 : i32
    %c0_i32_0 = arith.constant 0 : i32
    %c0_i32_1 = arith.constant 0 : i32
    return %c0_i32, %c0_i32_0 : i32, i32
  }
  func.func @transform_9(%arg0: i32) -> (i32, i32) {
    %c0_i32 = arith.constant 0 : i32
    %c0_i32_0 = arith.constant 0 : i32
    %c0_i32_1 = arith.constant 0 : i32
    return %c0_i32, %c0_i32_0 : i32, i32
  }
  func.func @transform_10(%arg0: i32) -> (i32, i32) {
    %c0_i32 = arith.constant 0 : i32
    %c0_i32_0 = arith.constant 0 : i32
    %c0_i32_1 = arith.constant 0 : i32
    return %c0_i32, %c0_i32_0 : i32, i32
  }
  func.func @transform_11(%arg0: i32) -> (i32, i32) {
    %c0_i32 = arith.constant 0 : i32
    %c0_i32_0 = arith.constant 0 : i32
    %c0_i32_1 = arith.constant 0 : i32
    return %c0_i32, %c0_i32_0 : i32, i32
  }
  func.func @transform_12(%arg0: i32) -> (i32, i32) {
    %c0_i32 = arith.constant 0 : i32
    %c0_i32_0 = arith.constant 0 : i32
    %c0_i32_1 = arith.constant 0 : i32
    return %c0_i32, %c0_i32_0 : i32, i32
  }
  func.func @transform_13(%arg0: i32) -> (i32, i32) {
    %c0_i32 = arith.constant 0 : i32
    %c0_i32_0 = arith.constant 0 : i32
    %c0_i32_1 = arith.constant 0 : i32
    return %c0_i32, %c0_i32_0 : i32, i32
  }
  func.func @transform_14(%arg0: i32) -> (i32, i32) {
    %c0_i32 = arith.constant 0 : i32
    %c0_i32_0 = arith.constant 0 : i32
    %c0_i32_1 = arith.constant 0 : i32
    return %c0_i32, %c0_i32_0 : i32, i32
  }
  func.func @transform_15(%arg0: i32) -> (i32, i32) {
    %c0_i32 = arith.constant 0 : i32
    %c0_i32_0 = arith.constant 0 : i32
    return %arg0, %c0_i32 : i32, i32
  }
  func.func @transform_16(%arg0: i32) -> (i32, i32) {
    %c0_i32 = arith.constant 0 : i32
    %c0_i32_0 = arith.constant 0 : i32
    return %arg0, %c0_i32 : i32, i32
  }
}

</mosaic_0001>

<bundles_post_ra>
// kernel: graph_transformer_forward.3
= control target key start
LH: loop header
LB: loop body
LE: loop exit
PB: predicated region body
PF: predicated region fallthrough
CT: control target
= control target key end

     0   :  { %vm57_vm0 = vcmask 1043456   ;;  %vm50_vm1 = vcmask 64512   ;;  %vm226_vm2 = vcmask 130048   ;;  %vm155_vm3 = vcmask 523264   ;;  %s471_s2 = inlined_call_operand.vmem [shape: bf16[8,64], index: 2, kind: input, shape index: {}]   ;;  %s472_s0 = inlined_call_operand.vmem [shape: f32[32,8], index: 0, kind: input, shape index: {}]   ;;  %s473_s4 = inlined_call_operand.vmem [shape: bf16[64,32], index: 4, kind: input, shape index: {}]   ;;  %s474_s6 = inlined_call_operand.vmem [shape: bf16[16,32], index: 6, kind: input, shape index: {}]   ;;  %s475_s1 = inlined_call_operand.vmem [shape: f32[32,16], index: 1, kind: input, shape index: {}]   ;;  %s476_s3 = inlined_call_operand.vmem [shape: f32[1,64], index: 3, kind: input, shape index: {}]   ;;  %s477_s5 = inlined_call_operand.vmem [shape: f32[1,32], index: 5, kind: input, shape index: {}]   ;;  %s478_s7 = inlined_call_operand.vmem [shape: f32[1,32], index: 7, kind: input, shape index: {}]   ;;  %s479_s8 = inlined_call_operand.vmem [shape: f32[32,32], index: 8, kind: output, shape index: {}]  }
   0x1   :  { %v42_v0 = vld [vmem:[%s471_s2] sm:$0xf]  ;;  %v31_v2 = vld [vmem:[%s472_s0 + $0x8] sm:$0xff]  ;;  %v32_v5 = vld [vmem:[%s472_s0 + $0x10] sm:$0xff]  ;;  %vm286_vm4 = vcmask 261120  }
   0x2   :  { %v30_v1 = vld [vmem:[%s472_s0] sm:$0xff]  ;;  %357 = vmatprep.subr.msk.bf16.mxu0 %vm57_vm0, %v42_v0  ;;  %v59_v3 = vsel %vm57_vm0, %v42_v0, 0  ;;  %v33_v6 = vld [vmem:[%s472_s0 + $0x18] sm:$0xff]  ;;  %v359_v9 = vld [vmem:[%s473_s4 + $0x8] sm:$0xff]  }
   0x3   :  { %v34_v4 = vpack.c.bf16 %v31_v2, %v30_v1  ;;  %322 = vmatpush3.bf16.msra.mxu0 %v59_v3  ;;  %v35_v7 = vpack.c.bf16 %v33_v6, %v32_v5  ;;  %v358_v8 = vld [vmem:[%s473_s4] sm:$0xff]   ;;  %v360_v10 = vld [vmem:[%s473_s4 + $0x10] sm:$0xff]   ;;  %v362_v11 = vld [vmem:[%s473_s4 + $0x18] sm:$0xff]  }
   0x4   :  { %327 = vmatprep.subr.bf16.mxu1 %v358_v8  ;;  %v361_v12 = vld [vmem:[%s474_s6] sm:$0xff]   ;;  %v37_v14 = vld [vmem:[%s475_s1 + $0x8] sm:$0xff]  ;;  %v38_v16 = vld [vmem:[%s475_s1 + $0x10] sm:$0xff] }
   0x5   :  { %323 = vmatprep.mubr.msk.bf16.mxu0 %vm50_vm1, %v34_v4  ;;  %328 = vmatpush3.bf16.msra.mxu1 %v358_v8  ;;  %v36_v13 = vld [vmem:[%s475_s1] sm:$0xff]  ;;  %v39_v17 = vld [vmem:[%s475_s1 + $0x18] sm:$0xff] }
   0x6   :  { %324 = vmatmul.mubr.msk.bf16.vlgmr.msra.gmra.mrb[0].mxu0 %vm50_vm1, %v35_v7  ;;  %329 = vmatprep.subr.bf16.mxu1 %v359_v9  ;;  %v40_v15 = vpack.c.bf16 %v37_v14, %v36_v13  ;;  %v41_v18 = vpack.c.bf16 %v39_v17, %v38_v16  ;;  %v295_v19 = vld [vmem:[%s476_s3] ss:$0 sm:$0xff] }
   0x7   :  { %339 = vmatprep.subr.bf16.mxu0 %v361_v12  ;;  %v298_v38 = vld [vmem:[%s477_s5] ss:$0 sm:$0xff] }
   0x8   :  { %340 = vmatpush3.bf16.msra.mxu0 %v361_v12  ;;  %341 = vmatprep.mubr.msk.bf16.mxu0 %vm226_vm2, %v40_v15  ;;  %v305_v43 = vld [vmem:[%s478_s7] ss:$0 sm:$0xff] }
   0x9   :  { %330 = vmatpush3.bf16.msra.mxu1 %v359_v9 }
   0xa   :  { %331 = vmatprep.subr.bf16.mxu1 %v360_v10 }
   0xd   :  { %332 = vmatpush3.bf16.msra.mxu1 %v360_v10 }
   0xe   :  { %333 = vmatprep.subr.bf16.mxu1 %v362_v11  ;;  %342 = vmatmul.mubr.msk.bf16.vlgmr.msra.gmra.mrb[4].mxu0 %vm226_vm2, %v41_v18 }
  0x11   :  { %334 = vmatpush3.bf16.msra.mxu1 %v362_v11 }
  0xd9   :  { %v325_v20 = vpop.f32.mrb[0].mxu0 }
  0xda   :  { %v104_v21 = vadd.f32 %v325_v20, %v295_v19  ;;  %v95_v22 = vpop.f32.mrb[1].mxu0 }
  0xdb   :  { %v96_v23 = vadd.f32 %v295_v19, %v95_v22  ;;  %v326_v24 = vpop.f32.mrb[2].mxu0 }
  0xdc   :  { %v107_v25 = vadd.f32 %v326_v24, %v295_v19  ;;  %v98_v26 = vpop.f32.mrb[3].mxu0  ;;  %v112_v28 = vmax.f32 %v104_v21, 0.0 }
  0xdd   :  { %v99_v27 = vadd.f32 %v295_v19, %v98_v26  ;;  %v110_v30 = vmax.f32 %v96_v23, 0.0 }
  0xde   :  { %v113_v29 = vmax.f32 %v107_v25, 0.0 }
  0xdf   :  { %v111_v31 = vmax.f32 %v99_v27, 0.0 }
  0xe0   :  { %v115_v32 = vpack.c.bf16 %v113_v29, %v112_v28 }
  0xe1   :  { %v114_v33 = vpack.c.bf16 %v111_v31, %v110_v30  ;;  %v343_v34 = vpop.f32.mrb[4].mxu0 }
  0xe2   :  { %v267_v35 = vpop.f32.mrb[5].mxu0 }
  0xe3   :  { %335 = vmatprep.mubr.msk.bf16.mxu1 %vm155_vm3, %v114_v33  ;;  %v344_v36 = vpop.f32.mrb[6].mxu0 }
  0xe4   :  { %336 = vmatmul.mubr.msk.bf16.vlgmr.msra.gmra.mrb[0].mxu1 %vm155_vm3, %v115_v32  ;;  %v270_v37 = vpop.f32.mrb[7].mxu0 }
 0x1b7   :  { %v337_v39 = vpop.f32.mrb[0].mxu1 }
 0x1b8   :  { %v205_v40 = vadd.f32 %v337_v39, %v298_v38  ;;  %v196_v41 = vpop.f32.mrb[1].mxu1 }
 0x1b9   :  { %v197_v42 = vadd.f32 %v298_v38, %v196_v41  ;;  %v338_v44 = vpop.f32.mrb[2].mxu1 }
 0x1ba   :  { %v346_v45 = vadd.f32 %v343_v34, %v205_v40  ;;  %v208_v46 = vadd.f32 %v338_v44, %v298_v38  ;;  %v199_v47 = vpop.f32.mrb[3].mxu1 }
 0x1bb   :  { %v349_v48 = vadd.f32 %v267_v35, %v197_v42  ;;  %v200_v49 = vadd.f32 %v298_v38, %v199_v47 }
 0x1bc   :  { %v347_v50 = vadd.f32 %v346_v45, %v305_v43  ;;  %v352_v51 = vadd.f32 %v305_v43, %v208_v46 }
 0x1bd   :  { %v350_v52 = vadd.f32 %v349_v48, %v305_v43  ;;  %v355_v53 = vadd.f32 %v305_v43, %v200_v49 }
 0x1be   :  { %289 = vst.msk [vmem:[%s479_s8 + $0x10] sm:$0xff] %vm286_vm4, %v347_v50  ;;  %v353_v54 = vadd.f32 %v352_v51, %v344_v36 }
 0x1bf   :  { %287 = vst.msk [vmem:[%s479_s8] sm:$0xff] %vm286_vm4, %v350_v52  ;;  %v356_v55 = vadd.f32 %v355_v53, %v270_v37 }
 0x1c0   :  { %290 = vst.msk [vmem:[%s479_s8 + $0x18] sm:$0xff] %vm286_vm4, %v353_v54 }
 0x1c1   :  { %288 = vst.msk [vmem:[%s479_s8 + $0x8] sm:$0xff] %vm286_vm4, %v356_v55 }

// kernel: graph_transformer_forward.5
= control target key start
LH: loop header
LB: loop body
LE: loop exit
PB: predicated region body
PF: predicated region fallthrough
CT: control target
= control target key end

     0   :  { %s1027_s0 = inlined_call_operand.vmem [shape: f32[4,32], index: 0, kind: input, shape index: {}]   ;;  %s1028_s1 = inlined_call_operand.vmem [shape: f32[1,32], index: 1, kind: input, shape index: {}]   ;;  %s1029_s2 = inlined_call_operand.vmem [shape: f32[1,32], index: 2, kind: input, shape index: {}]   ;;  %s1030_s3 = inlined_call_operand.vmem [shape: bf16[32,32], index: 3, kind: input, shape index: {}]   ;;  %s1031_s4 = inlined_call_operand.vmem [shape: f32[1,32], index: 4, kind: input, shape index: {}]   ;;  %s1032_s5 = inlined_call_operand.vmem [shape: bf16[32,64], index: 5, kind: input, shape index: {}]   ;;  %s1033_s6 = inlined_call_operand.vmem [shape: f32[1,64], index: 6, kind: input, shape index: {}]   ;;  %s1034_s7 = inlined_call_operand.vmem [shape: bf16[64,64], index: 7, kind: input, shape index: {}]   ;;  %s1035_s8 = inlined_call_operand.vmem [shape: f32[1,64], index: 8, kind: input, shape index: {}]   ;;  %s1036_s9 = inlined_call_operand.vmem [shape: bf16[64,64], index: 9, kind: input, shape index: {}]   ;;  %s1037_s10 = inlined_call_operand.vmem [shape: f32[1,64], index: 10, kind: input, shape index: {}]   ;;  %s1038_s11 = inlined_call_operand.vmem [shape: f32[1,64], index: 11, kind: input, shape index: {}]   ;;  %s1039_s12 = inlined_call_operand.vmem [shape: f32[1,64], index: 12, kind: input, shape index: {}]   ;;  %s1040_s13 = inlined_call_operand.vmem [shape: bf16[64,16], index: 13, kind: input, shape index: {}]   ;;  %s1041_s14 = inlined_call_operand.vmem [shape: f32[1,16], index: 14, kind: input, shape index: {}]   ;;  %s1042_s15 = inlined_call_operand.hbm [shape: f32[4,32], index: 15, kind: output, shape index: {0}]   ;;  %s1043_s16 = inlined_call_operand.hbm [shape: f32[4,16], index: 16, kind: output, shape index: {1}]  }
   0x1   :  { %1044 = sst [smem:[#allocation8_spill]] %s1027_s0 }
   0x2   :  { %22 = vsyncpa [#allocation3], 0  ;;  %s1045_s23 = sld [smem:[#allocation8_spill]]  ;;  %vm58_vm0 = vcmask 257024  }
   0x8   :  { %v55_v0 = vld [vmem:[%s1045_s23] sm:$0xf] }
   0x9   :  { %v59_v1 = vsel %vm58_vm0, %v55_v0, 0.0 }
   0xa   :  { %60 = vadd.xlane.f32.xlu0 %v59_v1 }
   0xb   :  { %23 = vsyncpa [#allocation5], 0  ;;  %v722_v7 = vld [vmem:[%s1030_s3] sm:$0xff]   ;;  %v802_v8 = vmov 0.0   ;;  %v723_v9 = vld [vmem:[%s1030_s3 + $0x8] sm:$0xff]   ;;  %vm803_vm1 = vmmov 0  }
   0xc   :  { %666 = vmatprep.subr.bf16.mxu1 %v802_v8  ;;  %682 = vmatprep.subr.bf16.mxu0 %v802_v8  ;;  %v615_v14 = vld [vmem:[%s1028_s1] ss:$0 sm:$0xff]  ;;  %vm111_vm2 = vcmask 261120   ;;  %v725_v21 = vld [vmem:[%s1032_s5 + $0x8] sm:$0xff]   ;;  %v728_v31 = vld [vmem:[%s1034_s7 + $0x10] sm:$0xff]   ;;  %vm290_vm4 = vcmask 523264  }
   0xd   :  { %667 = vmatpush3.bf16.msra.mxu1 %v722_v7  ;;  %670 = vmatprep.mubr.msk.bf16.mxu1 %vm803_vm1, %v802_v8  ;;  %v616_v16 = vld [vmem:[%s1029_s2] ss:$0 sm:$0xff]  ;;  %v727_v30 = vld [vmem:[%s1034_s7 + $0x8] sm:$0xff]   ;;  %v729_v32 = vld [vmem:[%s1034_s7 + $0x18] sm:$0xff]   ;;  %vm473_vm7 = vcmask 519168  }
   0xe   :  { %668 = vmatprep.subr.bf16.mxu1 %v802_v8  ;;  %690 = vmatprep.mubr.msk.bf16.mxu0 %vm803_vm1, %v802_v8  ;;  %v724_v19 = vld [vmem:[%s1032_s5] sm:$0xff]  }
   0xf   :  { %v617_v22 = vld [vmem:[%s1031_s4] ss:$0 sm:$0xff] }
  0x10   :  { %v726_v29 = vld [vmem:[%s1034_s7] sm:$0xff]  }
  0x11   :  { %669 = vmatpush3.bf16.msra.mxu1 %v723_v9  ;;  %683 = vmatpush3.bf16.msra.mxu0 %v726_v29  ;;  %v621_v33 = vld [vmem:[%s1033_s6] ss:$0 sm:$0xff] }
  0x12   :  { %674 = vmatprep.subr.bf16.mxu1 %v802_v8  ;;  %684 = vmatprep.subr.bf16.mxu0 %v802_v8  ;;  %v730_v1 = vld [vmem:[%s1036_s9] sm:$0xff]  }
  0x15   :  { %685 = vmatpush3.bf16.msra.mxu0 %v727_v30 }
  0x16   :  { %686 = vmatprep.subr.bf16.mxu0 %v802_v8 }
  0x19   :  { %687 = vmatpush3.bf16.msra.mxu0 %v728_v31 }
  0x1a   :  { %688 = vmatprep.subr.bf16.mxu0 %v802_v8 }
  0x1d   :  { %689 = vmatpush3.bf16.msra.mxu0 %v729_v32 }
  0x1e   :  { %706 = vmatprep.subr.bf16.mxu0 %v802_v8 }
  0x97   :  { %v61_v2 = vpop.xlane.xlu0 %60 }
  0x98   :  { %v63_v3 = vmul.f32 0.03125, %v61_v2  ;;  %v731_v2 = vld [vmem:[%s1036_s9 + $0x8] sm:$0xff]  }
  0x9a   :  { %v64_v4 = vsub.f32 %v55_v0, %v63_v3  ;;  %v732_v3 = vld [vmem:[%s1036_s9 + $0x10] sm:$0xff]  }
  0x9c   :  { %v65_v5 = vmul.f32 %v64_v4, %v64_v4 }
  0x9e   :  { %v66_v6 = vsel %vm58_vm0, %v65_v5, 0.0  ;;  %v625_v5 = vld [vmem:[%s1035_s8] ss:$0 sm:$0xff] }
  0x9f   :  { %67 = vadd.xlane.f32.xlu0 %v66_v6 }
 0x12c   :  { %v68_v10 = vpop.xlane.xlu0 %67 }
 0x12d   :  { %v69_v11 = vmul.f32 0.03125, %v68_v10 }
 0x12f   :  { %v70_v12 = vadd.f32 1e-05, %v69_v11 }
 0x131   :  { %738 = vrsqrt.f32 %v70_v12 }
 0x13b   :  { %v739_v13 = vpop.eup %738 }
 0x13c   :  { %v72_v15 = vmul.f32 %v739_v13, %v64_v4  ;;  %v733_v4 = vld [vmem:[%s1036_s9 + $0x18] sm:$0xff]  }
 0x13e   :  { %v79_v17 = vmul.f32 %v615_v14, %v72_v15 }
 0x140   :  { %v86_v18 = vadd.f32 %v616_v16, %v79_v17 }
 0x142   :  { %v87_v20 = vpack.c.bf16 %v86_v18, %v86_v18 }
 0x144   :  { %671 = vmatmul.mubr.msk.bf16.vlgmr.msra.gmra.mrb[0].mxu1 %vm111_vm2, %v87_v20 }
 0x145   :  { %675 = vmatpush3.bf16.msra.mxu1 %v724_v19  ;;  %678 = vmatprep.mubr.msk.bf16.mxu1 %vm803_vm1, %v802_v8 }
 0x146   :  { %676 = vmatprep.subr.bf16.mxu1 %v802_v8 }
 0x149   :  { %677 = vmatpush3.bf16.msra.mxu1 %v725_v21 }
 0x14a   :  { %694 = vmatprep.subr.bf16.mxu1 %v802_v8 }
 0x217   :  { %v149_v23 = vpop.f32.mrb[0].mxu1 }
 0x218   :  { %v150_v24 = vadd.f32 %v617_v22, %v149_v23  ;;  %v672_v25 = vpop.f32.mrb[1].mxu1 }
 0x219   :  { %v152_v26 = vpop.f32.mrb[2].mxu1 }
 0x21a   :  { %v156_v27 = vpack.c.bf16 %v150_v24, %v150_v24  ;;  %155 = vst.msk [vmem:[#allocation2] sm:$0xf] %vm58_vm0, %v150_v24  ;;  %v673_v28 = vpop.f32.mrb[3].mxu1 }
 0x21c   :  { %679 = vmatmul.mubr.msk.bf16.vlgmr.msra.gmra.mrb[4].mxu1 %vm111_vm2, %v156_v27 }
 0x21d   :  { %702 = vmatprep.mubr.msk.bf16.mxu1 %vm803_vm1, %v802_v8  ;;  %695 = vmatpush3.bf16.msra.mxu1 %v730_v1 }
 0x21e   :  { %696 = vmatprep.subr.bf16.mxu1 %v802_v8 }
 0x221   :  { %697 = vmatpush3.bf16.msra.mxu1 %v731_v2 }
 0x222   :  { %698 = vmatprep.subr.bf16.mxu1 %v802_v8 }
 0x225   :  { %699 = vmatpush3.bf16.msra.mxu1 %v732_v3 }
 0x226   :  { %700 = vmatprep.subr.bf16.mxu1 %v802_v8 }
 0x229   :  { %701 = vmatpush3.bf16.msra.mxu1 %v733_v4 }
 0x2ef   :  { %v217_v34 = vpop.f32.mrb[4].mxu1 }
 0x2f0   :  { %v218_v35 = vadd.f32 %v621_v33, %v217_v34  ;;  %v680_v36 = vpop.f32.mrb[5].mxu1 }
 0x2f1   :  { %v220_v37 = vpop.f32.mrb[6].mxu1 }
 0x2f2   :  { %v224_v38 = vmul.f32 0.70710677, %v218_v35  ;;  %v681_v39 = vpop.f32.mrb[7].mxu1  ;;  %v223_v61 = vmul.f32 0.5, %v218_v35 }
 0x2f4   :  { %v225_v40 = vand.u32 2147483647, %v224_v38  ;;  %vm245_vm3 = vcmp.ge.f32.partialorder %v224_v38, 0.0  ;;  %v631_v38 = vld [vmem:[%s1037_s10] ss:$0 sm:$0xff] }
 0x2f6   :  { %v226_v41 = vmul.f32 0.3275911, %v225_v40  ;;  %v239_v43 = vsub.f32 0.0, %v225_v40 }
 0x2f8   :  { %v227_v42 = vadd.f32 1.0, %v226_v41  ;;  %v240_v45 = vmul.f32 %v239_v43, %v225_v40 }
 0x2fa   :  { %740 = vrcp.f32 %v227_v42  ;;  %v241_v48 = vmul.f32 1.442695, %v240_v45 }
 0x2fc   :  { %742 = vpow2.f32 %v241_v48 }
 0x304   :  { %v741_v44 = vpop.eup %740 }
 0x305   :  { %v230_v46 = vmul.f32 1.0614054, %v741_v44 }
 0x306   :  { %v743_v56 = vpop.eup %742 }
 0x307   :  { %v231_v47 = vadd.f32 -1.4531521, %v230_v46 }
 0x309   :  { %v232_v49 = vmul.f32 %v741_v44, %v231_v47 }
 0x30b   :  { %v233_v50 = vadd.f32 1.4214138, %v232_v49 }
 0x30d   :  { %v234_v51 = vmul.f32 %v741_v44, %v233_v50 }
 0x30f   :  { %v235_v52 = vadd.f32 -0.28449672, %v234_v51 }
 0x311   :  { %v236_v53 = vmul.f32 %v741_v44, %v235_v52 }
 0x313   :  { %v237_v54 = vadd.f32 0.2548296, %v236_v53 }
 0x315   :  { %v238_v55 = vmul.f32 %v741_v44, %v237_v54 }
 0x317   :  { %v243_v57 = vmul.f32 %v743_v56, %v238_v55 }
 0x319   :  { %v244_v58 = vsub.f32 1.0, %v243_v57 }
 0x31b   :  { %v246_v59 = vsub.f32 0.0, %v244_v58 }
 0x31d   :  { %v247_v60 = vsel %vm245_vm3, %v244_v58, %v246_v59 }
 0x31e   :  { %v248_v62 = vadd.f32 1.0, %v247_v60 }
 0x320   :  { %v249_v63 = vmul.f32 %v248_v62, %v223_v61 }
 0x322   :  { %v250_v0 = vpack.c.bf16 %v249_v63, %v249_v63 }
 0x324   :  { %691 = vmatmul.mubr.msk.bf16.vlgmr.msra.gmra.mrb[0].mxu0 %vm290_vm4, %v250_v0 }
 0x325   :  { %714 = vmatprep.mubr.msk.bf16.mxu0 %vm803_vm1, %v802_v8 }
 0x3f7   :  { %v328_v6 = vpop.f32.mrb[0].mxu0 }
 0x3f8   :  { %v329_v7 = vadd.f32 %v625_v5, %v328_v6  ;;  %v692_v9 = vpop.f32.mrb[1].mxu0 }
 0x3f9   :  { %v331_v10 = vpop.f32.mrb[2].mxu0 }
 0x3fa   :  { %v335_v11 = vmul.f32 0.70710677, %v329_v7  ;;  %v693_v12 = vpop.f32.mrb[3].mxu0  ;;  %v334_v34 = vmul.f32 0.5, %v329_v7 }
 0x3fb   :  { %v734_v12 = vld [vmem:[%s1040_s13] sm:$0xff]  }
 0x3fc   :  { %v336_v13 = vand.u32 2147483647, %v335_v11  ;;  %vm356_vm5 = vcmp.ge.f32.partialorder %v335_v11, 0.0  ;;  %707 = vmatpush3.bf16.msra.mxu0 %v734_v12 }
 0x3fd   :  { %708 = vmatprep.subr.bf16.mxu0 %v802_v8 }
 0x3fe   :  { %v337_v14 = vmul.f32 0.3275911, %v336_v13  ;;  %v350_v16 = vsub.f32 0.0, %v336_v13 }
 0x400   :  { %v338_v15 = vadd.f32 1.0, %v337_v14  ;;  %v351_v18 = vmul.f32 %v350_v16, %v336_v13  ;;  %v735_v13 = vld [vmem:[%s1040_s13 + $0x8] sm:$0xff]   ;;  %v736_v14 = vld [vmem:[%s1040_s13 + $0x10] sm:$0xff]  }
 0x401   :  { %709 = vmatpush3.bf16.msra.mxu0 %v735_v13 }
 0x402   :  { %744 = vrcp.f32 %v338_v15  ;;  %v352_v21 = vmul.f32 1.442695, %v351_v18  ;;  %710 = vmatprep.subr.bf16.mxu0 %v802_v8  ;;  %v737_v15 = vld [vmem:[%s1040_s13 + $0x18] sm:$0xff]   ;;  %s804_s13 = smov [#allocation2]  }
 0x403   :  { %s593_s27 = sshll.u32 %s804_s13, 4  ;;  %s594_s27 = int_to_ptr.vmem [resolvable:$true] %s593_s27 }
 0x404   :  { %746 = vpow2.f32 %v352_v21  ;;  %s754_s6 = scalar_lea.vmem %s594_s27, 64  ;;  %p759_p1 = scmp.lt.s32.totalorder %s594_s27, %s594_s27 }
 0x405   :  { %711 = vmatpush3.bf16.msra.mxu0 %v736_v14  ;;  %p755_p0 = scmp.ne.s32.totalorder %s594_s27, %s754_s6  ;;  %p760_p2 = scmp.lt.s32.totalorder %s754_s6, %s754_s6 }
 0x406   :  { %712 = vmatprep.subr.bf16.mxu0 %v802_v8 }
 0x407   :  { %p761_p3 = por %p760_p2, %p759_p1 }
 0x409   :  { %713 = vmatpush3.bf16.msra.mxu0 %v737_v15  ;;  %p762_p4 = pnand %p761_p3, %p755_p0 }
 0x40c   :  { %v745_v17 = vpop.eup %744 }
 0x40d   :  { %v341_v19 = vmul.f32 1.0614054, %v745_v17 }
 0x40e   :  { %v747_v29 = vpop.eup %746 }
 0x40f   :  { %v342_v20 = vadd.f32 -1.4531521, %v341_v19 }
 0x411   :  { %v343_v22 = vmul.f32 %v745_v17, %v342_v20  ;;  %v637_v20 = vld [vmem:[%s1038_s11] ss:$0 sm:$0xff] }
 0x413   :  { %v344_v23 = vadd.f32 1.4214138, %v343_v22  ;;  %v638_v22 = vld [vmem:[%s1039_s12] ss:$0 sm:$0xff] }
 0x415   :  { %v345_v24 = vmul.f32 %v745_v17, %v344_v23 }
 0x417   :  { %v346_v25 = vadd.f32 -0.28449672, %v345_v24 }
 0x419   :  { %v347_v26 = vmul.f32 %v745_v17, %v346_v25 }
 0x41b   :  { %v348_v27 = vadd.f32 0.2548296, %v347_v26 }
 0x41d   :  { %v349_v28 = vmul.f32 %v745_v17, %v348_v27 }
 0x41f   :  { %v354_v30 = vmul.f32 %v747_v29, %v349_v28 }
 0x421   :  { %v355_v31 = vsub.f32 1.0, %v354_v30 }
 0x423   :  { %v357_v32 = vsub.f32 0.0, %v355_v31 }
 0x425   :  { %v358_v33 = vsel %vm356_vm5, %v355_v31, %v357_v32 }
 0x426   :  { %v359_v35 = vadd.f32 1.0, %v358_v33 }
 0x428   :  { %v360_v36 = vmul.f32 %v359_v35, %v334_v34 }
 0x42a   :  { %v361_v37 = vpack.c.bf16 %v360_v36, %v360_v36 }
 0x42c   :  { %703 = vmatmul.mubr.msk.bf16.vlgmr.msra.gmra.mrb[8].mxu1 %vm290_vm4, %v361_v37 }
 0x4ff   :  { %v438_v39 = vpop.f32.mrb[8].mxu1 }
 0x500   :  { %v439_v40 = vadd.f32 %v631_v38, %v438_v39  ;;  %v704_v41 = vpop.f32.mrb[9].mxu1 }
 0x501   :  { %v441_v42 = vpop.f32.mrb[10].mxu1 }
 0x502   :  { %v445_v43 = vmul.f32 0.70710677, %v439_v40  ;;  %v705_v44 = vpop.f32.mrb[11].mxu1  ;;  %v444_v2 = vmul.f32 0.5, %v439_v40 }
 0x504   :  { %v446_v45 = vand.u32 2147483647, %v445_v43  ;;  %vm466_vm6 = vcmp.ge.f32.partialorder %v445_v43, 0.0 }
 0x506   :  { %v447_v46 = vmul.f32 0.3275911, %v446_v45  ;;  %v460_v48 = vsub.f32 0.0, %v446_v45 }
 0x508   :  { %v448_v47 = vadd.f32 1.0, %v447_v46  ;;  %v461_v50 = vmul.f32 %v460_v48, %v446_v45 }
 0x50a   :  { %748 = vrcp.f32 %v448_v47  ;;  %v462_v53 = vmul.f32 1.442695, %v461_v50 }
 0x50c   :  { %750 = vpow2.f32 %v462_v53 }
 0x514   :  { %v749_v49 = vpop.eup %748 }
 0x515   :  { %v451_v51 = vmul.f32 1.0614054, %v749_v49 }
 0x516   :  { %v751_v61 = vpop.eup %750 }
 0x517   :  { %v452_v52 = vadd.f32 -1.4531521, %v451_v51 }
 0x519   :  { %v453_v54 = vmul.f32 %v749_v49, %v452_v52 }
 0x51b   :  { %v454_v55 = vadd.f32 1.4214138, %v453_v54 }
 0x51d   :  { %v455_v56 = vmul.f32 %v749_v49, %v454_v55 }
 0x51f   :  { %v456_v57 = vadd.f32 -0.28449672, %v455_v56 }
 0x521   :  { %v457_v58 = vmul.f32 %v749_v49, %v456_v57 }
 0x523   :  { %v458_v59 = vadd.f32 0.2548296, %v457_v58 }
 0x525   :  { %v459_v60 = vmul.f32 %v749_v49, %v458_v59 }
 0x527   :  { %v464_v62 = vmul.f32 %v751_v61, %v459_v60 }
 0x529   :  { %v465_v63 = vsub.f32 1.0, %v464_v62 }
 0x52b   :  { %v467_v0 = vsub.f32 0.0, %v465_v63 }
 0x52d   :  { %v468_v1 = vsel %vm466_vm6, %v465_v63, %v467_v0 }
 0x52e   :  { %v469_v3 = vadd.f32 1.0, %v468_v1 }
 0x530   :  { %v470_v4 = vmul.f32 %v469_v3, %v444_v2 }
 0x532   :  { %v474_v5 = vsel %vm473_vm7, %v470_v4, 0.0 }
 0x533   :  { %475 = vadd.xlane.f32.xlu1 %v474_v5 }
 0x5c0   :  { %v476_v6 = vpop.xlane.xlu1 %475 }
 0x5c1   :  { %v478_v7 = vmul.f32 0.015625, %v476_v6 }
 0x5c3   :  { %v479_v9 = vsub.f32 %v470_v4, %v478_v7 }
 0x5c5   :  { %v480_v10 = vmul.f32 %v479_v9, %v479_v9 }
 0x5c7   :  { %v481_v11 = vsel %vm473_vm7, %v480_v10, 0.0 }
 0x5c8   :  { %482 = vadd.xlane.f32.xlu1 %v481_v11 }
 0x655   :  { %v483_v16 = vpop.xlane.xlu1 %482 }
 0x656   :  { %v484_v17 = vmul.f32 0.015625, %v483_v16 }
 0x658   :  { %v485_v18 = vadd.f32 1e-05, %v484_v17 }
 0x65a   :  { %752 = vrsqrt.f32 %v485_v18 }
 0x664   :  { %v753_v19 = vpop.eup %752 }
 0x665   :  { %v487_v21 = vmul.f32 %v753_v19, %v479_v9 }
 0x667   :  { %v494_v8 = vmul.f32 %v637_v20, %v487_v21 }
 0x669   :  { %v501_v23 = vadd.f32 %v638_v22, %v494_v8 }
 0x66b   :  { %v502_v24 = vpack.c.bf16 %v501_v23, %v501_v23 }
 0x66d   :  { %715 = vmatmul.mubr.msk.bf16.vlgmr.msra.gmra.mrb[4].mxu0 %vm290_vm4, %v502_v24 }
 0x66e   :  { %765 = shalt.err (!%p762_p4)
}
 0x66f   :  { %s766_s28 = scalar_lea.hbm %s1042_s15, 64 }
 0x670   :  { %p767_p5 = scmp.ne.s32.totalorder %s1042_s15, %s766_s28  ;;  %p770_p6 = scmp.lt.u32.totalorder %s766_s28, %s1042_s15 }
 0x672   :  { %p772_p7 = pnand %p770_p6, %p767_p5 }
 0x674   :  { %775 = shalt.err (!%p772_p7)
}
 0x675   :  { %596 = dma.vmem_to_hbm [thread:$0]  %s594_s27, 64, %s1042_s15, [#allocation3]   ;;  %v639_v25 = vld [vmem:[%s1041_s14] ss:$0 sm:$0xff]  ;;  %vm585_vm8 = vcmask 125952  }
 0x676   :  { %s805_s8 = smov [#allocation4]  }
 0x677   :  { %s603_s9 = sshll.u32 %s805_s8, 4  ;;  %s604_s9 = int_to_ptr.vmem [resolvable:$true] %s603_s9 }
 0x678   :  { %s776_s10 = scalar_lea.vmem %s604_s9, 64  ;;  %p781_p9 = scmp.lt.s32.totalorder %s604_s9, %s604_s9 }
 0x679   :  { %p777_p8 = scmp.ne.s32.totalorder %s604_s9, %s776_s10  ;;  %p782_p10 = scmp.lt.s32.totalorder %s776_s10, %s776_s10 }
 0x67b   :  { %p783_p11 = por %p782_p10, %p781_p9 }
 0x67d   :  { %p784_p12 = pnand %p783_p11, %p777_p8 }
 0x740   :  { %v579_v26 = vpop.f32.mrb[4].mxu0 }
 0x741   :  { %v580_v27 = vadd.f32 %v639_v25, %v579_v26  ;;  %v716_v28 = vpop.f32.mrb[5].mxu0 }
 0x742   :  { %v582_v29 = vpop.f32.mrb[6].mxu0 }
 0x743   :  { %v717_v30 = vpop.f32.mrb[7].mxu0  ;;  %586 = vst.msk [vmem:[#allocation4] sm:$0xf] %vm585_vm8, %v580_v27 }
 0x744   :  { %787 = shalt.err (!%p784_p12)
}
 0x745   :  { %s788_s14 = scalar_lea.hbm %s1043_s16, 64 }
 0x746   :  { %p789_p13 = scmp.ne.s32.totalorder %s1043_s16, %s788_s14  ;;  %p792_p0 = scmp.lt.u32.totalorder %s788_s14, %s1043_s16 }
 0x748   :  { %p794_p1 = pnand %p792_p0, %p789_p13 }
 0x74a   :  { %797 = shalt.err (!%p794_p1)
}
 0x74b   :  { %606 = dma.vmem_to_hbm [thread:$0]  %s604_s9, 64, %s1043_s16, [#allocation5]  }
 0x74c   :  { %798 = dma.done.wait [#allocation3], 64  }
 0x74d   :  { %799 = vsyncadd [#allocation3], 4294967232 }
 0x74e   :  { %800 = dma.done.wait [#allocation5], 64  }
 0x74f   :  { %801 = vsyncadd [#allocation5], 4294967232 }
 0x750   :  { %613 = vsyncpa [#allocation3], 1 }
 0x751   :  { %614 = vsyncpa [#allocation5], 1 }

// kernel: graph_transformer_forward.4
= control target key start
LH: loop header
LB: loop body
LE: loop exit
PB: predicated region body
PF: predicated region fallthrough
CT: control target
= control target key end

     0   :  { %s3621_s18 = smov 0   ;;  %s3623_s19 = smov 0   ;;  %s4268_s0 = inlined_call_operand.vmem [shape: f32[64,32], index: 0, kind: input, shape index: {}]   ;;  %s4269_s1 = inlined_call_operand.vmem [shape: bf16[4,16,16], index: 1, kind: input, shape index: {}]   ;;  %s4270_s2 = inlined_call_operand.vmem [shape: f32[2,1,32], index: 2, kind: input, shape index: {}]   ;;  %s4271_s3 = inlined_call_operand.vmem [shape: f32[2,1,32], index: 3, kind: input, shape index: {}]   ;;  %s4272_s4 = inlined_call_operand.vmem [shape: bf16[2,32,384], index: 4, kind: input, shape index: {}]   ;;  %s4273_s5 = inlined_call_operand.vmem [shape: f32[2,2,32], index: 5, kind: input, shape index: {}]   ;;  %s4274_s6 = inlined_call_operand.vmem [shape: f32[2,1,2], index: 6, kind: input, shape index: {}]   ;;  %s4275_s7 = inlined_call_operand.vmem [shape: bf16[2,128,32], index: 7, kind: input, shape index: {}]   ;;  %s4276_s8 = inlined_call_operand.vmem [shape: f32[2,1,32], index: 8, kind: input, shape index: {}]   ;;  %s4277_s9 = inlined_call_operand.vmem [shape: f32[2,1,32], index: 9, kind: input, shape index: {}]   ;;  %s4278_s10 = inlined_call_operand.vmem [shape: f32[2,1,32], index: 10, kind: input, shape index: {}]   ;;  %s4279_s11 = inlined_call_operand.vmem [shape: bf16[2,32,64], index: 11, kind: input, shape index: {}]   ;;  %s4280_s12 = inlined_call_operand.vmem [shape: f32[2,1,64], index: 12, kind: input, shape index: {}]   ;;  %s4281_s13 = inlined_call_operand.vmem [shape: bf16[2,64,32], index: 13, kind: input, shape index: {}]   ;;  %s4282_s14 = inlined_call_operand.vmem [shape: f32[2,1,32], index: 14, kind: input, shape index: {}]   ;;  %s4283_s15 = inlined_call_operand.vmem [shape: f32[64,32], index: 15, kind: output, shape index: {}]  }
   0x1   :  { %4288 = sst [smem:[#allocation10_spill]] %s4268_s0  ;;  %s3625_s20 = smov 0  }
   0x2   :  { %4289 = sst [smem:[#allocation11_spill]] %s4269_s1  ;;  %s3627_s21 = smov 0  }
   0x3   :  { %4290 = sst [smem:[#allocation12_spill]] %s4270_s2  ;;  %s3629_s22 = smov 0  }
   0x4   :  { %4291 = sst [smem:[#allocation13_spill]] %s4271_s3 }
   0x5   :  { %4292 = sst [smem:[#allocation14_spill]] %s4272_s4 }
   0x6   :  { %4293 = sst [smem:[#allocation15_spill]] %s4273_s5 }
   0x7   :  { %4294 = sst [smem:[#allocation16_spill]] %s4282_s14 }
   0x8   :  { %4295 = sst [smem:[#allocation17_spill]] %s4283_s15 }
   0x9 LB: > { %4296 = sst [smem:[#allocation4_spill]] %s3523_s20  ;;  %s34_s23 = sadd.s32 1, %s3523_s20  ;;  %s3531_s22 = sphi %s3629_s22, %s25_s22   ;;  %s3527_s21 = sphi %s3627_s21, %s4323_s21   ;;  %s3523_s20 = sphi %s3625_s20, %s4322_s20   ;;  %s3519_s19 = sphi %s3623_s19, %s4321_s19   ;;  %s3515_s18 = sphi %s3621_s18, %s4320_s18  }
   0xa   : > { %4297 = sst [smem:[#allocation5_spill]] %s3527_s21  ;;  %s37_s24 = sadd.s32 1, %s3527_s21 }
   0xb   : > { %4298 = sst [smem:[#allocation6_spill]] %s3531_s22  ;;  %p35_p0 = scmp.ge.s32.totalorder %s34_s23, 2 }
   0xc   : > { %p3018_p1 = scmp.ge.s32.totalorder %s3531_s22, 1  ;;  %p575_p2 = scmp.lt.s32.totalorder %s3531_s22, 5 }
   0xd   : > { %s4325_s23 = smov (%p35_p0, %s34_s23), 0  ;;  %s4327_s24 = smov (!%p35_p0, %s37_s24), %s3527_s21 }
   0xe   : > { %4299 = sst [smem:[#allocation7_spill]] %s4325_s23  ;;  %p576_p3 = pnand %p3018_p1, %p575_p2 }
   0xf   : > { %p39_p4 = scmp.ge.s32.totalorder %s4327_s24, 2 }
  0x10   : > { %579 = sbr.rel (%p576_p3) target bundleno = 2795 (0xaeb), region = 80 }
  0x11   : > { %s4329_s24 = smov (%p39_p4, %s4327_s24), 0 }
  0x12   : > { %4300 = sst [smem:[#allocation8_spill]] %s4329_s24 }
  0x17   : > { %s3019_s25 = sshll.u32 %s3519_s19, 2  ;;  %s3021_s26 = sshll.u32 %s3519_s19, 1 }
  0x18   : > { %p678_p5 = scmp.lt.s32.totalorder %s3019_s25, 7  ;;  %p684_p6 = scmp.lt.s32.totalorder %s3021_s26, 3 }
  0x19   : > { %p690_p7 = scmp.lt.s32.totalorder %s3515_s18, 1  ;;  %s4301_s0 = sld [smem:[#allocation10_spill]] }
  0x1a   : > { %s4331_s25 = smov (!%p678_p5, %s3019_s25), 7  ;;  %s4333_s26 = smov (!%p684_p6, %s3021_s26), 3 }
  0x1b   : > { %s3020_s27 = sshll.u32 %s4331_s25, 3  ;;  %s3091_s16 = sshll.u32 %s4333_s26, 3 }
  0x1c   : > { %s4302_s1 = sld [smem:[#allocation11_spill]]  ;;  %s4304_s15 = sld [smem:[#allocation17_spill]] }
  0x1d   : > { %s3670_s22 = scalar_select %p690_p7, %s3515_s18, 1 }
  0x1e   : > { %s4307_s5 = sld [smem:[#allocation15_spill]]  ;;  %s4308_s4 = sld [smem:[#allocation14_spill]] }
  0x1f   : > { %s3657_s30 = scalar_lea.vmem %s4301_s0, %s3020_s27  ;;  %s3025_s28 = sshll.u32 %s3670_s22, 1 }
  0x20   : > { %s3094_s2 = sshll.u32 %s3670_s22, 5  ;;  %s4309_s0 = sld [smem:[#allocation16_spill]] }
  0x21   : > { %s3728_s14 = scalar_lea.vmem %s4281_s13, %s3094_s2  ;;  %p3034_p8 = scmp.ne.s32.totalorder %s3515_s18, 0 }
  0x22   : > { %s3662_s24 = scalar_lea.vmem %s4302_s1, %s3091_s16  ;;  %s3667_s19 = scalar_lea.vmem %s4304_s15, %s3020_s27  ;;  %v749_v0 = vld [vmem:[%s3657_s30] sm:$0xff] (!%p3034_p8)  ;;  %vm753_vm0 = vcmask (!%p3034_p8), 261120   ;;  %v750_v1 = vld [vmem:[%s3657_s30 + $0x8] sm:$0xff] (!%p3034_p8)  ;;  %v751_v2 = vld [vmem:[%s3657_s30 + $0x10] sm:$0xff] (!%p3034_p8) }
  0x23   : > { %4303 = sst [smem:[#allocation9_spill]] %s3662_s24  ;;  %s3304_s27 = smul.u32 48, %s3670_s22  ;;  %754 = vst.msk [vmem:[%s3667_s19] sm:$0xff] (!%p3034_p8), %vm753_vm0, %v749_v0  ;;  %v752_v3 = vld [vmem:[%s3657_s30 + $0x18] sm:$0xff] (!%p3034_p8)  ;;  %755 = vst.msk [vmem:[%s3667_s19 + $0x8] sm:$0xff] (!%p3034_p8), %vm753_vm0, %v750_v1 }
  0x24   : > { %s3685_s16 = scalar_lea.vmem %s4307_s5, %s3025_s28  ;;  %s3092_s24 = sshll.u32 %s3670_s22, 6  ;;  %756 = vst.msk [vmem:[%s3667_s19 + $0x10] sm:$0xff] (!%p3034_p8), %vm753_vm0, %v751_v2  ;;  %757 = vst.msk [vmem:[%s3667_s19 + $0x18] sm:$0xff] (!%p3034_p8), %vm753_vm0, %v752_v3 }
  0x25   : > { %s3694_s20 = scalar_lea.vmem %s4308_s4, %s3304_s27  ;;  %s3700_s26 = scalar_lea.vmem %s4275_s7, %s3092_s24 }
  0x26   : > { %s721_s1 = scalar_lea.vmem %s4278_s10, %s3670_s22  ;;  %s3093_s15 = sshll.u32 %s3670_s22, 4 }
  0x27   : > { %s729_s5 = scalar_lea.vmem %s4280_s12, %s3670_s22  ;;  %s3722_s23 = scalar_lea.vmem %s4279_s11, %s3093_s15 }
  0x28   : > { %s737_s25 = scalar_lea.vmem %s4309_s0, %s3670_s22  ;;  %748 = sbr.rel (%p3034_p8) target bundleno = 47 (0x2f), region = 84 }
  0x2f PF: > { %v758_v4 = vld [vmem:[%s3667_s19] sm:$0xff]  ;;  %vm764_vm1 = vcmask 261120   ;;  %v760_v5 = vld [vmem:[%s3667_s19 + $0x10] sm:$0xff]  ;;  %v759_v6 = vld [vmem:[%s3667_s19 + $0x8] sm:$0xff]  ;;  %v3533_v37 = vmov 0   ;;  %s4310_s30 = sld [smem:[#allocation12_spill]]  ;;  %s4314_s29 = scalar_lea.vmem %s4274_s6, %s3670_s22 }
  0x30   : > { %v765_v7 = vsel %vm764_vm1, %v758_v4, 0.0  ;;  %v771_v8 = vsel %vm764_vm1, %v760_v5, 0.0  ;;  %v761_v9 = vld [vmem:[%s3667_s19 + $0x18] sm:$0xff]  ;;  %v768_v10 = vsel %vm764_vm1, %v759_v6, 0.0  ;;  %v3359_v32 = vld [vmem:[%s3694_s20 + $0x4] ss:$12 sps:$4 sm:$0xff]   ;;  %918 = vmatprep.mubr.bf16.mxu0 %v3533_v37  ;;  %3353 = vset.pattern.permute.xlu0 %v3533_v37  ;;  %s4316_s18 = scalar_lea.vmem %s4276_s8, %s3670_s22 }
  0x31   : > { %766 = vadd.xlane.f32.xlu0 %v765_v7  ;;  %772 = vadd.xlane.f32.xlu1 %v771_v8  ;;  %v774_v11 = vsel %vm764_vm1, %v761_v9, 0.0  ;;  %v3361_v33 = vld [vmem:[%s3694_s20] ss:$12 sps:$4 sm:$0xff]   ;;  %v3362_v34 = vld [vmem:[%s3694_s20 + $0x1c] ss:$12 sps:$4 sm:$0xff]   ;;  %s4312_s15 = sld [smem:[#allocation13_spill]] }
  0x32   : > { %886 = vmatprep.subr.bf16.mxu0 %v3359_v32  ;;  %v3364_v35 = vld [vmem:[%s3694_s20 + $0x8] ss:$12 sps:$4 sm:$0xff]   ;;  %v3365_v36 = vld [vmem:[%s3694_s20 + $0x18] ss:$12 sps:$4 sm:$0xff]   ;;  %v3366_v38 = vld [vmem:[%s3694_s20 + $0x20] ss:$12 sps:$4 sm:$0xff]   ;;  %3354 = vset.pattern.permute.xlu1 %v3533_v37 }
  0x33   : > { %887 = vmatpush1.bf16.msra.mxu0 %v3361_v33  ;;  %3160 = vmatprep.subr.bf16.mxu1 %v3364_v35  ;;  %v3534_v7 = vmov 0.0   ;;  %vm3535_vm2 = vmmov 0   ;;  %s3536_s21 = smov 96   ;;  %s3537_s24 = smov 64   ;;  %vm1166_vm4 = vcmask 130048   ;;  %vm1385_vm5 = vcmask 523520  }
  0x34   : > { %888 = vmatprep.subr.bf16.mxu0 %v3362_v34  ;;  %3161 = vmatpush3.bf16.msra.mxu1 %v3364_v35  ;;  %s3538_s2 = smov 32   ;;  %s4315_s0 = sld [smem:[#allocation9_spill]]  ;;  %vm1537_vm6 = vcmask 785920   ;;  %vm1689_vm7 = vcmask 1048320   ;;  %vm2738_vm12 = vcmask 523264  }
  0x35   : > { %769 = vadd.xlane.f32.xlu0 %v768_v10  ;;  %775 = vadd.xlane.f32.xlu1 %v774_v11  ;;  %s4311_s20 = scalar_lea.vmem %s4310_s30, %s3670_s22 }
  0x36   : > { %3162 = vmatprep.subr.bf16.mxu1 %v3366_v38  ;;  %v3035_v53 = vld [vmem:[%s4311_s20] ss:$0 sm:$0xff]  ;;  %s4317_s20 = scalar_lea.vmem %s4277_s9, %s3670_s22 }
  0x37   : > { %889 = vmatpush1.bf16.msra.mxu0 %v3365_v36  ;;  %s4313_s27 = scalar_lea.vmem %s4312_s15, %s3670_s22 }
  0x38   : > { %3163 = vmatpush3.bf16.msra.mxu1 %v3366_v38  ;;  %v3036_v59 = vld [vmem:[%s4313_s27] ss:$0 sm:$0xff]  ;;  %3174 = vmatprep.subr.bf16.mxu0 %v3534_v7 }
  0x39   : > { %3168 = vmatprep.subr.bf16.mxu1 %v3534_v7 }
  0xbe   : > { %v767_v12 = vpop.xlane.xlu0 %766  ;;  %v773_v13 = vpop.xlane.xlu1 %772 }
  0xbf   : > { %v778_v14 = vmul.f32 0.03125, %v767_v12  ;;  %v780_v15 = vmul.f32 0.03125, %v773_v13 }
  0xc1   : > { %v782_v16 = vsub.f32 %v758_v4, %v778_v14  ;;  %v784_v17 = vsub.f32 %v760_v5, %v780_v15 }
  0xc2   : > { %v770_v18 = vpop.xlane.xlu0 %769  ;;  %v776_v19 = vpop.xlane.xlu1 %775 }
  0xc3   : > { %v779_v20 = vmul.f32 0.03125, %v770_v18  ;;  %v781_v21 = vmul.f32 0.03125, %v776_v19  ;;  %v786_v22 = vmul.f32 %v782_v16, %v782_v16  ;;  %v788_v23 = vmul.f32 %v784_v17, %v784_v17 }
  0xc5   : > { %v783_v24 = vsub.f32 %v759_v6, %v779_v20  ;;  %v785_v25 = vsub.f32 %v761_v9, %v781_v21  ;;  %v790_v26 = vsel %vm764_vm1, %v786_v22, 0.0  ;;  %v796_v27 = vsel %vm764_vm1, %v788_v23, 0.0 }
  0xc6   : > { %791 = vadd.xlane.f32.xlu0 %v790_v26 }
  0xc7   : > { %v787_v28 = vmul.f32 %v783_v24, %v783_v24  ;;  %v789_v29 = vmul.f32 %v785_v25, %v785_v25 }
  0xc9   : > { %v793_v30 = vsel %vm764_vm1, %v787_v28, 0.0  ;;  %v799_v31 = vsel %vm764_vm1, %v789_v29, 0.0 }
  0xca   : > { %797 = vadd.xlane.f32.xlu0 %v796_v27  ;;  %794 = vadd.xlane.f32.xlu1 %v793_v30  ;;  %v1002_v27 = vlaneseq  ;;  %v1000_v30 = vld [vmem:[%s3685_s16] sm:$0x3] }
  0xcc   : > { %v1003_v28 = vshrl.u32 %v1002_v27, 7 }
  0xce   : > { %800 = vadd.xlane.f32.xlu1 %v799_v31  ;;  %v1004_v29 = vsub.s32 0, %v1003_v28  ;;  %v1042_v32 = vsub.s32 1, %v1003_v28  ;;  %v3539_v28 = vmov 1  }
  0xd0   : > { %v1005_v31 = vrot.slane %v1000_v30, %v1004_v29  ;;  %v1043_v34 = vrot.slane %v1000_v30, %v1042_v32 }
 0x153   : > { %v792_v39 = vpop.xlane.xlu0 %791 }
 0x154   : > { %v802_v40 = vmul.f32 0.03125, %v792_v39 }
 0x156   : > { %v806_v41 = vadd.f32 1e-05, %v802_v40 }
 0x157   : > { %v795_v42 = vpop.xlane.xlu1 %794  ;;  %v798_v43 = vpop.xlane.xlu0 %797 }
 0x158   : > { %3381 = vrsqrt.f32 %v806_v41  ;;  %v803_v44 = vmul.f32 0.03125, %v795_v42  ;;  %v804_v45 = vmul.f32 0.03125, %v798_v43 }
 0x15a   : > { %v807_v46 = vadd.f32 1e-05, %v803_v44  ;;  %v808_v47 = vadd.f32 1e-05, %v804_v45 }
 0x15b   : > { %v801_v48 = vpop.xlane.xlu1 %800 }
 0x15c   : > { %3383 = vrsqrt.f32 %v807_v46  ;;  %v805_v49 = vmul.f32 0.03125, %v801_v48 }
 0x15d   : > { %3385 = vrsqrt.f32 %v808_v47 }
 0x15e   : > { %v809_v50 = vadd.f32 1e-05, %v805_v49 }
 0x160   : > { %3387 = vrsqrt.f32 %v809_v50 }
 0x162   : > { %v3382_v51 = vpop.eup %3381 }
 0x163   : > { %v814_v52 = vmul.f32 %v3382_v51, %v782_v16 }
 0x165   : > { %v824_v56 = vmul.f32 %v3035_v53, %v814_v52 }
 0x166   : > { %v3384_v54 = vpop.eup %3383 }
 0x167   : > { %v3386_v55 = vpop.eup %3385  ;;  %v815_v57 = vmul.f32 %v3384_v54, %v783_v24  ;;  %v3774_v0 = vadd.f32 %v3036_v59, %v824_v56 }
 0x168   : > { %v816_v58 = vmul.f32 %v3386_v55, %v784_v17 }
 0x169   : > { %v825_v60 = vmul.f32 %v3035_v53, %v815_v57  ;;  %v1006_v33 = vmul.f32 %v1005_v31, %v3774_v0  ;;  %v1044_v36 = vmul.f32 %v1043_v34, %v3774_v0 }
 0x16a   : > { %v3388_v61 = vpop.eup %3387  ;;  %v826_v62 = vmul.f32 %v3035_v53, %v816_v58 }
 0x16b   : > { %v817_v63 = vmul.f32 %v3388_v61, %v785_v25  ;;  %v3776_v1 = vadd.f32 %v3036_v59, %v825_v60  ;;  %v1010_v35 = vsel %vm764_vm1, %v1006_v33, 0.0  ;;  %v1048_v38 = vsel %vm764_vm1, %v1044_v36, 0.0 }
 0x16c   : > { %v3782_v4 = vadd.f32 %v3036_v59, %v826_v62 }
 0x16d   : > { %v827_v2 = vmul.f32 %v3035_v53, %v817_v63  ;;  %v838_v3 = vpack.c.bf16 %v3776_v1, %v3774_v0  ;;  %v1045_v39 = vmul.f32 %v1043_v34, %v3776_v1  ;;  %v1007_v41 = vmul.f32 %v1005_v31, %v3776_v1 }
 0x16e   : > { %v1008_v42 = vmul.f32 %v1005_v31, %v3782_v4  ;;  %v1046_v46 = vmul.f32 %v1043_v34, %v3782_v4 }
 0x16f   : > { %3043 = vmatmul.mubr.msk.bf16.vlgmr.msra.gmra.mrb[0].mxu0 %vm764_vm1, %v838_v3  ;;  %3164 = vmatprep.mubr.msk.bf16.mxu1 %vm764_vm1, %v838_v3  ;;  %v3784_v5 = vadd.f32 %v3036_v59, %v827_v2  ;;  %v1051_v40 = vsel %vm764_vm1, %v1045_v39, 0.0  ;;  %v1013_v43 = vsel %vm764_vm1, %v1007_v41, 0.0 }
 0x170   : > { %928 = vmatprep.mubr.bf16.mxu0 %v3533_v37  ;;  %v1016_v44 = vsel %vm764_vm1, %v1008_v42, 0.0  ;;  %v1054_v48 = vsel %vm764_vm1, %v1046_v46, 0.0 }
 0x171   : > { %v839_v6 = vpack.c.bf16 %v3784_v5, %v3782_v4  ;;  %v1009_v45 = vmul.f32 %v1005_v31, %v3784_v5  ;;  %v1047_v49 = vmul.f32 %v1043_v34, %v3784_v5 }
 0x173   : > { %3165 = vmatmul.mubr.msk.bf16.vlgmr.msra.gmra.mrb[0].mxu1 %vm764_vm1, %v839_v6  ;;  %v1019_v47 = vsel %vm764_vm1, %v1009_v45, 0.0  ;;  %v1057_v50 = vsel %vm764_vm1, %v1047_v49, 0.0 }
 0x174   : > { %3170 = vmatprep.mubr.msk.bf16.mxu1 %vm3535_vm2, %v3534_v7 }
 0x177   : > { %3044 = vmatmul.mubr.msk.bf16.gmra.mrb[4].mxu0 %vm764_vm1, %v839_v6 }
 0x178   : > { %3176 = vmatprep.mubr.msk.bf16.mxu0 %vm3535_vm2, %v3534_v7 }
 0x242   : > { %v920_v8 = vpop.f32.mrb[0].mxu0 }
 0x243   : > { %v922_v9 = vpop.f32.mrb[1].mxu0 }
 0x244   : > { %v924_v10 = vpop.f32.mrb[2].mxu0 }
 0x245   : > { %v1082_v11 = vpack.c.bf16 %v924_v10, %v920_v8  ;;  %v926_v12 = vpop.f32.mrb[3].mxu0 }
 0x246   : > { %v1085_v13 = vpack.c.bf16 %v926_v12, %v922_v9  ;;  %v3166_v14 = vpop.f32.mrb[0].mxu1 }
 0x247   : > { %1246 = vrot.lane.b32.xlu1 %v1082_v11, %s3536_s21  ;;  %v973_v15 = vpop.f32.mrb[1].mxu1 }
 0x248   : > { %1249 = vrot.lane.b32.xlu0 %v1085_v13, %s3536_s21  ;;  %v3167_v16 = vpop.f32.mrb[2].mxu1  ;;  %v1093_v17 = vsel %vm764_vm1, %v1085_v13, 0 }
 0x249   : > { %v3800_v18 = vpack.c.bf16 %v3167_v16, %v3166_v14  ;;  %v976_v19 = vpop.f32.mrb[3].mxu1  ;;  %3169 = vmatpush3.bf16.xpose.msra.mxu1 %v1093_v17 }
 0x24a   : > { %v3802_v20 = vpack.c.bf16 %v976_v19, %v973_v15  ;;  %v930_v21 = vpop.f32.mrb[4].mxu0  ;;  %3180 = vmatprep.subr.bf16.mxu1 %v3534_v7 }
 0x24b   : > { %1401 = vrot.lane.b32.xlu1 %v1085_v13, %s3537_s24  ;;  %v932_v22 = vpop.f32.mrb[5].mxu0 }
 0x24c   : > { %1553 = vrot.lane.b32.xlu0 %v1085_v13, %s3538_s2  ;;  %v934_v23 = vpop.f32.mrb[6].mxu0  ;;  %3175 = vmatpush3.bf16.msra.mxu0 %v3802_v20 }
 0x24d   : > { %v3808_v24 = vpack.c.bf16 %v934_v23, %v930_v21  ;;  %v936_v25 = vpop.f32.mrb[7].mxu0  ;;  %3186 = vmatprep.subr.bf16.mxu0 %v3534_v7 }
 0x24e   : > { %v1702_v26 = vpack.c.bf16 %v936_v25, %v932_v22 }
 0x24f   : > { %1398 = vrot.lane.b32.xlu1 %v1082_v11, %s3537_s24 }
 0x250   : > { %3171 = vmatmul.mubr.msk.bf16.vlgmr.msra.gmra.mrb[4].mxu1 %vm764_vm1, %v1082_v11  ;;  %1865 = vrot.lane.b32.xlu0 %v1702_v26, %s3536_s21  ;;  %v1710_v60 = vsel %vm764_vm1, %v1702_v26, 0 }
 0x251   : > { %3182 = vmatprep.mubr.msk.bf16.mxu1 %vm3535_vm2, %v3534_v7 }
 0x253   : > { %1550 = vrot.lane.b32.xlu1 %v1082_v11, %s3538_s2  ;;  %v3047_v11 = vld [vmem:[%s4314_s29] ss:$0 sm:$0xff] }
 0x254   : > { %2016 = vrot.lane.b32.xlu0 %v1702_v26, %s3537_s24 }
 0x257   : > { %1862 = vrot.lane.b32.xlu1 %v3808_v24, %s3536_s21 }
 0x258   : > { %2167 = vrot.lane.b32.xlu0 %v1702_v26, %s3538_s2 }
 0x25b   : > { %2013 = vrot.lane.b32.xlu1 %v3808_v24, %s3537_s24 }
 0x25f   : > { %2164 = vrot.lane.b32.xlu1 %v3808_v24, %s3538_s2 }
 0x277   : > { %1011 = vadd.xlane.f32.xlu0 %v1010_v35 }
 0x27b   : > { %1049 = vadd.xlane.f32.xlu0 %v1048_v38 }
 0x27f   : > { %1052 = vadd.xlane.f32.xlu0 %v1051_v40 }
 0x283   : > { %1014 = vadd.xlane.f32.xlu1 %v1013_v43  ;;  %1017 = vadd.xlane.f32.xlu0 %v1016_v44 }
 0x287   : > { %1020 = vadd.xlane.f32.xlu1 %v1019_v47  ;;  %1055 = vadd.xlane.f32.xlu0 %v1054_v48 }
 0x28b   : > { %1058 = vadd.xlane.f32.xlu1 %v1057_v50 }
 0x2b9   : > { %v1247_v51 = vpop.permute.xlu1 %1246 }
 0x2ba   : > { %v1250_v52 = vpop.permute.xlu0 %1249 }
 0x2bb   : > { %v1255_v53 = vsel %vm764_vm1, %v1250_v52, 0 }
 0x2bc   : > { %3181 = vmatpush3.bf16.xpose.msra.mxu1 %v1255_v53 }
 0x2bd   : > { %3192 = vmatprep.subr.bf16.mxu1 %v3534_v7  ;;  %v1402_v54 = vpop.permute.xlu1 %1401 }
 0x2be   : > { %v1407_v55 = vsel %vm764_vm1, %v1402_v54, 0  ;;  %v1554_v56 = vpop.permute.xlu0 %1553 }
 0x2bf   : > { %v1559_v58 = vsel %vm764_vm1, %v1554_v56, 0 }
 0x2c1   : > { %v1399_v57 = vpop.permute.xlu1 %1398 }
 0x2c2   : > { %v1866_v61 = vpop.permute.xlu0 %1865 }
 0x2c3   : > { %3183 = vmatmul.mubr.msk.bf16.vlgmr.msra.gmra.mrb[8].mxu1 %vm764_vm1, %v1247_v51  ;;  %v1871_v62 = vsel %vm764_vm1, %v1866_v61, 0 }
 0x2c4   : > { %3193 = vmatpush3.bf16.xpose.msra.mxu1 %v1407_v55  ;;  %3194 = vmatprep.mubr.msk.bf16.mxu1 %vm3535_vm2, %v3534_v7 }
 0x2c5   : > { %3204 = vmatprep.subr.bf16.mxu1 %v3534_v7  ;;  %v1551_v59 = vpop.permute.xlu1 %1550 }
 0x2c6   : > { %v2017_v63 = vpop.permute.xlu0 %2016 }
 0x2c7   : > { %v2022_v3 = vsel %vm764_vm1, %v2017_v63, 0 }
 0x2c9   : > { %v1863_v2 = vpop.permute.xlu1 %1862 }
 0x2ca   : > { %v2168_v6 = vpop.permute.xlu0 %2167 }
 0x2cb   : > { %3195 = vmatmul.mubr.msk.bf16.vlgmr.msra.gmra.mrb[12].mxu1 %vm764_vm1, %v1399_v57  ;;  %v2173_v9 = vsel %vm764_vm1, %v2168_v6, 0 }
 0x2cc   : > { %3205 = vmatpush3.bf16.xpose.msra.mxu1 %v1559_v58  ;;  %3206 = vmatprep.mubr.msk.bf16.mxu1 %vm3535_vm2, %v3534_v7  ;;  %v3096_v58 = vld [vmem:[%s4315_s0] sm:$0xff]  }
 0x2cd   : > { %3216 = vmatprep.subr.bf16.mxu1 %v3534_v7  ;;  %v2014_v8 = vpop.permute.xlu1 %2013  ;;  %v3097_v63 = vunpack.c.l.bf16 %v3096_v58 }
 0x2d1   : > { %v2165_v10 = vpop.permute.xlu1 %2164 }
 0x2d3   : > { %3207 = vmatmul.mubr.msk.bf16.vlgmr.msra.gmra.mrb[16].mxu1 %vm764_vm1, %v1551_v59  ;;  %v1073_v59 = vand.u32 127, %v1002_v27 }
 0x2d4   : > { %3217 = vmatpush3.bf16.xpose.msra.mxu1 %v1710_v60  ;;  %3218 = vmatprep.mubr.msk.bf16.mxu1 %vm3535_vm2, %v3534_v7 }
 0x2d5   : > { %3228 = vmatprep.subr.bf16.mxu1 %v3534_v7  ;;  %vm1074_vm3 = vcmp.lt.s32.totalorder %v1073_v59, 9 }
 0x2db   : > { %3219 = vmatmul.mubr.msk.bf16.vlgmr.msra.gmra.mrb[20].mxu1 %vm764_vm1, %v3808_v24 }
 0x2dc   : > { %3229 = vmatpush3.bf16.xpose.msra.mxu1 %v1871_v62  ;;  %3230 = vmatprep.mubr.msk.bf16.mxu1 %vm3535_vm2, %v3534_v7 }
 0x2dd   : > { %3240 = vmatprep.subr.bf16.mxu1 %v3534_v7 }
 0x2e3   : > { %3231 = vmatmul.mubr.msk.bf16.vlgmr.msra.gmra.mrb[24].mxu1 %vm764_vm1, %v1863_v2 }
 0x2e4   : > { %3241 = vmatpush3.bf16.xpose.msra.mxu1 %v2022_v3  ;;  %3242 = vmatprep.mubr.msk.bf16.mxu1 %vm3535_vm2, %v3534_v7 }
 0x2e5   : > { %3252 = vmatprep.subr.bf16.mxu1 %v3534_v7 }
 0x2eb   : > { %3243 = vmatmul.mubr.msk.bf16.vlgmr.msra.gmra.mrb[28].mxu1 %vm764_vm1, %v2014_v8 }
 0x2ec   : > { %3253 = vmatpush3.bf16.xpose.msra.mxu1 %v2173_v9  ;;  %3254 = vmatprep.mubr.msk.bf16.mxu1 %vm3535_vm2, %v3534_v7 }
 0x2f3   : > { %3255 = vmatmul.mubr.msk.bf16.vlgmr.msra.gmra.mrb[32].mxu1 %vm764_vm1, %v2165_v10 }
 0x304   : > { %v1012_v12 = vpop.xlane.xlu0 %1011 }
 0x305   : > { %v1028_v13 = vadd.f32 %v3047_v11, %v1012_v12  ;;  %v3540_v12 = vmov -1e+30  }
 0x307   : > { %v1032_v14 = vmul.f32 1.442695, %v1028_v13  ;;  %v3884_v13 = vsel %vm1074_vm3, 0.0, %v3540_v12 }
 0x308   : > { %v1050_v15 = vpop.xlane.xlu0 %1049 }
 0x309   : > { %3389 = vpow2.f32 %v1032_v14  ;;  %v1060_v19 = vadd.f32 %v3047_v11, %v1050_v15 }
 0x30b   : > { %v1064_v24 = vmul.f32 1.442695, %v1060_v19 }
 0x30c   : > { %v1053_v21 = vpop.xlane.xlu0 %1052 }
 0x30d   : > { %v1061_v25 = vadd.f32 %v3047_v11, %v1053_v21 }
 0x30f   : > { %v1066_v29 = vmul.f32 1.442695, %v1061_v25 }
 0x310   : > { %v1015_v16 = vpop.xlane.xlu1 %1014  ;;  %v1018_v26 = vpop.xlane.xlu0 %1017 }
 0x311   : > { %v1029_v17 = vadd.f32 %v3047_v11, %v1015_v16  ;;  %v1030_v30 = vadd.f32 %v3047_v11, %v1018_v26 }
 0x313   : > { %v3390_v22 = vpop.eup %3389  ;;  %v1034_v23 = vmul.f32 1.442695, %v1029_v17  ;;  %v1036_v33 = vmul.f32 1.442695, %v1030_v30 }
 0x314   : > { %1140 = vperm.xlu0 %3353, %v3390_v22   ;;  %v1021_v31 = vpop.xlane.xlu1 %1020  ;;  %v1056_v35 = vpop.xlane.xlu0 %1055 }
 0x315   : > { %3391 = vpow2.f32 %v1034_v23  ;;  %v1031_v34 = vadd.f32 %v3047_v11, %v1021_v31  ;;  %v1062_v40 = vadd.f32 %v3047_v11, %v1056_v35 }
 0x316   : > { %3393 = vpow2.f32 %v1064_v24 }
 0x317   : > { %3395 = vpow2.f32 %v1066_v29  ;;  %v1038_v36 = vmul.f32 1.442695, %v1031_v34  ;;  %v1068_v46 = vmul.f32 1.442695, %v1062_v40 }
 0x318   : > { %3358 = vset.pattern.permute.xlu0 %v3539_v28  ;;  %3397 = vpow2.f32 %v1036_v33  ;;  %v1059_v42 = vpop.xlane.xlu1 %1058 }
 0x319   : > { %3399 = vpow2.f32 %v1038_v36  ;;  %v1063_v47 = vadd.f32 %v3047_v11, %v1059_v42  ;;  %v3098_v11 = vunpack.c.h.bf16 %v3096_v58 }
 0x31a   : > { %3401 = vpow2.f32 %v1068_v46 }
 0x31b   : > { %v1070_v48 = vmul.f32 1.442695, %v1063_v47 }
 0x31d   : > { %3403 = vpow2.f32 %v1070_v48 }
 0x31f   : > { %v3392_v32 = vpop.eup %3391 }
 0x320   : > { %1145 = vperm.xlu1 %3354, %v3392_v32   ;;  %v3394_v39 = vpop.eup %3393 }
 0x321   : > { %v3396_v45 = vpop.eup %3395 }
 0x322   : > { %v3398_v49 = vpop.eup %3397 }
 0x323   : > { %v1129_v38 = vpop.f32.mrb[4].mxu1  ;;  %v3400_v50 = vpop.eup %3399 }
 0x324   : > { %v3172_v41 = vpop.f32.mrb[5].mxu1  ;;  %3355 = vset.pattern.permute.xlu1 %v3539_v28  ;;  %v3402_v51 = vpop.eup %3401  ;;  %v1136_v3 = vmul.f32 0.17677669, %v1129_v38 }
 0x325   : > { %v1132_v43 = vpop.f32.mrb[6].mxu1  ;;  %1152 = vperm.xlu1 %3355, %v3394_v39  }
 0x326   : > { %v3173_v44 = vpop.f32.mrb[7].mxu1  ;;  %v1137_v14 = vmul.f32 0.17677669, %v1132_v43 }
 0x327   : > { %v3404_v52 = vpop.eup %3403 }
 0x329   : > { %1157 = vperm.xlu1 %3355, %v3396_v45  }
 0x32d   : > { %3356 = vset.pattern.permute.xlu1 %v3533_v37 }
 0x32e   : > { %1757 = vperm.xlu1 %3356, %v3398_v49  }
 0x332   : > { %1762 = vperm.xlu1 %3356, %v3400_v50  }
 0x336   : > { %3357 = vset.pattern.permute.xlu1 %v3539_v28 }
 0x337   : > { %1769 = vperm.xlu1 %3357, %v3402_v51  }
 0x33b   : > { %1774 = vperm.xlu1 %3357, %v3404_v52  }
 0x393   : > { %v1141_v2 = vpop.permute.xlu0 %1140 }
 0x394   : > { %v1148_v9 = vmul.f32 %v1141_v2, %v1136_v3 }
 0x396   : > { %v1291_v53 = vpop.f32.mrb[8].mxu1 }
 0x397   : > { %v3184_v54 = vpop.f32.mrb[9].mxu1  ;;  %v1298_v6 = vmul.f32 0.17677669, %v1291_v53  ;;  %v3103_v53 = vld [vmem:[%s4315_s0 + $0x8] sm:$0xff]  }
 0x398   : > { %v1294_v55 = vpop.f32.mrb[10].mxu1  ;;  %v3101_v58 = vunpack.c.l.bf16 %v3103_v53 }
 0x399   : > { %v3185_v56 = vpop.f32.mrb[11].mxu1  ;;  %v1299_v27 = vmul.f32 0.17677669, %v1294_v55  ;;  %v1300_v21 = vmul.f32 %v1298_v6, %v1141_v2 }
 0x39e   : > { %v1443_v57 = vpop.f32.mrb[12].mxu1 }
 0x39f   : > { %v1146_v60 = vpop.permute.xlu1 %1145  ;;  %v3196_v61 = vpop.f32.mrb[13].mxu1  ;;  %v1450_v22 = vmul.f32 0.17677669, %v1443_v57 }
 0x3a0   : > { %v1446_v37 = vpop.f32.mrb[14].mxu1  ;;  %v1149_v23 = vmul.f32 %v1146_v60, %v1137_v14  ;;  %v1301_v26 = vmul.f32 %v1299_v27, %v1146_v60 }
 0x3a1   : > { %v3197_v62 = vpop.f32.mrb[15].mxu1  ;;  %v1451_v15 = vmul.f32 0.17677669, %v1446_v37  ;;  %v1452_v40 = vmul.f32 %v1450_v22, %v1141_v2 }
 0x3a3   : > { %v1453_v32 = vmul.f32 %v1451_v15, %v1146_v60 }
 0x3a4   : > { %v1153_v8 = vpop.permute.xlu1 %1152 }
 0x3a5   : > { %v1160_v10 = vmul.f32 %v3097_v63, %v1153_v8 }
 0x3a6   : > { %v1595_v16 = vpop.f32.mrb[16].mxu1 }
 0x3a7   : > { %v3208_v17 = vpop.f32.mrb[17].mxu1  ;;  %v1162_v19 = vadd.f32 %v1160_v10, %v1148_v9  ;;  %v1602_v33 = vmul.f32 0.17677669, %v1595_v16  ;;  %v1302_v34 = vadd.f32 %v1300_v21, %v1160_v10  ;;  %v1454_v48 = vadd.f32 %v1452_v40, %v1160_v10 }
 0x3a8   : > { %v1598_v24 = vpop.f32.mrb[18].mxu1  ;;  %v1158_v25 = vpop.permute.xlu1 %1157  ;;  %v3102_v9 = vunpack.c.h.bf16 %v3103_v53 }
 0x3a9   : > { %v1603_v28 = vmul.f32 0.17677669, %v1598_v24  ;;  %v1161_v29 = vmul.f32 %v3098_v11, %v1158_v25  ;;  %v3209_v30 = vpop.f32.mrb[19].mxu1  ;;  %v3887_v31 = vadd.f32 %v1162_v19, %v3884_v13  ;;  %v1604_v45 = vmul.f32 %v1602_v33, %v1141_v2 }
 0x3aa   : > { %v3900_v47 = vadd.f32 %v1302_v34, %v3884_v13  ;;  %v3913_v59 = vadd.f32 %v1454_v48, %v3884_v13 }
 0x3ab   : > { %v1605_v35 = vmul.f32 %v1603_v28, %v1146_v60  ;;  %v1167_v36 = vsel %vm1166_vm4, %v3887_v31, -inf  ;;  %v1163_v38 = vadd.f32 %v1161_v29, %v1149_v23  ;;  %v1303_v39 = vadd.f32 %v1301_v26, %v1161_v29 }
 0x3ac   : > { %1168 = vmax.xlane.f32.xlu1 %v1167_v36  ;;  %v1455_v41 = vadd.f32 %v1453_v32, %v1161_v29  ;;  %v1606_v60 = vadd.f32 %v1604_v45, %v1160_v10  ;;  %v1306_v37 = vsel %vm1166_vm4, %v3900_v47, -inf  ;;  %v1458_v8 = vsel %vm1166_vm4, %v3913_v59, -inf }
 0x3ad   : > { %v3891_v42 = vpop.permute.xlu1 %1757  ;;  %v3894_v43 = vadd.f32 %v1163_v38, %v3884_v13  ;;  %v3897_v44 = vadd.f32 %v1303_v39, %v3884_v13  ;;  %v1607_v54 = vadd.f32 %v1605_v35, %v1161_v29 }
 0x3ae   : > { %v1746_v46 = vpop.f32.mrb[20].mxu1  ;;  %v3907_v52 = vadd.f32 %v1455_v41, %v3884_v13  ;;  %v3925_v10 = vadd.f32 %v1606_v60, %v3884_v13 }
 0x3af   : > { %v3220_v49 = vpop.f32.mrb[21].mxu1  ;;  %v1170_v50 = vsel %vm1166_vm4, %v3894_v43, -inf  ;;  %v1309_v51 = vsel %vm1166_vm4, %v3897_v44, -inf  ;;  %v1753_v61 = vmul.f32 0.17677669, %v1746_v46  ;;  %v3920_v63 = vadd.f32 %v1607_v54, %v3884_v13 }
 0x3b0   : > { %v1749_v55 = vpop.f32.mrb[22].mxu1  ;;  %1171 = vmax.xlane.f32.xlu0 %v1170_v50  ;;  %1310 = vmax.xlane.f32.xlu1 %v1309_v51  ;;  %v1461_v62 = vsel %vm1166_vm4, %v3907_v52, -inf  ;;  %v1610_v25 = vsel %vm1166_vm4, %v3925_v10, -inf }
 0x3b1   : > { %v3221_v56 = vpop.f32.mrb[23].mxu1  ;;  %v3910_v57 = vpop.permute.xlu1 %1762  ;;  %v1754_v2 = vmul.f32 0.17677669, %v1749_v55  ;;  %v1765_v11 = vmul.f32 %v3891_v42, %v1753_v61  ;;  %v1613_v16 = vsel %vm1166_vm4, %v3920_v63, -inf }
 0x3b3   : > { %v1766_v23 = vmul.f32 %v3910_v57, %v1754_v2 }
 0x3b4   : > { %1307 = vmax.xlane.f32.xlu0 %v1306_v37  ;;  %1462 = vmax.xlane.f32.xlu1 %v1461_v62 }
 0x3b6   : > { %v1907_v3 = vpop.f32.mrb[24].mxu1  ;;  %v1770_v6 = vpop.permute.xlu1 %1769 }
 0x3b7   : > { %v1914_v12 = vmul.f32 0.17677669, %v1907_v3  ;;  %v1777_v14 = vmul.f32 %v3101_v58, %v1770_v6  ;;  %v3232_v15 = vpop.f32.mrb[25].mxu1 }
 0x3b8   : > { %v1910_v27 = vpop.f32.mrb[26].mxu1  ;;  %1459 = vmax.xlane.f32.xlu0 %v1458_v8  ;;  %1614 = vmax.xlane.f32.xlu1 %v1613_v16 }
 0x3b9   : > { %v1916_v17 = vmul.f32 %v1914_v12, %v3891_v42  ;;  %v1915_v19 = vmul.f32 0.17677669, %v1910_v27  ;;  %v3233_v21 = vpop.f32.mrb[27].mxu1  ;;  %v1779_v22 = vadd.f32 %v1777_v14, %v1765_v11 }
 0x3ba   : > { %v1775_v24 = vpop.permute.xlu1 %1774 }
 0x3bb   : > { %v1917_v26 = vmul.f32 %v1915_v19, %v3910_v57  ;;  %v1778_v28 = vmul.f32 %v3102_v9, %v1775_v24  ;;  %v3936_v29 = vadd.f32 %v1779_v22, %v3884_v13  ;;  %v1918_v30 = vadd.f32 %v1916_v17, %v1777_v14 }
 0x3bc   : > { %1611 = vmax.xlane.f32.xlu0 %v1610_v25 }
 0x3bd   : > { %v1780_v32 = vadd.f32 %v1778_v28, %v1766_v23  ;;  %v1919_v33 = vadd.f32 %v1917_v26, %v1778_v28  ;;  %v1783_v38 = vsel %vm1166_vm4, %v3936_v29, -inf  ;;  %v3944_v40 = vadd.f32 %v1918_v30, %v3884_v13 }
 0x3be   : > { %v2058_v34 = vpop.f32.mrb[28].mxu1 }
 0x3bf   : > { %v2065_v35 = vmul.f32 0.17677669, %v2058_v34  ;;  %v3244_v36 = vpop.f32.mrb[29].mxu1  ;;  %v3941_v39 = vadd.f32 %v1780_v32, %v3884_v13  ;;  %v3950_v50 = vadd.f32 %v1919_v33, %v3884_v13  ;;  %v1922_v53 = vsel %vm1166_vm4, %v3944_v40, -inf }
 0x3c0   : > { %v2061_v41 = vpop.f32.mrb[30].mxu1  ;;  %1784 = vmax.xlane.f32.xlu0 %v1783_v38 }
 0x3c1   : > { %v2067_v45 = vmul.f32 %v2065_v35, %v3891_v42  ;;  %v2066_v46 = vmul.f32 0.17677669, %v2061_v41  ;;  %v3245_v48 = vpop.f32.mrb[31].mxu1  ;;  %v1786_v49 = vsel %vm1166_vm4, %v3941_v39, -inf  ;;  %v1925_v55 = vsel %vm1166_vm4, %v3950_v50, -inf }
 0x3c2   : > { %1787 = vmax.xlane.f32.xlu1 %v1786_v49 }
 0x3c3   : > { %v2068_v51 = vmul.f32 %v2066_v46, %v3910_v57  ;;  %v2069_v54 = vadd.f32 %v2067_v45, %v1777_v14 }
 0x3c4   : > { %1923 = vmax.xlane.f32.xlu0 %v1922_v53 }
 0x3c5   : > { %v3958_v56 = vadd.f32 %v2069_v54, %v3884_v13  ;;  %v2070_v58 = vadd.f32 %v2068_v51, %v1778_v28 }
 0x3c6   : > { %v2209_v60 = vpop.f32.mrb[32].mxu1  ;;  %1926 = vmax.xlane.f32.xlu1 %v1925_v55 }
 0x3c7   : > { %v2216_v61 = vmul.f32 0.17677669, %v2209_v60  ;;  %v3256_v37 = vpop.f32.mrb[33].mxu1  ;;  %v2073_v62 = vsel %vm1166_vm4, %v3958_v56, -inf  ;;  %v3963_v2 = vadd.f32 %v2070_v58, %v3884_v13 }
 0x3c8   : > { %v2212_v3 = vpop.f32.mrb[34].mxu1  ;;  %2074 = vmax.xlane.f32.xlu0 %v2073_v62 }
 0x3c9   : > { %v2218_v6 = vmul.f32 %v2216_v61, %v3891_v42  ;;  %v2217_v8 = vmul.f32 0.17677669, %v2212_v3  ;;  %v3257_v9 = vpop.f32.mrb[35].mxu1  ;;  %v2076_v11 = vsel %vm1166_vm4, %v3963_v2, -inf }
 0x3ca   : > { %2077 = vmax.xlane.f32.xlu1 %v2076_v11 }
 0x3cb   : > { %v2219_v12 = vmul.f32 %v2217_v8, %v3910_v57  ;;  %v2220_v15 = vadd.f32 %v2218_v6, %v1777_v14 }
 0x3cd   : > { %v3970_v16 = vadd.f32 %v2220_v15, %v3884_v13  ;;  %v2221_v27 = vadd.f32 %v2219_v12, %v1778_v28 }
 0x3cf   : > { %v3973_v17 = vadd.f32 %v2221_v27, %v3884_v13  ;;  %v2224_v13 = vsel %vm1166_vm4, %v3970_v16, -inf }
 0x439   : > { %v1169_v19 = vpop.xlane.xlu1 %1168 }
 0x43a   : > { %v1173_v21 = vsub.f32 %v3887_v31, %v1169_v19 }
 0x43c   : > { %v1175_v42 = vmul.f32 1.442695, %v1173_v21 }
 0x43d   : > { %v1172_v22 = vpop.xlane.xlu0 %1171  ;;  %v1311_v30 = vpop.xlane.xlu1 %1310 }
 0x43e   : > { %3405 = vpow2.f32 %v1175_v42  ;;  %v1174_v23 = vsub.f32 %v3894_v43, %v1172_v22  ;;  %v2227_v43 = vsel %vm1166_vm4, %v3973_v17, -inf  ;;  %v1313_v38 = vsub.f32 %v3897_v44, %v1311_v30 }
 0x440   : > { %v1177_v24 = vmul.f32 1.442695, %v1174_v23  ;;  %v1316_v46 = vmul.f32 1.442695, %v1313_v38 }
 0x441   : > { %v1308_v26 = vpop.xlane.xlu0 %1307  ;;  %v1463_v34 = vpop.xlane.xlu1 %1462 }
 0x442   : > { %3407 = vpow2.f32 %v1177_v24  ;;  %v1312_v32 = vsub.f32 %v3900_v47, %v1308_v26  ;;  %v1465_v48 = vsub.f32 %v3907_v52, %v1463_v34 }
 0x444   : > { %v1314_v35 = vmul.f32 1.442695, %v1312_v32  ;;  %v1468_v54 = vmul.f32 1.442695, %v1465_v48 }
 0x445   : > { %v1460_v28 = vpop.xlane.xlu0 %1459  ;;  %v1615_v51 = vpop.xlane.xlu1 %1614 }
 0x446   : > { %v1464_v36 = vsub.f32 %v3913_v59, %v1460_v28  ;;  %3409 = vpow2.f32 %v1314_v35  ;;  %v1617_v55 = vsub.f32 %v3920_v63, %v1615_v51 }
 0x448   : > { %v3977_v25 = vpop.eup %3405  ;;  %v1466_v41 = vmul.f32 1.442695, %v1464_v36  ;;  %v1620_v58 = vmul.f32 1.442695, %v1617_v55 }
 0x449   : > { %v1179_v57 = vsel %vm1166_vm4, %v3977_v25, 0.0  ;;  %v1612_v33 = vpop.xlane.xlu0 %1611 }
 0x44a   : > { %1180 = vadd.xlane.f32.xlu0 %v1179_v57  ;;  %v1616_v45 = vsub.f32 %v3925_v10, %v1612_v33  ;;  %3411 = vpow2.f32 %v1466_v41 }
 0x44b   : > { %3413 = vpow2.f32 %v1316_v46 }
 0x44c   : > { %v3981_v14 = vpop.eup %3407  ;;  %v1618_v53 = vmul.f32 1.442695, %v1616_v45 }
 0x44d   : > { %v1182_v31 = vsel %vm1166_vm4, %v3981_v14, 0.0  ;;  %v1785_v49 = vpop.xlane.xlu0 %1784 }
 0x44e   : > { %2225 = vmax.xlane.f32.xlu0 %v2224_v13  ;;  %1183 = vadd.xlane.f32.xlu1 %v1182_v31  ;;  %v1789_v47 = vsub.f32 %v3936_v29, %v1785_v49  ;;  %3415 = vpow2.f32 %v1618_v53 }
 0x44f   : > { %v1788_v59 = vpop.xlane.xlu1 %1787  ;;  %3417 = vpow2.f32 %v1468_v54 }
 0x450   : > { %v1791_v44 = vmul.f32 1.442695, %v1789_v47  ;;  %v1790_v10 = vsub.f32 %v3941_v39, %v1788_v59  ;;  %v4001_v60 = vpop.eup %3409 }
 0x451   : > { %v1924_v52 = vpop.xlane.xlu0 %1923  ;;  %v1318_v62 = vsel %vm1166_vm4, %v4001_v60, 0.0 }
 0x452   : > { %2228 = vmax.xlane.f32.xlu1 %v2227_v43  ;;  %3419 = vpow2.f32 %v1791_v44  ;;  %v1793_v37 = vmul.f32 1.442695, %v1790_v10  ;;  %v1928_v29 = vsub.f32 %v3944_v40, %v1924_v52 }
 0x453   : > { %v1927_v61 = vpop.xlane.xlu1 %1926  ;;  %3421 = vpow2.f32 %v1620_v58 }
 0x454   : > { %v4006_v63 = vpop.eup %3411  ;;  %3423 = vpow2.f32 %v1793_v37  ;;  %v1930_v6 = vmul.f32 1.442695, %v1928_v29  ;;  %v1929_v39 = vsub.f32 %v3950_v50, %v1927_v61 }
 0x455   : > { %v4008_v3 = vpop.eup %3413  ;;  %v1470_v8 = vsel %vm1166_vm4, %v4006_v63, 0.0  ;;  %v2075_v32 = vpop.xlane.xlu0 %2074 }
 0x456   : > { %v1321_v40 = vsel %vm1166_vm4, %v4008_v3, 0.0  ;;  %3425 = vpow2.f32 %v1930_v6  ;;  %v1932_v15 = vmul.f32 1.442695, %v1929_v39  ;;  %v2079_v33 = vsub.f32 %v3958_v56, %v2075_v32 }
 0x457   : > { %v2078_v11 = vpop.xlane.xlu1 %2077 }
 0x458   : > { %v4013_v9 = vpop.eup %3415  ;;  %v2080_v27 = vsub.f32 %v3963_v2, %v2078_v11  ;;  %3427 = vpow2.f32 %v1932_v15  ;;  %v2081_v34 = vmul.f32 1.442695, %v2079_v33 }
 0x459   : > { %v4017_v12 = vpop.eup %3417  ;;  %v1622_v50 = vsel %vm1166_vm4, %v4013_v9, 0.0 }
 0x45a   : > { %v1473_v21 = vsel %vm1166_vm4, %v4017_v12, 0.0  ;;  %v2083_v22 = vmul.f32 1.442695, %v2080_v27 }
 0x45c   : > { %v4022_v19 = vpop.eup %3419  ;;  %3429 = vpow2.f32 %v2083_v22 }
 0x45d   : > { %v4026_v42 = vpop.eup %3421  ;;  %v1795_v23 = vsel %vm1166_vm4, %v4022_v19, 0.0  ;;  %3431 = vpow2.f32 %v2081_v34 }
 0x45e   : > { %v1625_v2 = vsel %vm1166_vm4, %v4026_v42, 0.0  ;;  %v4032_v24 = vpop.eup %3423 }
 0x45f   : > { %v1798_v57 = vsel %vm1166_vm4, %v4032_v24, 0.0 }
 0x460   : > { %v4036_v13 = vpop.eup %3425 }
 0x461   : > { %v1934_v31 = vsel %vm1166_vm4, %v4036_v13, 0.0 }
 0x462   : > { %v4040_v43 = vpop.eup %3427 }
 0x463   : > { %1482 = vrot.lane.b32.xlu1 %v3802_v20, %s3537_s24  ;;  %v1937_v26 = vsel %vm1166_vm4, %v4040_v43, 0.0 }
 0x464   : > { %1330 = vrot.lane.b32.xlu0 %v3802_v20, %s3536_s21 }
 0x466   : > { %v4044_v28 = vpop.eup %3429 }
 0x467   : > { %v2088_v30 = vsel %vm1166_vm4, %v4044_v28, 0.0  ;;  %v4051_v35 = vpop.eup %3431 }
 0x468   : > { %v2085_v36 = vsel %vm1166_vm4, %v4051_v35, 0.0 }
 0x483   : > { %1319 = vadd.xlane.f32.xlu0 %v1318_v62 }
 0x487   : > { %1471 = vadd.xlane.f32.xlu0 %v1470_v8  ;;  %1322 = vadd.xlane.f32.xlu1 %v1321_v40 }
 0x48b   : > { %1623 = vadd.xlane.f32.xlu0 %v1622_v50  ;;  %1474 = vadd.xlane.f32.xlu1 %v1473_v21 }
 0x48f   : > { %1796 = vadd.xlane.f32.xlu0 %v1795_v23  ;;  %1626 = vadd.xlane.f32.xlu1 %v1625_v2 }
 0x493   : > { %1799 = vadd.xlane.f32.xlu1 %v1798_v57 }
 0x497   : > { %1935 = vadd.xlane.f32.xlu1 %v1934_v31 }
 0x49b   : > { %1938 = vadd.xlane.f32.xlu1 %v1937_v26 }
 0x49f   : > { %2089 = vadd.xlane.f32.xlu1 %v2088_v30 }
 0x4a5   : > { %1634 = vrot.lane.b32.xlu0 %v3802_v20, %s3538_s2 }
 0x4c4   : > { %2086 = vadd.xlane.f32.xlu0 %v2085_v36 }
 0x4d7   : > { %v1181_v38 = vpop.xlane.xlu0 %1180 }
 0x4d8   : > { %3433 = vrcp.f32 %v1181_v38 }
 0x4da   : > { %2097 = vrot.lane.b32.xlu0 %v3800_v18, %s3537_s24 }
 0x4db   : > { %v2226_v41 = vpop.xlane.xlu0 %2225  ;;  %v1184_v45 = vpop.xlane.xlu1 %1183 }
 0x4dc   : > { %v2230_v20 = vsub.f32 %v3970_v16, %v2226_v41  ;;  %3435 = vrcp.f32 %v1184_v45 }
 0x4de   : > { %v2232_v46 = vmul.f32 1.442695, %v2230_v20  ;;  %2248 = vrot.lane.b32.xlu0 %v3800_v18, %s3538_s2 }
 0x4df   : > { %v2229_v56 = vpop.xlane.xlu1 %2228  ;;  %v1331_v44 = vpop.permute.xlu0 %1330 }
 0x4e0   : > { %3437 = vpow2.f32 %v2232_v46  ;;  %v2231_v48 = vsub.f32 %v3973_v17, %v2229_v56 }
 0x4e2   : > { %v2234_v49 = vmul.f32 1.442695, %v2231_v48  ;;  %v3434_v51 = vpop.eup %3433 }
 0x4e3   : > { %v1187_v47 = vmul.f32 %v3434_v51, %v3977_v25 }
 0x4e4   : > { %3439 = vpow2.f32 %v2234_v49 }
 0x4e6   : > { %v3436_v53 = vpop.eup %3435 }
 0x4e7   : > { %v1188_v54 = vmul.f32 %v3436_v53, %v3981_v14  ;;  %v1483_v14 = vpop.permute.xlu1 %1482 }
 0x4e9   : > { %v1189_v16 = vpack.c.bf16 %v1188_v54, %v1187_v47 }
 0x4ea   : > { %v4063_v55 = vpop.eup %3437 }
 0x4eb   : > { %v2236_v59 = vsel %vm1166_vm4, %v4063_v55, 0.0  ;;  %3177 = vmatmul.mubr.msk.bf16.vlgmr.msra.gmra.mrb[8].mxu0 %vm1166_vm4, %v1189_v16 }
 0x4ec   : > { %2237 = vadd.xlane.f32.xlu1 %v2236_v59  ;;  %3187 = vmatpush3.bf16.msra.mxu0 %v1331_v44 }
 0x4ed   : > { %3188 = vmatprep.mubr.msk.bf16.mxu0 %vm3535_vm2, %v3534_v7  ;;  %3198 = vmatprep.subr.bf16.mxu0 %v3534_v7 }
 0x4ee   : > { %v4071_v17 = vpop.eup %3439 }
 0x4ef   : > { %v2239_v25 = vsel %vm1166_vm4, %v4071_v17, 0.0 }
 0x4f0   : > { %2240 = vadd.xlane.f32.xlu1 %v2239_v25 }
 0x501   : > { %1946 = vrot.lane.b32.xlu1 %v3800_v18, %s3536_s21 }
 0x510   : > { %v1320_v58 = vpop.xlane.xlu0 %1319 }
 0x511   : > { %3441 = vrcp.f32 %v1320_v58 }
 0x514   : > { %v1323_v10 = vpop.xlane.xlu1 %1322  ;;  %v1472_v52 = vpop.xlane.xlu0 %1471 }
 0x515   : > { %3443 = vrcp.f32 %v1323_v10 }
 0x518   : > { %v1475_v61 = vpop.xlane.xlu1 %1474  ;;  %v1624_v8 = vpop.xlane.xlu0 %1623 }
 0x519   : > { %3445 = vrcp.f32 %v1475_v61 }
 0x51a   : > { %3447 = vrcp.f32 %v1472_v52 }
 0x51b   : > { %v3442_v37 = vpop.eup %3441 }
 0x51c   : > { %v1627_v29 = vpop.xlane.xlu1 %1626  ;;  %v1326_v6 = vmul.f32 %v3442_v37, %v4001_v60  ;;  %v1797_v50 = vpop.xlane.xlu0 %1796 }
 0x51d   : > { %3449 = vrcp.f32 %v1627_v29 }
 0x51e   : > { %3451 = vrcp.f32 %v1624_v8 }
 0x51f   : > { %v3444_v62 = vpop.eup %3443 }
 0x520   : > { %v1327_v39 = vmul.f32 %v3444_v62, %v4008_v3  ;;  %v1800_v21 = vpop.xlane.xlu1 %1799  ;;  %v1635_v23 = vpop.permute.xlu0 %1634  ;;  %v3367_v62 = vld [vmem:[%s3700_s26] sm:$0xff]  }
 0x521   : > { %3453 = vrcp.f32 %v1800_v21  ;;  %3264 = vmatprep.subr.bf16.mxu1 %v3367_v62  ;;  %v3369_v21 = vld [vmem:[%s3700_s26 + $0x10] sm:$0xff]  }
 0x522   : > { %v1328_v11 = vpack.c.bf16 %v1327_v39, %v1326_v6  ;;  %3455 = vrcp.f32 %v1797_v50  ;;  %3265 = vmatpush3.bf16.msra.mxu1 %v3367_v62  ;;  %v3368_v50 = vld [vmem:[%s3700_s26 + $0x8] sm:$0xff]  }
 0x523   : > { %v3446_v40 = vpop.eup %3445  ;;  %3266 = vmatprep.subr.bf16.mxu1 %v3368_v50 }
 0x524   : > { %3189 = vmatmul.mubr.msk.bf16.vlgmr.msra.gmra.mrb[12].mxu0 %vm1166_vm4, %v1328_v11  ;;  %v3448_v15 = vpop.eup %3447  ;;  %v1479_v27 = vmul.f32 %v3446_v40, %v4017_v12 }
 0x525   : > { %3199 = vmatpush3.bf16.msra.mxu0 %v1483_v14  ;;  %3200 = vmatprep.mubr.msk.bf16.mxu0 %vm3535_vm2, %v3534_v7  ;;  %v1478_v60 = vmul.f32 %v3448_v15, %v4006_v63 }
 0x526   : > { %3210 = vmatprep.subr.bf16.mxu0 %v3534_v7  ;;  %3267 = vmatpush3.bf16.msra.mxu1 %v3368_v50 }
 0x527   : > { %v1480_v3 = vpack.c.bf16 %v1479_v27, %v1478_v60  ;;  %v3450_v22 = vpop.eup %3449  ;;  %3268 = vmatprep.subr.bf16.mxu1 %v3369_v21  ;;  %v3370_v60 = vld [vmem:[%s3700_s26 + $0x18] sm:$0xff]  }
 0x528   : > { %v3452_v2 = vpop.eup %3451  ;;  %v1631_v12 = vmul.f32 %v3450_v22, %v4026_v42 }
 0x529   : > { %v1630_v57 = vmul.f32 %v3452_v2, %v4013_v9  ;;  %v1936_v9 = vpop.xlane.xlu1 %1935 }
 0x52a   : > { %3269 = vmatpush3.bf16.msra.mxu1 %v3369_v21 }
 0x52b   : > { %v1632_v31 = vpack.c.bf16 %v1631_v12, %v1630_v57  ;;  %v3454_v63 = vpop.eup %3453  ;;  %3270 = vmatprep.subr.bf16.mxu1 %v3370_v60  ;;  %v3372_v57 = vld [vmem:[%s3700_s26 + $0x28] sm:$0xff]  }
 0x52c   : > { %3201 = vmatmul.mubr.msk.bf16.vlgmr.msra.gmra.mrb[16].mxu0 %vm1166_vm4, %v1480_v3  ;;  %v3456_v26 = vpop.eup %3455  ;;  %v1804_v30 = vmul.f32 %v3454_v63, %v4032_v24  ;;  %v3371_v3 = vld [vmem:[%s3700_s26 + $0x20] sm:$0xff]   ;;  %v3374_v63 = vld [vmem:[%s3700_s26 + $0x38] sm:$0xff]  }
 0x52d   : > { %3211 = vmatpush3.bf16.msra.mxu0 %v1635_v23  ;;  %3212 = vmatprep.mubr.msk.bf16.mxu0 %vm3535_vm2, %v3534_v7  ;;  %v1803_v42 = vmul.f32 %v3456_v26, %v4022_v19  ;;  %v1939_v33 = vpop.xlane.xlu1 %1938 }
 0x52e   : > { %3222 = vmatprep.subr.bf16.mxu0 %v3534_v7  ;;  %3457 = vrcp.f32 %v1939_v33  ;;  %3271 = vmatpush3.bf16.msra.mxu1 %v3370_v60 }
 0x52f   : > { %v1805_v32 = vpack.c.bf16 %v1804_v30, %v1803_v42  ;;  %3459 = vrcp.f32 %v1936_v9  ;;  %3272 = vmatprep.subr.bf16.mxu1 %v3371_v3 }
 0x532   : > { %3273 = vmatpush3.bf16.msra.mxu1 %v3371_v3 }
 0x533   : > { %3274 = vmatprep.subr.bf16.mxu1 %v3372_v57 }
 0x534   : > { %3213 = vmatmul.mubr.msk.bf16.vlgmr.msra.gmra.mrb[20].mxu0 %vm1166_vm4, %v1632_v31  ;;  %v3373_v31 = vld [vmem:[%s3700_s26 + $0x30] sm:$0xff]  }
 0x535   : > { %3223 = vmatpush3.bf16.msra.mxu0 %v3800_v18  ;;  %3224 = vmatprep.mubr.msk.bf16.mxu0 %vm3535_vm2, %v3534_v7  ;;  %v2090_v18 = vpop.xlane.xlu1 %2089 }
 0x536   : > { %3234 = vmatprep.subr.bf16.mxu0 %v3534_v7  ;;  %3275 = vmatpush3.bf16.msra.mxu1 %v3372_v57 }
 0x537   : > { %3276 = vmatprep.subr.bf16.mxu1 %v3373_v31 }
 0x538   : > { %v3458_v38 = vpop.eup %3457 }
 0x539   : > { %v3460_v41 = vpop.eup %3459  ;;  %v1943_v19 = vmul.f32 %v3458_v38, %v4040_v43 }
 0x53a   : > { %v1942_v45 = vmul.f32 %v3460_v41, %v4036_v13  ;;  %3277 = vmatpush3.bf16.msra.mxu1 %v3373_v31 }
 0x53b   : > { %3278 = vmatprep.subr.bf16.mxu1 %v3374_v63 }
 0x53c   : > { %3225 = vmatmul.mubr.msk.bf16.vlgmr.msra.gmra.mrb[24].mxu0 %vm1166_vm4, %v1805_v32  ;;  %v1944_v46 = vpack.c.bf16 %v1943_v19, %v1942_v45 }
 0x53d   : > { %3236 = vmatprep.mubr.msk.bf16.mxu0 %vm3535_vm2, %v3534_v7 }
 0x53e   : > { %3279 = vmatpush3.bf16.msra.mxu1 %v3374_v63  ;;  %v3375_v63 = vld [vmem:[%s3722_s23] sm:$0xff]  }
 0x551   : > { %v2087_v34 = vpop.xlane.xlu0 %2086 }
 0x552   : > { %3461 = vrcp.f32 %v2087_v34 }
 0x553   : > { %3463 = vrcp.f32 %v2090_v18 }
 0x555   : > { %v2098_v48 = vpop.permute.xlu0 %2097 }
 0x559   : > { %v2249_v47 = vpop.permute.xlu0 %2248 }
 0x55c   : > { %v3462_v56 = vpop.eup %3461 }
 0x55d   : > { %v3464_v49 = vpop.eup %3463  ;;  %v2093_v43 = vmul.f32 %v3462_v56, %v4051_v35 }
 0x55e   : > { %v2094_v13 = vmul.f32 %v3464_v49, %v4044_v28 }
 0x560   : > { %v2095_v51 = vpack.c.bf16 %v2094_v13, %v2093_v43 }
 0x579   : > { %v2238_v36 = vpop.xlane.xlu1 %2237 }
 0x57d   : > { %v2241_v24 = vpop.xlane.xlu1 %2240 }
 0x57e   : > { %3465 = vrcp.f32 %v2241_v24 }
 0x57f   : > { %3467 = vrcp.f32 %v2238_v36 }
 0x581   : > { %v1947_v20 = vpop.permute.xlu1 %1946 }
 0x582   : > { %3235 = vmatpush3.bf16.msra.mxu0 %v1947_v20 }
 0x583   : > { %3246 = vmatprep.subr.bf16.mxu0 %v3534_v7 }
 0x585   : > { %3237 = vmatmul.mubr.msk.bf16.vlgmr.msra.gmra.mrb[28].mxu0 %vm1166_vm4, %v1944_v46 }
 0x586   : > { %3247 = vmatpush3.bf16.msra.mxu0 %v2098_v48  ;;  %3248 = vmatprep.mubr.msk.bf16.mxu0 %vm3535_vm2, %v3534_v7 }
 0x587   : > { %3258 = vmatprep.subr.bf16.mxu0 %v3534_v7 }
 0x588   : > { %v3466_v53 = vpop.eup %3465 }
 0x589   : > { %v3468_v54 = vpop.eup %3467  ;;  %v2245_v16 = vmul.f32 %v3466_v53, %v4071_v17 }
 0x58a   : > { %v2244_v59 = vmul.f32 %v3468_v54, %v4063_v55 }
 0x58c   : > { %v2246_v44 = vpack.c.bf16 %v2245_v16, %v2244_v59  ;;  %v3066_v59 = vld [vmem:[%s4316_s18] ss:$0 sm:$0xff] }
 0x58d   : > { %3249 = vmatmul.mubr.msk.bf16.vlgmr.msra.gmra.mrb[32].mxu0 %vm1166_vm4, %v2095_v51 }
 0x58e   : > { %3259 = vmatpush3.bf16.msra.mxu0 %v2249_v47  ;;  %3260 = vmatprep.mubr.msk.bf16.mxu0 %vm3535_vm2, %v3534_v7 }
 0x58f   : > { %3284 = vmatprep.subr.bf16.mxu0 %v3375_v63 }
 0x595   : > { %3261 = vmatmul.mubr.msk.bf16.vlgmr.msra.gmra.mrb[36].mxu0 %vm1166_vm4, %v2246_v44 }
 0x596   : > { %3285 = vmatpush3.bf16.msra.mxu0 %v3375_v63 }
 0x5be   : > { %v1227_v35 = vpop.f32.mrb[8].mxu0 }
 0x5bf   : > { %1234 = vst.msk [vmem:[#allocation3] sm:$0xff] %vm764_vm1, %v1227_v35  ;;  %v3178_v28 = vpop.f32.mrb[9].mxu0 }
 0x5c0   : > { %v1230_v25 = vpop.f32.mrb[10].mxu0 }
 0x5c1   : > { %1235 = vst.msk [vmem:[#allocation3 + $0x8] sm:$0xff] %vm764_vm1, %v1230_v25  ;;  %v3179_v14 = vpop.f32.mrb[11].mxu0 }
 0x5f7   : > { %v1370_v58 = vpop.f32.mrb[12].mxu0 }
 0x5f8   : > { %1379 = vrot.lane.b32.xlu0 %v1370_v58, %s3538_s2  ;;  %v3190_v7 = vpop.f32.mrb[13].mxu0 }
 0x5f9   : > { %v1373_v10 = vpop.f32.mrb[14].mxu0 }
 0x5fa   : > { %v3191_v17 = vpop.f32.mrb[15].mxu0 }
 0x5fc   : > { %1381 = vrot.lane.b32.xlu0 %v1373_v10, %s3538_s2 }
 0x5ff   : > { %v1522_v55 = vpop.f32.mrb[16].mxu0 }
 0x600   : > { %1531 = vrot.lane.b32.xlu1 %v1522_v55, %s3537_s24  ;;  %v3202_v52 = vpop.f32.mrb[17].mxu0 }
 0x601   : > { %v1525_v61 = vpop.f32.mrb[18].mxu0 }
 0x602   : > { %1533 = vrot.lane.b32.xlu0 %v1525_v61, %s3537_s24  ;;  %v3203_v37 = vpop.f32.mrb[19].mxu0 }
 0x607   : > { %v1674_v29 = vpop.f32.mrb[20].mxu0 }
 0x608   : > { %1683 = vrot.lane.b32.xlu1 %v1674_v29, %s3536_s21  ;;  %v3214_v6 = vpop.f32.mrb[21].mxu0 }
 0x609   : > { %v1677_v39 = vpop.f32.mrb[22].mxu0 }
 0x60a   : > { %1685 = vrot.lane.b32.xlu0 %v1677_v39, %s3536_s21  ;;  %v3215_v8 = vpop.f32.mrb[23].mxu0 }
 0x60f   : > { %v1843_v11 = vpop.f32.mrb[24].mxu0 }
 0x610   : > { %1850 = vst.msk [vmem:[#allocation3 + $0x10] sm:$0xff] %vm764_vm1, %v1843_v11  ;;  %v3226_v40 = vpop.f32.mrb[25].mxu0 }
 0x611   : > { %v1846_v15 = vpop.f32.mrb[26].mxu0 }
 0x612   : > { %1851 = vst.msk [vmem:[#allocation3 + $0x18] sm:$0xff] %vm764_vm1, %v1846_v15  ;;  %v3227_v27 = vpop.f32.mrb[27].mxu0 }
 0x658   : > { %v1986_v22 = vpop.f32.mrb[28].mxu0 }
 0x659   : > { %1995 = vrot.lane.b32.xlu1 %v1986_v22, %s3538_s2  ;;  %v3238_v23 = vpop.f32.mrb[29].mxu0 }
 0x65a   : > { %v1989_v2 = vpop.f32.mrb[30].mxu0 }
 0x65b   : > { %1997 = vrot.lane.b32.xlu0 %v1989_v2, %s3538_s2  ;;  %v3239_v12 = vpop.f32.mrb[31].mxu0 }
 0x660   : > { %v2137_v26 = vpop.f32.mrb[32].mxu0 }
 0x661   : > { %2146 = vrot.lane.b32.xlu1 %v2137_v26, %s3537_s24  ;;  %v3250_v30 = vpop.f32.mrb[33].mxu0  ;;  %v3376_v26 = vld [vmem:[%s3722_s23 + $0x8] sm:$0xff]  }
 0x662   : > { %v2140_v42 = vpop.f32.mrb[34].mxu0  ;;  %3286 = vmatprep.subr.bf16.mxu0 %v3376_v26 }
 0x663   : > { %2148 = vrot.lane.b32.xlu0 %v2140_v42, %s3537_s24  ;;  %v3251_v32 = vpop.f32.mrb[35].mxu0  ;;  %3287 = vmatpush3.bf16.msra.mxu0 %v3376_v26 }
 0x668   : > { %v2288_v9 = vpop.f32.mrb[36].mxu0 }
 0x669   : > { %2297 = vrot.lane.b32.xlu1 %v2288_v9, %s3536_s21  ;;  %v3262_v33 = vpop.f32.mrb[37].mxu0 }
 0x66a   : > { %v2291_v18 = vpop.f32.mrb[38].mxu0  ;;  %v1380_v34 = vpop.permute.xlu0 %1379 }
 0x66b   : > { %1386 = vst.msk [vmem:[#allocation3] sm:$0xff] %vm1385_vm5, %v1380_v34  ;;  %2299 = vrot.lane.b32.xlu0 %v2291_v18, %s3536_s21  ;;  %v3263_v36 = vpop.f32.mrb[39].mxu0 }
 0x66e   : > { %v1382_v38 = vpop.permute.xlu0 %1381 }
 0x66f   : > { %1387 = vst.msk [vmem:[#allocation3 + $0x8] sm:$0xff] %vm1385_vm5, %v1382_v38 }
 0x672   : > { %v1532_v24 = vpop.permute.xlu1 %1531 }
 0x673   : > { %1538 = vst.msk [vmem:[#allocation3] sm:$0xff] %vm1537_vm6, %v1532_v24 }
 0x674   : > { %v1534_v41 = vpop.permute.xlu0 %1533 }
 0x675   : > { %1539 = vst.msk [vmem:[#allocation3 + $0x8] sm:$0xff] %vm1537_vm6, %v1534_v41 }
 0x67a   : > { %v1684_v19 = vpop.permute.xlu1 %1683 }
 0x67b   : > { %1690 = vst.msk [vmem:[#allocation3] sm:$0xff] %vm1689_vm7, %v1684_v19 }
 0x67c   : > { %v1686_v45 = vpop.permute.xlu0 %1685 }
 0x67d   : > { %1691 = vst.msk [vmem:[#allocation3 + $0x8] sm:$0xff] %vm1689_vm7, %v1686_v45 }
 0x682   : > { %v2305_v20 = vld [vmem:[#allocation3] sm:$0xff] }
 0x684   : > { %v2306_v46 = vld [vmem:[#allocation3 + $0x8] sm:$0xff] }
 0x685   : > { %v2309_v56 = vpack.c.bf16 %v2306_v46, %v2305_v20  ;;  %v3075_v20 = vld [vmem:[%s4317_s20] ss:$0 sm:$0xff] }
 0x687   : > { %3280 = vmatprep.mubr.bf16.mxu1 %v2309_v56 }
 0x6cb   : > { %v1996_v48 = vpop.permute.xlu1 %1995 }
 0x6cc   : > { %2001 = vst.msk [vmem:[#allocation3 + $0x10] sm:$0xff] %vm1385_vm5, %v1996_v48 }
 0x6cd   : > { %v1998_v49 = vpop.permute.xlu0 %1997 }
 0x6ce   : > { %2002 = vst.msk [vmem:[#allocation3 + $0x18] sm:$0xff] %vm1385_vm5, %v1998_v49 }
 0x6d3   : > { %v2147_v43 = vpop.permute.xlu1 %2146 }
 0x6d4   : > { %2152 = vst.msk [vmem:[#allocation3 + $0x10] sm:$0xff] %vm1537_vm6, %v2147_v43  ;;  %v3076_v43 = vld [vmem:[%s721_s1] ss:$0 sm:$0xff] }
 0x6d5   : > { %v2149_v13 = vpop.permute.xlu0 %2148 }
 0x6d6   : > { %2153 = vst.msk [vmem:[#allocation3 + $0x18] sm:$0xff] %vm1537_vm6, %v2149_v13 }
 0x6db   : > { %v2298_v51 = vpop.permute.xlu1 %2297 }
 0x6dc   : > { %2303 = vst.msk [vmem:[#allocation3 + $0x10] sm:$0xff] %vm1689_vm7, %v2298_v51 }
 0x6dd   : > { %v2300_v53 = vpop.permute.xlu0 %2299 }
 0x6de   : > { %2304 = vst.msk [vmem:[#allocation3 + $0x18] sm:$0xff] %vm1689_vm7, %v2300_v53 }
 0x6e3   : > { %v2307_v47 = vld [vmem:[#allocation3 + $0x10] sm:$0xff] }
 0x6e5   : > { %v2308_v54 = vld [vmem:[#allocation3 + $0x18] sm:$0xff] }
 0x6e6   : > { %v2310_v16 = vpack.c.bf16 %v2308_v54, %v2307_v47 }
 0x6e8   : > { %3281 = vmatmul.mubr.bf16.vlgmr.msra.gmra.mrb[36].mxu1 %v2310_v16 }
 0x7bb   : > { %v3282_v44 = vpop.f32.mrb[36].mxu1 }
 0x7bc   : > { %v2416_v35 = vpop.f32.mrb[37].mxu1  ;;  %v2425_v7 = vadd.f32 %v3282_v44, %v3066_v59 }
 0x7bd   : > { %v2417_v28 = vadd.f32 %v3066_v59, %v2416_v35  ;;  %v3283_v25 = vpop.f32.mrb[38].mxu1 }
 0x7be   : > { %v2428_v14 = vadd.f32 %v3283_v25, %v3066_v59  ;;  %v2419_v58 = vpop.f32.mrb[39].mxu1  ;;  %v2433_v29 = vadd.f32 %v2425_v7, %v3782_v4  ;;  %v3377_v7 = vld [vmem:[%s3728_s14] sm:$0xff]  }
 0x7bf   : > { %v2420_v10 = vadd.f32 %v3066_v59, %v2419_v58  ;;  %v2431_v17 = vadd.f32 %v2417_v28, %v3774_v0  ;;  %3292 = vmatprep.subr.bf16.mxu0 %v3377_v7 }
 0x7c0   : > { %v2434_v61 = vadd.f32 %v2428_v14, %v3784_v5  ;;  %v2443_v6 = vsel %vm764_vm1, %v2433_v29, 0.0 }
 0x7c1   : > { %v2437_v55 = vsel %vm764_vm1, %v2431_v17, 0.0  ;;  %v2432_v52 = vadd.f32 %v2420_v10, %v3776_v1  ;;  %v3378_v10 = vld [vmem:[%s3728_s14 + $0x8] sm:$0xff]  }
 0x7c2   : > { %2438 = vadd.xlane.f32.xlu1 %v2437_v55  ;;  %v2446_v62 = vsel %vm764_vm1, %v2434_v61, 0.0  ;;  %v3380_v55 = vld [vmem:[%s3728_s14 + $0x18] sm:$0xff]  }
 0x7c3   : > { %v2440_v37 = vsel %vm764_vm1, %v2432_v52, 0.0 }
 0x7c4   : > { %2441 = vadd.xlane.f32.xlu0 %v2440_v37 }
 0x7c6   : > { %2447 = vadd.xlane.f32.xlu1 %v2446_v62 }
 0x7c8   : > { %2444 = vadd.xlane.f32.xlu0 %v2443_v6 }
 0x84f   : > { %v2439_v39 = vpop.xlane.xlu1 %2438 }
 0x850   : > { %v2449_v0 = vmul.f32 0.03125, %v2439_v39 }
 0x851   : > { %v2442_v8 = vpop.xlane.xlu0 %2441 }
 0x852   : > { %v2453_v11 = vsub.f32 %v2431_v17, %v2449_v0  ;;  %v2450_v40 = vmul.f32 0.03125, %v2442_v8  ;;  %v3379_v17 = vld [vmem:[%s3728_s14 + $0x10] sm:$0xff]  }
 0x853   : > { %v2448_v1 = vpop.xlane.xlu1 %2447 }
 0x854   : > { %v2454_v15 = vsub.f32 %v2432_v52, %v2450_v40  ;;  %v2452_v5 = vmul.f32 0.03125, %v2448_v1  ;;  %v2457_v27 = vmul.f32 %v2453_v11, %v2453_v11  ;;  %v3077_v52 = vld [vmem:[%s729_s5] ss:$0 sm:$0xff] }
 0x855   : > { %v2445_v50 = vpop.xlane.xlu0 %2444 }
 0x856   : > { %v2456_v21 = vsub.f32 %v2434_v61, %v2452_v5  ;;  %v2451_v4 = vmul.f32 0.03125, %v2445_v50  ;;  %v2461_v60 = vsel %vm764_vm1, %v2457_v27, 0.0  ;;  %v2458_v3 = vmul.f32 %v2454_v15, %v2454_v15 }
 0x857   : > { %2462 = vadd.xlane.f32.xlu0 %v2461_v60 }
 0x858   : > { %v2455_v22 = vsub.f32 %v2433_v29, %v2451_v4  ;;  %v2464_v23 = vsel %vm764_vm1, %v2458_v3, 0.0  ;;  %v2460_v2 = vmul.f32 %v2456_v21, %v2456_v21 }
 0x859   : > { %2465 = vadd.xlane.f32.xlu1 %v2464_v23 }
 0x85a   : > { %v2459_v12 = vmul.f32 %v2455_v22, %v2455_v22  ;;  %v2470_v31 = vsel %vm764_vm1, %v2460_v2, 0.0 }
 0x85c   : > { %v2467_v57 = vsel %vm764_vm1, %v2459_v12, 0.0 }
 0x85d   : > { %2468 = vadd.xlane.f32.xlu0 %v2467_v57  ;;  %2471 = vadd.xlane.f32.xlu1 %v2470_v31 }
 0x8e4   : > { %v2463_v30 = vpop.xlane.xlu0 %2462 }
 0x8e5   : > { %v2473_v42 = vmul.f32 0.03125, %v2463_v30 }
 0x8e6   : > { %v2466_v32 = vpop.xlane.xlu1 %2465 }
 0x8e7   : > { %v2477_v9 = vadd.f32 1e-05, %v2473_v42  ;;  %v2474_v33 = vmul.f32 0.03125, %v2466_v32 }
 0x8e9   : > { %3469 = vrsqrt.f32 %v2477_v9  ;;  %v2478_v18 = vadd.f32 1e-05, %v2474_v33 }
 0x8ea   : > { %v2469_v34 = vpop.xlane.xlu0 %2468  ;;  %v2472_v36 = vpop.xlane.xlu1 %2471 }
 0x8eb   : > { %3471 = vrsqrt.f32 %v2478_v18  ;;  %v2475_v38 = vmul.f32 0.03125, %v2469_v34  ;;  %v2476_v24 = vmul.f32 0.03125, %v2472_v36 }
 0x8ed   : > { %v2479_v41 = vadd.f32 1e-05, %v2475_v38  ;;  %v2480_v19 = vadd.f32 1e-05, %v2476_v24 }
 0x8ef   : > { %3473 = vrsqrt.f32 %v2479_v41 }
 0x8f0   : > { %3475 = vrsqrt.f32 %v2480_v19 }
 0x8f3   : > { %v3470_v45 = vpop.eup %3469 }
 0x8f4   : > { %v2485_v46 = vmul.f32 %v3470_v45, %v2453_v11 }
 0x8f5   : > { %v3472_v56 = vpop.eup %3471 }
 0x8f6   : > { %v2486_v48 = vmul.f32 %v3472_v56, %v2454_v15  ;;  %v2495_v49 = vmul.f32 %v3075_v20, %v2485_v46 }
 0x8f8   : > { %v2496_v13 = vmul.f32 %v3075_v20, %v2486_v48  ;;  %v4181_v54 = vadd.f32 %v3076_v43, %v2495_v49 }
 0x8f9   : > { %v3474_v51 = vpop.eup %3473 }
 0x8fa   : > { %v3476_v53 = vpop.eup %3475  ;;  %v2487_v47 = vmul.f32 %v3474_v51, %v2455_v22  ;;  %v4183_v16 = vadd.f32 %v3076_v43, %v2496_v13 }
 0x8fb   : > { %v2488_v59 = vmul.f32 %v3476_v53, %v2456_v21 }
 0x8fc   : > { %v2497_v44 = vmul.f32 %v3075_v20, %v2487_v47  ;;  %v2509_v35 = vpack.c.bf16 %v4183_v16, %v4181_v54 }
 0x8fd   : > { %v2498_v28 = vmul.f32 %v3075_v20, %v2488_v59 }
 0x8fe   : > { %3288 = vmatprep.mubr.msk.bf16.mxu0 %vm764_vm1, %v2509_v35  ;;  %v4188_v25 = vadd.f32 %v3076_v43, %v2497_v44 }
 0x8ff   : > { %v4190_v14 = vadd.f32 %v3076_v43, %v2498_v28 }
 0x901   : > { %v2510_v58 = vpack.c.bf16 %v4190_v14, %v4188_v25 }
 0x903   : > { %3289 = vmatmul.mubr.msk.bf16.vlgmr.msra.gmra.mrb[40].mxu0 %vm764_vm1, %v2510_v58 }
 0x904   : > { %3293 = vmatpush3.bf16.msra.mxu0 %v3377_v7 }
 0x905   : > { %3294 = vmatprep.subr.bf16.mxu0 %v3378_v10 }
 0x908   : > { %3295 = vmatpush3.bf16.msra.mxu0 %v3378_v10 }
 0x909   : > { %3296 = vmatprep.subr.bf16.mxu0 %v3379_v17 }
 0x90c   : > { %3297 = vmatpush3.bf16.msra.mxu0 %v3379_v17 }
 0x90d   : > { %3298 = vmatprep.subr.bf16.mxu0 %v3380_v55 }
 0x910   : > { %3299 = vmatpush3.bf16.msra.mxu0 %v3380_v55 }
 0x9d6   : > { %v3290_v61 = vpop.f32.mrb[40].mxu0 }
 0x9d7   : > { %v4204_v37 = vadd.f32 %v3290_v61, %v3077_v52  ;;  %v2574_v29 = vpop.f32.mrb[41].mxu0 }
 0x9d8   : > { %v4206_v62 = vadd.f32 %v3077_v52, %v2574_v29  ;;  %v3291_v6 = vpop.f32.mrb[42].mxu0 }
 0x9d9   : > { %v4209_v39 = vmul.f32 0.70710677, %v4204_v37  ;;  %v4211_v0 = vadd.f32 %v3291_v6, %v3077_v52  ;;  %v2577_v8 = vpop.f32.mrb[43].mxu0 }
 0x9da   : > { %v4214_v11 = vmul.f32 0.70710677, %v4206_v62  ;;  %v4216_v40 = vadd.f32 %v3077_v52, %v2577_v8 }
 0x9db   : > { %v2599_v1 = vand.u32 2147483647, %v4209_v39  ;;  %v4220_v15 = vmul.f32 0.70710677, %v4211_v0  ;;  %vm2679_vm8 = vcmp.ge.f32.partialorder %v4209_v39, 0.0 }
 0x9dc   : > { %v2597_v5 = vand.u32 2147483647, %v4214_v11  ;;  %v4224_v27 = vmul.f32 0.70710677, %v4216_v40  ;;  %vm2677_vm9 = vcmp.ge.f32.partialorder %v4214_v11, 0.0 }
 0x9dd   : > { %v2603_v50 = vmul.f32 0.3275911, %v2599_v1  ;;  %v2600_v21 = vand.u32 2147483647, %v4220_v15  ;;  %v2655_v31 = vsub.f32 0.0, %v2599_v1  ;;  %vm2680_vm10 = vcmp.ge.f32.partialorder %v4220_v15, 0.0 }
 0x9de   : > { %v2601_v4 = vmul.f32 0.3275911, %v2597_v5  ;;  %v2598_v60 = vand.u32 2147483647, %v4224_v27  ;;  %v2653_v63 = vsub.f32 0.0, %v2597_v5  ;;  %vm2678_vm11 = vcmp.ge.f32.partialorder %v4224_v27, 0.0 }
 0x9df   : > { %v2607_v3 = vadd.f32 1.0, %v2603_v50  ;;  %v2604_v22 = vmul.f32 0.3275911, %v2600_v21  ;;  %v2659_v30 = vmul.f32 %v2655_v31, %v2599_v1  ;;  %v2656_v42 = vsub.f32 0.0, %v2600_v21 }
 0x9e0   : > { %v2605_v23 = vadd.f32 1.0, %v2601_v4  ;;  %v2602_v2 = vmul.f32 0.3275911, %v2598_v60  ;;  %v2657_v33 = vmul.f32 %v2653_v63, %v2597_v5  ;;  %v2654_v34 = vsub.f32 0.0, %v2598_v60 }
 0x9e1   : > { %3477 = vrcp.f32 %v2607_v3  ;;  %v2608_v12 = vadd.f32 1.0, %v2604_v22  ;;  %v2665_v24 = vmul.f32 1.442695, %v2659_v30  ;;  %v2660_v19 = vmul.f32 %v2656_v42, %v2600_v21 }
 0x9e2   : > { %3479 = vrcp.f32 %v2605_v23  ;;  %v2606_v57 = vadd.f32 1.0, %v2602_v2  ;;  %v2661_v20 = vmul.f32 1.442695, %v2657_v33  ;;  %v2658_v49 = vmul.f32 %v2654_v34, %v2598_v60 }
 0x9e3   : > { %3481 = vrcp.f32 %v2608_v12  ;;  %v2667_v47 = vmul.f32 1.442695, %v2660_v19 }
 0x9e4   : > { %3483 = vrcp.f32 %v2606_v57  ;;  %v2663_v58 = vmul.f32 1.442695, %v2658_v49 }
 0x9e5   : > { %3485 = vpow2.f32 %v2665_v24 }
 0x9e6   : > { %3487 = vpow2.f32 %v2661_v20 }
 0x9e7   : > { %3489 = vpow2.f32 %v2667_v47 }
 0x9e8   : > { %3491 = vpow2.f32 %v2663_v58 }
 0x9eb   : > { %v3478_v26 = vpop.eup %3477 }
 0x9ec   : > { %v3480_v32 = vpop.eup %3479  ;;  %v2619_v9 = vmul.f32 1.0614054, %v3478_v26 }
 0x9ed   : > { %v2617_v18 = vmul.f32 1.0614054, %v3480_v32  ;;  %v3482_v38 = vpop.eup %3481 }
 0x9ee   : > { %v2623_v36 = vadd.f32 -1.4531521, %v2619_v9  ;;  %v2620_v46 = vmul.f32 1.0614054, %v3482_v38  ;;  %v3484_v56 = vpop.eup %3483 }
 0x9ef   : > { %v2621_v41 = vadd.f32 -1.4531521, %v2617_v18  ;;  %v2618_v51 = vmul.f32 1.0614054, %v3484_v56  ;;  %v3486_v3 = vpop.eup %3485 }
 0x9f0   : > { %v2627_v45 = vmul.f32 %v3478_v26, %v2623_v36  ;;  %v2624_v13 = vadd.f32 -1.4531521, %v2620_v46  ;;  %v3488_v23 = vpop.eup %3487 }
 0x9f1   : > { %v2625_v48 = vmul.f32 %v3480_v32, %v2621_v41  ;;  %v2622_v35 = vadd.f32 -1.4531521, %v2618_v51  ;;  %v3490_v9 = vpop.eup %3489  ;;  %v2589_v51 = vmul.f32 0.5, %v4206_v62  ;;  %v3082_v62 = vld [vmem:[%s737_s25] ss:$0 sm:$0xff] }
 0x9f2   : > { %v2631_v43 = vadd.f32 1.4214138, %v2627_v45  ;;  %v2628_v44 = vmul.f32 %v3482_v38, %v2624_v13  ;;  %v3492_v24 = vpop.eup %3491  ;;  %v2592_v13 = vmul.f32 0.5, %v4211_v0 }
 0x9f3   : > { %v2629_v53 = vadd.f32 1.4214138, %v2625_v48  ;;  %v2626_v17 = vmul.f32 %v3484_v56, %v2622_v35 }
 0x9f4   : > { %v2635_v59 = vmul.f32 %v3478_v26, %v2631_v43  ;;  %v2632_v10 = vadd.f32 1.4214138, %v2628_v44 }
 0x9f5   : > { %v2633_v28 = vmul.f32 %v3480_v32, %v2629_v53  ;;  %v2630_v29 = vadd.f32 1.4214138, %v2626_v17 }
 0x9f6   : > { %v2639_v7 = vadd.f32 -0.28449672, %v2635_v59  ;;  %v2636_v61 = vmul.f32 %v3482_v38, %v2632_v10  ;;  %v2590_v59 = vmul.f32 0.5, %v4216_v40 }
 0x9f7   : > { %v2637_v55 = vadd.f32 -0.28449672, %v2633_v28  ;;  %v2634_v5 = vmul.f32 %v3484_v56, %v2630_v29 }
 0x9f8   : > { %v2643_v52 = vmul.f32 %v3478_v26, %v2639_v7  ;;  %v2640_v1 = vadd.f32 -0.28449672, %v2636_v61 }
 0x9f9   : > { %v2641_v6 = vmul.f32 %v3480_v32, %v2637_v55  ;;  %v2638_v60 = vadd.f32 -0.28449672, %v2634_v5 }
 0x9fa   : > { %v2647_v8 = vadd.f32 0.2548296, %v2643_v52  ;;  %v2644_v4 = vmul.f32 %v3482_v38, %v2640_v1 }
 0x9fb   : > { %v2645_v50 = vadd.f32 0.2548296, %v2641_v6  ;;  %v2642_v57 = vmul.f32 %v3484_v56, %v2638_v60 }
 0x9fc   : > { %v2651_v21 = vmul.f32 %v3478_v26, %v2647_v8  ;;  %v2648_v12 = vadd.f32 0.2548296, %v2644_v4 }
 0x9fd   : > { %v2649_v22 = vmul.f32 %v3480_v32, %v2645_v50  ;;  %v2646_v42 = vadd.f32 0.2548296, %v2642_v57 }
 0x9fe   : > { %v2671_v2 = vmul.f32 %v3486_v3, %v2651_v21  ;;  %v2652_v30 = vmul.f32 %v3482_v38, %v2648_v12  ;;  %v2591_v38 = vmul.f32 0.5, %v4204_v37 }
 0x9ff   : > { %v2669_v31 = vmul.f32 %v3488_v23, %v2649_v22  ;;  %v2650_v36 = vmul.f32 %v3484_v56, %v2646_v42 }
 0xa00   : > { %v2675_v63 = vsub.f32 1.0, %v2671_v2  ;;  %v2672_v34 = vmul.f32 %v3490_v9, %v2652_v30 }
 0xa01   : > { %v2673_v33 = vsub.f32 1.0, %v2669_v31  ;;  %v2670_v32 = vmul.f32 %v3492_v24, %v2650_v36 }
 0xa02   : > { %v2683_v18 = vsub.f32 0.0, %v2675_v63  ;;  %v2676_v19 = vsub.f32 1.0, %v2672_v34 }
 0xa03   : > { %v2681_v26 = vsub.f32 0.0, %v2673_v33  ;;  %v2674_v46 = vsub.f32 1.0, %v2670_v32 }
 0xa04   : > { %v2687_v41 = vsel %vm2679_vm8, %v2675_v63, %v2683_v18  ;;  %v2684_v20 = vsub.f32 0.0, %v2676_v19 }
 0xa05   : > { %v2685_v45 = vsel %vm2677_vm9, %v2673_v33, %v2681_v26  ;;  %v2691_v48 = vadd.f32 1.0, %v2687_v41  ;;  %v2682_v43 = vsub.f32 0.0, %v2674_v46 }
 0xa06   : > { %v2688_v49 = vsel %vm2680_vm10, %v2676_v19, %v2684_v20  ;;  %v2689_v56 = vadd.f32 1.0, %v2685_v45 }
 0xa07   : > { %v2692_v39 = vadd.f32 1.0, %v2688_v49  ;;  %v2686_v11 = vsel %vm2678_vm11, %v2674_v46, %v2682_v43  ;;  %v2695_v53 = vmul.f32 %v2691_v48, %v2591_v38 }
 0xa08   : > { %v2690_v44 = vadd.f32 1.0, %v2686_v11  ;;  %v2693_v15 = vmul.f32 %v2689_v56, %v2589_v51 }
 0xa09   : > { %v2696_v47 = vmul.f32 %v2692_v39, %v2592_v13 }
 0xa0a   : > { %v2694_v37 = vmul.f32 %v2690_v44, %v2590_v59 }
 0xa0b   : > { %v2698_v35 = vpack.c.bf16 %v2696_v47, %v2695_v53 }
 0xa0c   : > { %v2697_v28 = vpack.c.bf16 %v2694_v37, %v2693_v15 }
 0xa0e   : > { %3300 = vmatprep.mubr.msk.bf16.mxu0 %vm2738_vm12, %v2697_v28 }
 0xa0f   : > { %3301 = vmatmul.mubr.msk.bf16.vlgmr.msra.gmra.mrb[44].mxu0 %vm2738_vm12, %v2698_v35 }
 0xae2   : > { %v3302_v0 = vpop.f32.mrb[44].mxu0 }
 0xae3   : > { %v2779_v27 = vpop.f32.mrb[45].mxu0  ;;  %v2788_v7 = vadd.f32 %v3302_v0, %v3082_v62 }
 0xae4   : > { %v2780_v40 = vadd.f32 %v3082_v62, %v2779_v27  ;;  %v3303_v58 = vpop.f32.mrb[46].mxu0 }
 0xae5   : > { %v2782_v10 = vpop.f32.mrb[47].mxu0  ;;  %v2791_v55 = vadd.f32 %v3303_v58, %v3082_v62  ;;  %v2796_v29 = vadd.f32 %v2788_v7, %v4188_v25 }
 0xae6   : > { %v2794_v17 = vadd.f32 %v2780_v40, %v4181_v54  ;;  %v2783_v52 = vadd.f32 %v3082_v62, %v2782_v10 }
 0xae7   : > { %v2797_v6 = vadd.f32 %v2791_v55, %v4190_v14  ;;  %2800 = vst.msk [vmem:[%s3667_s19 + $0x10] sm:$0xff] %vm764_vm1, %v2796_v29 }
 0xae8   : > { %2798 = vst.msk [vmem:[%s3667_s19] sm:$0xff] %vm764_vm1, %v2794_v17  ;;  %v2795_v61 = vadd.f32 %v2783_v52, %v4183_v16 }
 0xae9   : > { %2801 = vst.msk [vmem:[%s3667_s19 + $0x18] sm:$0xff] %vm764_vm1, %v2797_v6 }
 0xaea   : > { %2799 = vst.msk [vmem:[%s3667_s19 + $0x8] sm:$0xff] %vm764_vm1, %v2795_v61 }
 0xaeb PF: > { %s4319_s22 = sld [smem:[#allocation6_spill]]  ;;  %s4320_s18 = sld [smem:[#allocation4_spill]] }
 0xaec   : > { %s4321_s19 = sld [smem:[#allocation5_spill]]  ;;  %s4322_s20 = sld [smem:[#allocation7_spill]] }
 0xaed   : > { %s4323_s21 = sld [smem:[#allocation8_spill]] }
 0xaf1   : > { %s25_s22 = sadd.s32 1, %s4319_s22  }
 0xaf2   : > { %p22_p9 = scmp.ge.s32.totalorder %s25_s22, 6  }
 0xaf4   :  { %24 = sbr.rel (!%p22_p9) target bundleno = 9 (0x9), region = 157 }

</bundles_post_ra>
